<compile_context>
chip_gen: v5e
topology: v5e:2x2
jax: 0.10.0
libtpu: 0.0.40
codegen_flags: <defaults>
</compile_context>

<pallas_src>
import functools

import jax
import jax.numpy as jnp
from jax import lax
from jax.experimental import pallas as pl
from jax.experimental.pallas import tpu as pltpu


# ----------------------------------------------------------------- helpers

def _mish(y):
    # numerically-stable softplus, then Mish: y * tanh(softplus(y))
    sp = jnp.log1p(jnp.exp(-jnp.abs(y))) + jnp.maximum(y, 0.0)
    return y * jnp.tanh(sp)


def _tap_selectors(L):
    """0/1 matrices S_t (L, L//2) with S_t[j, l] = [j == 2l + t - 1].

    z(C, L) @ S_t gives the t-th tap of a k=3 / pad=1 / stride=2 conv (zero
    padded), i.e. the shift + stride-2 downsample expressed purely as MXU
    matmuls.  The leading (L', L'//2) block of S_t is the selector for any
    shorter length L', so one set of selectors serves every pyramid layer.
    """
    j = jnp.arange(L)[:, None]
    l = jnp.arange(L // 2)[None, :]
    return [(j == 2 * l + (t - 1)).astype(jnp.float32) for t in range(3)]


def _fold_conv_bn(w, b, gamma, beta, mean, var, eps=1e-5):
    """Fold eval-mode BatchNorm1d (+ conv bias) into a tap-stacked weight.

    Returns (w_stack, shift): w_stack (3*Cout, Cin) with rows
    [t*Cout:(t+1)*Cout] = scale * w[:, :, t]; shift (Cout, 1).
    """
    scale = gamma / jnp.sqrt(var + eps)                   # (Cout,)
    w_f = w * scale[:, None, None]                        # (Cout, Cin, 3)
    shift = b * scale + beta - mean * scale               # (Cout,)
    w_stack = jnp.concatenate([w_f[:, :, t] for t in range(3)], axis=0)
    return w_stack, shift[:, None]


def _fold_pool_linear(wl, c_last, l_last, pool_sz, desc_sz):
    """Fold AdaptiveAvgPool1d(pool_sz) + Flatten into the Linear weight.

    Returns W (c_last*l_last, desc) with
      W[c*l_last + l, d] = wl[d, c*pool_sz + l//k] / k,   k = l_last // pool_sz
    so that  flatten_rowmajor(h) @ W  reproduces pool + flatten + linear.
    """
    k = l_last // pool_sz
    cols = (jnp.arange(c_last)[:, None] * pool_sz
            + jnp.arange(l_last)[None, :] // k)           # (C, L_last)
    w = wl[:, cols] / k                                   # (desc, C, L_last)
    return jnp.transpose(w, (1, 2, 0)).reshape(c_last * l_last, desc_sz)


# ------------------------------------------------------------------ kernel

def _make_kernel(num_convs):
    def kernel(*refs):
        x_ref = refs[0]
        s_refs = refs[1:4]                         # 3 tap-selector matrices
        layer_refs = refs[4:4 + 2 * num_convs]     # (w_stack, shift) per layer
        wl_ref, bl_ref, o_ref = refs[4 + 2 * num_convs:]

        h = x_ref[0]                               # (1, L): channels x length
        for i in range(num_convs):
            wz_ref = layer_refs[2 * i]             # (3*Cout, Cin), BN folded
            sh_ref = layer_refs[2 * i + 1]         # (Cout, 1), bias+BN shift
            cin, lin = h.shape
            cout = wz_ref.shape[0] // 3
            lout = lin // 2

            # Channel mix for all 3 taps at once (one matmul; VPU outer
            # product for Cin == 1).  z rows [t*Cout:(t+1)*Cout] = W_t @ h.
            if cin == 1:
                z = wz_ref[...] * h                # (3*Cout, L) broadcast
            else:
                z = jnp.dot(wz_ref[...], h,
                            preferred_element_type=jnp.float32)

            # Stride-2 / pad-1 tap selection via shared 0/1 selector matmuls
            # (lane dim stays = L_out -> lane-dense activations).  Sublane
            # slices of z are at multiples of Cout (>= 8), so no relayout.
            y = jnp.dot(z[0:cout, :], s_refs[0][:lin, :lout],
                        preferred_element_type=jnp.float32)
            y = y + jnp.dot(z[cout:2 * cout, :], s_refs[1][:lin, :lout],
                            preferred_element_type=jnp.float32)
            y = y + jnp.dot(z[2 * cout:3 * cout, :], s_refs[2][:lin, :lout],
                            preferred_element_type=jnp.float32)
            h = _mish(y + sh_ref[...])             # (Cout, L_out)

        # AdaptiveAvgPool1d + Flatten + Linear (pool folded into wl_ref):
        # flatten (C, L_last) row-major onto the lane axis, one matmul + bias.
        c_last = h.shape[0]
        flat = jnp.concatenate([h[c:c + 1, :] for c in range(c_last)], axis=1)
        out = jnp.dot(flat, wl_ref[...], preferred_element_type=jnp.float32)
        o_ref[0] = out + bl_ref[...]

    return kernel


# ----------------------------------------------------------------- wrapper

@functools.partial(jax.jit, static_argnames=("pool_sz", "desc_sz"))
def extractor_forward(x, params, pool_sz, desc_sz):
    """Pallas implementation of ExtractorConv1d.forward.  x: (B, 1, L)."""
    x = x.astype(jnp.float32)
    B, cin0, L = x.shape
    assert cin0 == 1
    convs = params["convs"]
    n = len(convs)
    assert L % (2 ** n) == 0
    l_last = L // (2 ** n)
    c_last = convs[-1][0].shape[0]
    # TODO(synk): general AdaptiveAvgPool1d (l_last % pool_sz != 0 or
    # l_last < pool_sz) uses variable-size windows; only the exact-divisor
    # case is implemented.
    assert l_last % pool_sz == 0 and l_last >= pool_sz

    # ---- host-side, one-time parameter folding / constant prep ----------
    s0, s1, s2 = _tap_selectors(L)
    wl, bl = params["linear"]                      # wl: (desc, c_last*pool)
    wl_fold = _fold_pool_linear(wl, c_last, l_last, pool_sz, desc_sz)
    bl2 = bl.reshape(1, desc_sz)

    inputs = [x, s0, s1, s2]
    in_specs = [
        pl.BlockSpec((1, 1, L), lambda b: (b, 0, 0)),   # per-batch input row
        pl.BlockSpec(s0.shape, lambda b: (0, 0)),
        pl.BlockSpec(s1.shape, lambda b: (0, 0)),
        pl.BlockSpec(s2.shape, lambda b: (0, 0)),
    ]
    for (w, b_, gamma, beta, mean, var) in convs:
        w_stack, shift = _fold_conv_bn(w, b_, gamma, beta, mean, var)
        inputs += [w_stack, shift]
        in_specs += [pl.BlockSpec(w_stack.shape, lambda b: (0, 0)),
                     pl.BlockSpec(shift.shape, lambda b: (0, 0))]
    inputs += [wl_fold, bl2]
    in_specs += [pl.BlockSpec(wl_fold.shape, lambda b: (0, 0)),
                 pl.BlockSpec(bl2.shape, lambda b: (0, 0))]

    out = pl.pallas_call(
        _make_kernel(n),
        out_shape=jax.ShapeDtypeStruct((B, 1, desc_sz), jnp.float32),
        grid=(B,),
        in_specs=in_specs,
        out_specs=pl.BlockSpec((1, 1, desc_sz), lambda b: (b, 0, 0)),
        compiler_params=pltpu.CompilerParams(
            dimension_semantics=("parallel",)),
    )(*inputs)
    return out[:, 0, :]


# --------------------------------------------------------------- reference

def extractor_forward_ref(x, params, pool_sz, desc_sz):
    h = x.astype(jnp.float32)
    for (w, b, gamma, beta, mean, var) in params["convs"]:
        y = lax.conv_general_dilated(
            h, w, window_strides=(2,), padding=((1, 1),),
            dimension_numbers=("NCH", "OIH", "NCH"),
            precision=lax.Precision.HIGHEST,
        ) + b[None, :, None]
        scale = gamma / jnp.sqrt(var + 1e-5)
        shift = beta - mean * scale
        y = y * scale[None, :, None] + shift[None, :, None]
        h = _mish(y)
    B, C, L = h.shape
    k = L // pool_sz
    pooled = h.reshape(B, C, pool_sz, k).mean(-1)
    flat = pooled.reshape(B, C * pool_sz)
    wl, bl = params["linear"]
    return jnp.dot(flat, wl.T, precision=lax.Precision.HIGHEST) + bl


# ------------------------------------------------------------------ params

def init_params(key, desc_sz, start_nf=8, num_convs=4, pool_sz=16):
    params = {"convs": []}
    cin, nf = 1, start_nf
    for i in range(num_convs):
        cout = nf if i == 0 else 2 * cin
        key, kw, kb, kg, kbt, km, kv = jax.random.split(key, 7)
        w = 0.1 * jax.random.normal(kw, (cout, cin, 3), jnp.float32)
        b = 0.1 * jax.random.normal(kb, (cout,), jnp.float32)
        gamma = 1.0 + 0.1 * jax.random.normal(kg, (cout,), jnp.float32)
        beta = 0.1 * jax.random.normal(kbt, (cout,), jnp.float32)
        mean = 0.1 * jax.random.normal(km, (cout,), jnp.float32)
        var = jax.random.uniform(kv, (cout,), jnp.float32, 0.5, 1.5)
        params["convs"].append((w, b, gamma, beta, mean, var))
        cin = cout
    key, kw, kb = jax.random.split(key, 3)
    wl = 0.05 * jax.random.normal(kw, (desc_sz, cin * pool_sz), jnp.float32)
    bl = 0.05 * jax.random.normal(kb, (desc_sz,), jnp.float32)
    params["linear"] = (wl, bl)
    return params


# ------------------------------------------------------------------ main

if __name__ == "__main__":
    B, L = 2, 512            # input: (B, 1, L); 4 stride-2 convs -> L/16 = 32
    desc_sz, start_nf, num_convs, pool_sz = 32, 8, 4, 16

    key = jax.random.PRNGKey(0)
    key, kx = jax.random.split(key)
    x = jax.random.normal(kx, (B, 1, L), jnp.float32)
    params = init_params(key, desc_sz, start_nf, num_convs, pool_sz)

    out = extractor_forward(x, params, pool_sz=pool_sz, desc_sz=desc_sz)
    out = jax.block_until_ready(out)

    ref = extractor_forward_ref(x, params, pool_sz, desc_sz)
    assert out.shape == (B, desc_sz)
    # Tolerance allows for MXU f32 multi-pass rounding differences between the
    # fused kernel (BN/pool folded into weights) and the HIGHEST-precision
    # XLA reference.
    assert jnp.allclose(out, ref, rtol=2e-3, atol=2e-3), (
        float(jnp.max(jnp.abs(out - ref))))

    print("KERNEL_OK")
</pallas_src>

<mosaic_0001>
module attributes {stable_mosaic.version = 11 : i64} {
  func.func @kernel(%arg0: i32, %arg1: memref<1x1x512xf32, #tpu.memory_space<vmem>>, %arg2: memref<512x256xf32, #tpu.memory_space<vmem>>, %arg3: memref<512x256xf32, #tpu.memory_space<vmem>>, %arg4: memref<512x256xf32, #tpu.memory_space<vmem>>, %arg5: memref<24x1xf32, #tpu.memory_space<vmem>>, %arg6: memref<8x1xf32, #tpu.memory_space<vmem>>, %arg7: memref<48x8xf32, #tpu.memory_space<vmem>>, %arg8: memref<16x1xf32, #tpu.memory_space<vmem>>, %arg9: memref<96x16xf32, #tpu.memory_space<vmem>>, %arg10: memref<32x1xf32, #tpu.memory_space<vmem>>, %arg11: memref<192x32xf32, #tpu.memory_space<vmem>>, %arg12: memref<64x1xf32, #tpu.memory_space<vmem>>, %arg13: memref<2048x32xf32, #tpu.memory_space<vmem>>, %arg14: memref<1x32xf32, #tpu.memory_space<vmem>>, %arg15: memref<1x1x32xf32, #tpu.memory_space<vmem>>) attributes {dimension_semantics = [#tpu.dimension_semantics<parallel>], iteration_bounds = array<i64: 2>, scalar_prefetch = 0 : i64, scratch_operands = 0 : i64, tpu.core_type = #tpu.core_type<tc>, window_params = [{transform_indices = @transform_0, window_bounds = array<i64: 1, 1, 512>}, {pipeline_mode = #tpu.pipeline_mode<synchronous>, transform_indices = @transform_1, window_bounds = array<i64: 512, 256>}, {pipeline_mode = #tpu.pipeline_mode<synchronous>, transform_indices = @transform_2, window_bounds = array<i64: 512, 256>}, {pipeline_mode = #tpu.pipeline_mode<synchronous>, transform_indices = @transform_3, window_bounds = array<i64: 512, 256>}, {pipeline_mode = #tpu.pipeline_mode<synchronous>, transform_indices = @transform_4, window_bounds = array<i64: 24, 1>}, {pipeline_mode = #tpu.pipeline_mode<synchronous>, transform_indices = @transform_5, window_bounds = array<i64: 8, 1>}, {pipeline_mode = #tpu.pipeline_mode<synchronous>, transform_indices = @transform_6, window_bounds = array<i64: 48, 8>}, {pipeline_mode = #tpu.pipeline_mode<synchronous>, transform_indices = @transform_7, window_bounds = array<i64: 16, 1>}, {pipeline_mode = #tpu.pipeline_mode<synchronous>, transform_indices = @transform_8, window_bounds = array<i64: 96, 16>}, {pipeline_mode = #tpu.pipeline_mode<synchronous>, transform_indices = @transform_9, window_bounds = array<i64: 32, 1>}, {pipeline_mode = #tpu.pipeline_mode<synchronous>, transform_indices = @transform_10, window_bounds = array<i64: 192, 32>}, {pipeline_mode = #tpu.pipeline_mode<synchronous>, transform_indices = @transform_11, window_bounds = array<i64: 64, 1>}, {pipeline_mode = #tpu.pipeline_mode<synchronous>, transform_indices = @transform_12, window_bounds = array<i64: 2048, 32>}, {pipeline_mode = #tpu.pipeline_mode<synchronous>, transform_indices = @transform_13, window_bounds = array<i64: 1, 32>}, {transform_indices = @transform_14, window_bounds = array<i64: 1, 1, 32>}]} {
    %c0 = arith.constant 0 : index
    %c0_0 = arith.constant 0 : index
    %c0_1 = arith.constant 0 : index
    %0 = vector.load %arg1[%c0, %c0_0, %c0_1] : memref<1x1x512xf32, #tpu.memory_space<vmem>>, vector<1x1x512xf32>
    %1 = vector.shape_cast %0 : vector<1x1x512xf32> to vector<1x512xf32>
    %c0_2 = arith.constant 0 : index
    %c0_3 = arith.constant 0 : index
    %2 = vector.load %arg5[%c0_2, %c0_3] : memref<24x1xf32, #tpu.memory_space<vmem>>, vector<24x1xf32>
    %3 = vector.broadcast %2 : vector<24x1xf32> to vector<24x512xf32>
    %4 = vector.broadcast %1 : vector<1x512xf32> to vector<24x512xf32>
    %5 = arith.mulf %3, %4 : vector<24x512xf32>
    %6 = vector.extract_strided_slice %5 {offsets = [0, 0], sizes = [8, 512], strides = [1, 1]} : vector<24x512xf32> to vector<8x512xf32>
    %c0_4 = arith.constant 0 : index
    %c0_5 = arith.constant 0 : index
    %7 = vector.load %arg2[%c0_4, %c0_5] : memref<512x256xf32, #tpu.memory_space<vmem>>, vector<512x256xf32>
    %cst = arith.constant dense<0.000000e+00> : vector<8x256xf32>
    %8 = tpu.matmul %6, %7, %cst {dimension_numbers = #tpu.dot_dimension_numbers<[1], [0], [0], [1], [0, 0, 1, 1], [], []>} : vector<8x512xf32>, vector<512x256xf32>, vector<8x256xf32> -> vector<8x256xf32>
    %9 = vector.extract_strided_slice %5 {offsets = [8, 0], sizes = [8, 512], strides = [1, 1]} : vector<24x512xf32> to vector<8x512xf32>
    %c0_6 = arith.constant 0 : index
    %c0_7 = arith.constant 0 : index
    %10 = vector.load %arg3[%c0_6, %c0_7] : memref<512x256xf32, #tpu.memory_space<vmem>>, vector<512x256xf32>
    %cst_8 = arith.constant dense<0.000000e+00> : vector<8x256xf32>
    %11 = tpu.matmul %9, %10, %cst_8 {dimension_numbers = #tpu.dot_dimension_numbers<[1], [0], [0], [1], [0, 0, 1, 1], [], []>} : vector<8x512xf32>, vector<512x256xf32>, vector<8x256xf32> -> vector<8x256xf32>
    %12 = arith.addf %8, %11 : vector<8x256xf32>
    %13 = vector.extract_strided_slice %5 {offsets = [16, 0], sizes = [8, 512], strides = [1, 1]} : vector<24x512xf32> to vector<8x512xf32>
    %c0_9 = arith.constant 0 : index
    %c0_10 = arith.constant 0 : index
    %14 = vector.load %arg4[%c0_9, %c0_10] : memref<512x256xf32, #tpu.memory_space<vmem>>, vector<512x256xf32>
    %cst_11 = arith.constant dense<0.000000e+00> : vector<8x256xf32>
    %15 = tpu.matmul %13, %14, %cst_11 {dimension_numbers = #tpu.dot_dimension_numbers<[1], [0], [0], [1], [0, 0, 1, 1], [], []>} : vector<8x512xf32>, vector<512x256xf32>, vector<8x256xf32> -> vector<8x256xf32>
    %16 = arith.addf %12, %15 : vector<8x256xf32>
    %c0_12 = arith.constant 0 : index
    %c0_13 = arith.constant 0 : index
    %17 = vector.load %arg6[%c0_12, %c0_13] : memref<8x1xf32, #tpu.memory_space<vmem>>, vector<8x1xf32>
    %18 = vector.broadcast %17 : vector<8x1xf32> to vector<8x256xf32>
    %19 = arith.addf %16, %18 : vector<8x256xf32>
    %20 = math.absf %19 : vector<8x256xf32>
    %cst_14 = arith.constant 0.000000e+00 : f32
    %21 = vector.broadcast %cst_14 : f32 to vector<8x256xf32>
    %22 = arith.subf %21, %20 : vector<8x256xf32>
    %23 = math.exp %22 : vector<8x256xf32>
    %24 = math.log1p %23 : vector<8x256xf32>
    %cst_15 = arith.constant 0.000000e+00 : f32
    %25 = vector.broadcast %cst_15 : f32 to vector<8x256xf32>
    %26 = arith.maximumf %19, %25 : vector<8x256xf32>
    %27 = arith.addf %24, %26 : vector<8x256xf32>
    %28 = math.tanh %27 : vector<8x256xf32>
    %29 = arith.mulf %19, %28 : vector<8x256xf32>
    %c0_16 = arith.constant 0 : index
    %c0_17 = arith.constant 0 : index
    %30 = vector.load %arg7[%c0_16, %c0_17] : memref<48x8xf32, #tpu.memory_space<vmem>>, vector<48x8xf32>
    %cst_18 = arith.constant dense<0.000000e+00> : vector<48x256xf32>
    %31 = tpu.matmul %30, %29, %cst_18 {dimension_numbers = #tpu.dot_dimension_numbers<[1], [0], [0], [1], [0, 0, 1, 1], [], []>} : vector<48x8xf32>, vector<8x256xf32>, vector<48x256xf32> -> vector<48x256xf32>
    %32 = vector.extract_strided_slice %31 {offsets = [0, 0], sizes = [16, 256], strides = [1, 1]} : vector<48x256xf32> to vector<16x256xf32>
    %c0_19 = arith.constant 0 : index
    %c0_20 = arith.constant 0 : index
    %33 = vector.load %arg2[%c0_19, %c0_20] : memref<512x256xf32, #tpu.memory_space<vmem>>, vector<256x128xf32>
    %cst_21 = arith.constant dense<0.000000e+00> : vector<16x128xf32>
    %34 = tpu.matmul %32, %33, %cst_21 {dimension_numbers = #tpu.dot_dimension_numbers<[1], [0], [0], [1], [0, 0, 1, 1], [], []>} : vector<16x256xf32>, vector<256x128xf32>, vector<16x128xf32> -> vector<16x128xf32>
    %35 = vector.extract_strided_slice %31 {offsets = [16, 0], sizes = [16, 256], strides = [1, 1]} : vector<48x256xf32> to vector<16x256xf32>
    %c0_22 = arith.constant 0 : index
    %c0_23 = arith.constant 0 : index
    %36 = vector.load %arg3[%c0_22, %c0_23] : memref<512x256xf32, #tpu.memory_space<vmem>>, vector<256x128xf32>
    %cst_24 = arith.constant dense<0.000000e+00> : vector<16x128xf32>
    %37 = tpu.matmul %35, %36, %cst_24 {dimension_numbers = #tpu.dot_dimension_numbers<[1], [0], [0], [1], [0, 0, 1, 1], [], []>} : vector<16x256xf32>, vector<256x128xf32>, vector<16x128xf32> -> vector<16x128xf32>
    %38 = arith.addf %34, %37 : vector<16x128xf32>
    %39 = vector.extract_strided_slice %31 {offsets = [32, 0], sizes = [16, 256], strides = [1, 1]} : vector<48x256xf32> to vector<16x256xf32>
    %c0_25 = arith.constant 0 : index
    %c0_26 = arith.constant 0 : index
    %40 = vector.load %arg4[%c0_25, %c0_26] : memref<512x256xf32, #tpu.memory_space<vmem>>, vector<256x128xf32>
    %cst_27 = arith.constant dense<0.000000e+00> : vector<16x128xf32>
    %41 = tpu.matmul %39, %40, %cst_27 {dimension_numbers = #tpu.dot_dimension_numbers<[1], [0], [0], [1], [0, 0, 1, 1], [], []>} : vector<16x256xf32>, vector<256x128xf32>, vector<16x128xf32> -> vector<16x128xf32>
    %42 = arith.addf %38, %41 : vector<16x128xf32>
    %c0_28 = arith.constant 0 : index
    %c0_29 = arith.constant 0 : index
    %43 = vector.load %arg8[%c0_28, %c0_29] : memref<16x1xf32, #tpu.memory_space<vmem>>, vector<16x1xf32>
    %44 = vector.broadcast %43 : vector<16x1xf32> to vector<16x128xf32>
    %45 = arith.addf %42, %44 : vector<16x128xf32>
    %46 = math.absf %45 : vector<16x128xf32>
    %cst_30 = arith.constant 0.000000e+00 : f32
    %47 = vector.broadcast %cst_30 : f32 to vector<16x128xf32>
    %48 = arith.subf %47, %46 : vector<16x128xf32>
    %49 = math.exp %48 : vector<16x128xf32>
    %50 = math.log1p %49 : vector<16x128xf32>
    %cst_31 = arith.constant 0.000000e+00 : f32
    %51 = vector.broadcast %cst_31 : f32 to vector<16x128xf32>
    %52 = arith.maximumf %45, %51 : vector<16x128xf32>
    %53 = arith.addf %50, %52 : vector<16x128xf32>
    %54 = math.tanh %53 : vector<16x128xf32>
    %55 = arith.mulf %45, %54 : vector<16x128xf32>
    %c0_32 = arith.constant 0 : index
    %c0_33 = arith.constant 0 : index
    %56 = vector.load %arg9[%c0_32, %c0_33] : memref<96x16xf32, #tpu.memory_space<vmem>>, vector<96x16xf32>
    %cst_34 = arith.constant dense<0.000000e+00> : vector<96x128xf32>
    %57 = tpu.matmul %56, %55, %cst_34 {dimension_numbers = #tpu.dot_dimension_numbers<[1], [0], [0], [1], [0, 0, 1, 1], [], []>} : vector<96x16xf32>, vector<16x128xf32>, vector<96x128xf32> -> vector<96x128xf32>
    %58 = vector.extract_strided_slice %57 {offsets = [0, 0], sizes = [32, 128], strides = [1, 1]} : vector<96x128xf32> to vector<32x128xf32>
    %c0_35 = arith.constant 0 : index
    %c0_36 = arith.constant 0 : index
    %59 = vector.load %arg2[%c0_35, %c0_36] : memref<512x256xf32, #tpu.memory_space<vmem>>, vector<128x64xf32>
    %cst_37 = arith.constant dense<0.000000e+00> : vector<32x64xf32>
    %60 = tpu.matmul %58, %59, %cst_37 {dimension_numbers = #tpu.dot_dimension_numbers<[1], [0], [0], [1], [0, 0, 1, 1], [], []>} : vector<32x128xf32>, vector<128x64xf32>, vector<32x64xf32> -> vector<32x64xf32>
    %61 = vector.extract_strided_slice %57 {offsets = [32, 0], sizes = [32, 128], strides = [1, 1]} : vector<96x128xf32> to vector<32x128xf32>
    %c0_38 = arith.constant 0 : index
    %c0_39 = arith.constant 0 : index
    %62 = vector.load %arg3[%c0_38, %c0_39] : memref<512x256xf32, #tpu.memory_space<vmem>>, vector<128x64xf32>
    %cst_40 = arith.constant dense<0.000000e+00> : vector<32x64xf32>
    %63 = tpu.matmul %61, %62, %cst_40 {dimension_numbers = #tpu.dot_dimension_numbers<[1], [0], [0], [1], [0, 0, 1, 1], [], []>} : vector<32x128xf32>, vector<128x64xf32>, vector<32x64xf32> -> vector<32x64xf32>
    %64 = arith.addf %60, %63 : vector<32x64xf32>
    %65 = vector.extract_strided_slice %57 {offsets = [64, 0], sizes = [32, 128], strides = [1, 1]} : vector<96x128xf32> to vector<32x128xf32>
    %c0_41 = arith.constant 0 : index
    %c0_42 = arith.constant 0 : index
    %66 = vector.load %arg4[%c0_41, %c0_42] : memref<512x256xf32, #tpu.memory_space<vmem>>, vector<128x64xf32>
    %cst_43 = arith.constant dense<0.000000e+00> : vector<32x64xf32>
    %67 = tpu.matmul %65, %66, %cst_43 {dimension_numbers = #tpu.dot_dimension_numbers<[1], [0], [0], [1], [0, 0, 1, 1], [], []>} : vector<32x128xf32>, vector<128x64xf32>, vector<32x64xf32> -> vector<32x64xf32>
    %68 = arith.addf %64, %67 : vector<32x64xf32>
    %c0_44 = arith.constant 0 : index
    %c0_45 = arith.constant 0 : index
    %69 = vector.load %arg10[%c0_44, %c0_45] : memref<32x1xf32, #tpu.memory_space<vmem>>, vector<32x1xf32>
    %70 = vector.broadcast %69 : vector<32x1xf32> to vector<32x64xf32>
    %71 = arith.addf %68, %70 : vector<32x64xf32>
    %72 = math.absf %71 : vector<32x64xf32>
    %cst_46 = arith.constant 0.000000e+00 : f32
    %73 = vector.broadcast %cst_46 : f32 to vector<32x64xf32>
    %74 = arith.subf %73, %72 : vector<32x64xf32>
    %75 = math.exp %74 : vector<32x64xf32>
    %76 = math.log1p %75 : vector<32x64xf32>
    %cst_47 = arith.constant 0.000000e+00 : f32
    %77 = vector.broadcast %cst_47 : f32 to vector<32x64xf32>
    %78 = arith.maximumf %71, %77 : vector<32x64xf32>
    %79 = arith.addf %76, %78 : vector<32x64xf32>
    %80 = math.tanh %79 : vector<32x64xf32>
    %81 = arith.mulf %71, %80 : vector<32x64xf32>
    %c0_48 = arith.constant 0 : index
    %c0_49 = arith.constant 0 : index
    %82 = vector.load %arg11[%c0_48, %c0_49] : memref<192x32xf32, #tpu.memory_space<vmem>>, vector<192x32xf32>
    %cst_50 = arith.constant dense<0.000000e+00> : vector<192x64xf32>
    %83 = tpu.matmul %82, %81, %cst_50 {dimension_numbers = #tpu.dot_dimension_numbers<[1], [0], [0], [1], [0, 0, 1, 1], [], []>} : vector<192x32xf32>, vector<32x64xf32>, vector<192x64xf32> -> vector<192x64xf32>
    %84 = vector.extract_strided_slice %83 {offsets = [0, 0], sizes = [64, 64], strides = [1, 1]} : vector<192x64xf32> to vector<64x64xf32>
    %c0_51 = arith.constant 0 : index
    %c0_52 = arith.constant 0 : index
    %85 = vector.load %arg2[%c0_51, %c0_52] : memref<512x256xf32, #tpu.memory_space<vmem>>, vector<64x32xf32>
    %cst_53 = arith.constant dense<0.000000e+00> : vector<64x32xf32>
    %86 = tpu.matmul %84, %85, %cst_53 {dimension_numbers = #tpu.dot_dimension_numbers<[1], [0], [0], [1], [0, 0, 1, 1], [], []>} : vector<64x64xf32>, vector<64x32xf32>, vector<64x32xf32> -> vector<64x32xf32>
    %87 = vector.extract_strided_slice %83 {offsets = [64, 0], sizes = [64, 64], strides = [1, 1]} : vector<192x64xf32> to vector<64x64xf32>
    %c0_54 = arith.constant 0 : index
    %c0_55 = arith.constant 0 : index
    %88 = vector.load %arg3[%c0_54, %c0_55] : memref<512x256xf32, #tpu.memory_space<vmem>>, vector<64x32xf32>
    %cst_56 = arith.constant dense<0.000000e+00> : vector<64x32xf32>
    %89 = tpu.matmul %87, %88, %cst_56 {dimension_numbers = #tpu.dot_dimension_numbers<[1], [0], [0], [1], [0, 0, 1, 1], [], []>} : vector<64x64xf32>, vector<64x32xf32>, vector<64x32xf32> -> vector<64x32xf32>
    %90 = arith.addf %86, %89 : vector<64x32xf32>
    %91 = vector.extract_strided_slice %83 {offsets = [128, 0], sizes = [64, 64], strides = [1, 1]} : vector<192x64xf32> to vector<64x64xf32>
    %c0_57 = arith.constant 0 : index
    %c0_58 = arith.constant 0 : index
    %92 = vector.load %arg4[%c0_57, %c0_58] : memref<512x256xf32, #tpu.memory_space<vmem>>, vector<64x32xf32>
    %cst_59 = arith.constant dense<0.000000e+00> : vector<64x32xf32>
    %93 = tpu.matmul %91, %92, %cst_59 {dimension_numbers = #tpu.dot_dimension_numbers<[1], [0], [0], [1], [0, 0, 1, 1], [], []>} : vector<64x64xf32>, vector<64x32xf32>, vector<64x32xf32> -> vector<64x32xf32>
    %94 = arith.addf %90, %93 : vector<64x32xf32>
    %c0_60 = arith.constant 0 : index
    %c0_61 = arith.constant 0 : index
    %95 = vector.load %arg12[%c0_60, %c0_61] : memref<64x1xf32, #tpu.memory_space<vmem>>, vector<64x1xf32>
    %96 = vector.broadcast %95 : vector<64x1xf32> to vector<64x32xf32>
    %97 = arith.addf %94, %96 : vector<64x32xf32>
    %98 = math.absf %97 : vector<64x32xf32>
    %cst_62 = arith.constant 0.000000e+00 : f32
    %99 = vector.broadcast %cst_62 : f32 to vector<64x32xf32>
    %100 = arith.subf %99, %98 : vector<64x32xf32>
    %101 = math.exp %100 : vector<64x32xf32>
    %102 = math.log1p %101 : vector<64x32xf32>
    %cst_63 = arith.constant 0.000000e+00 : f32
    %103 = vector.broadcast %cst_63 : f32 to vector<64x32xf32>
    %104 = arith.maximumf %97, %103 : vector<64x32xf32>
    %105 = arith.addf %102, %104 : vector<64x32xf32>
    %106 = math.tanh %105 : vector<64x32xf32>
    %107 = arith.mulf %97, %106 : vector<64x32xf32>
    %108 = vector.extract_strided_slice %107 {offsets = [0, 0], sizes = [1, 32], strides = [1, 1]} : vector<64x32xf32> to vector<1x32xf32>
    %109 = vector.extract_strided_slice %107 {offsets = [1, 0], sizes = [1, 32], strides = [1, 1]} : vector<64x32xf32> to vector<1x32xf32>
    %110 = vector.extract_strided_slice %107 {offsets = [2, 0], sizes = [1, 32], strides = [1, 1]} : vector<64x32xf32> to vector<1x32xf32>
    %111 = vector.extract_strided_slice %107 {offsets = [3, 0], sizes = [1, 32], strides = [1, 1]} : vector<64x32xf32> to vector<1x32xf32>
    %112 = vector.extract_strided_slice %107 {offsets = [4, 0], sizes = [1, 32], strides = [1, 1]} : vector<64x32xf32> to vector<1x32xf32>
    %113 = vector.extract_strided_slice %107 {offsets = [5, 0], sizes = [1, 32], strides = [1, 1]} : vector<64x32xf32> to vector<1x32xf32>
    %114 = vector.extract_strided_slice %107 {offsets = [6, 0], sizes = [1, 32], strides = [1, 1]} : vector<64x32xf32> to vector<1x32xf32>
    %115 = vector.extract_strided_slice %107 {offsets = [7, 0], sizes = [1, 32], strides = [1, 1]} : vector<64x32xf32> to vector<1x32xf32>
    %116 = vector.extract_strided_slice %107 {offsets = [8, 0], sizes = [1, 32], strides = [1, 1]} : vector<64x32xf32> to vector<1x32xf32>
    %117 = vector.extract_strided_slice %107 {offsets = [9, 0], sizes = [1, 32], strides = [1, 1]} : vector<64x32xf32> to vector<1x32xf32>
    %118 = vector.extract_strided_slice %107 {offsets = [10, 0], sizes = [1, 32], strides = [1, 1]} : vector<64x32xf32> to vector<1x32xf32>
    %119 = vector.extract_strided_slice %107 {offsets = [11, 0], sizes = [1, 32], strides = [1, 1]} : vector<64x32xf32> to vector<1x32xf32>
    %120 = vector.extract_strided_slice %107 {offsets = [12, 0], sizes = [1, 32], strides = [1, 1]} : vector<64x32xf32> to vector<1x32xf32>
    %121 = vector.extract_strided_slice %107 {offsets = [13, 0], sizes = [1, 32], strides = [1, 1]} : vector<64x32xf32> to vector<1x32xf32>
    %122 = vector.extract_strided_slice %107 {offsets = [14, 0], sizes = [1, 32], strides = [1, 1]} : vector<64x32xf32> to vector<1x32xf32>
    %123 = vector.extract_strided_slice %107 {offsets = [15, 0], sizes = [1, 32], strides = [1, 1]} : vector<64x32xf32> to vector<1x32xf32>
    %124 = vector.extract_strided_slice %107 {offsets = [16, 0], sizes = [1, 32], strides = [1, 1]} : vector<64x32xf32> to vector<1x32xf32>
    %125 = vector.extract_strided_slice %107 {offsets = [17, 0], sizes = [1, 32], strides = [1, 1]} : vector<64x32xf32> to vector<1x32xf32>
    %126 = vector.extract_strided_slice %107 {offsets = [18, 0], sizes = [1, 32], strides = [1, 1]} : vector<64x32xf32> to vector<1x32xf32>
    %127 = vector.extract_strided_slice %107 {offsets = [19, 0], sizes = [1, 32], strides = [1, 1]} : vector<64x32xf32> to vector<1x32xf32>
    %128 = vector.extract_strided_slice %107 {offsets = [20, 0], sizes = [1, 32], strides = [1, 1]} : vector<64x32xf32> to vector<1x32xf32>
    %129 = vector.extract_strided_slice %107 {offsets = [21, 0], sizes = [1, 32], strides = [1, 1]} : vector<64x32xf32> to vector<1x32xf32>
    %130 = vector.extract_strided_slice %107 {offsets = [22, 0], sizes = [1, 32], strides = [1, 1]} : vector<64x32xf32> to vector<1x32xf32>
    %131 = vector.extract_strided_slice %107 {offsets = [23, 0], sizes = [1, 32], strides = [1, 1]} : vector<64x32xf32> to vector<1x32xf32>
    %132 = vector.extract_strided_slice %107 {offsets = [24, 0], sizes = [1, 32], strides = [1, 1]} : vector<64x32xf32> to vector<1x32xf32>
    %133 = vector.extract_strided_slice %107 {offsets = [25, 0], sizes = [1, 32], strides = [1, 1]} : vector<64x32xf32> to vector<1x32xf32>
    %134 = vector.extract_strided_slice %107 {offsets = [26, 0], sizes = [1, 32], strides = [1, 1]} : vector<64x32xf32> to vector<1x32xf32>
    %135 = vector.extract_strided_slice %107 {offsets = [27, 0], sizes = [1, 32], strides = [1, 1]} : vector<64x32xf32> to vector<1x32xf32>
    %136 = vector.extract_strided_slice %107 {offsets = [28, 0], sizes = [1, 32], strides = [1, 1]} : vector<64x32xf32> to vector<1x32xf32>
    %137 = vector.extract_strided_slice %107 {offsets = [29, 0], sizes = [1, 32], strides = [1, 1]} : vector<64x32xf32> to vector<1x32xf32>
    %138 = vector.extract_strided_slice %107 {offsets = [30, 0], sizes = [1, 32], strides = [1, 1]} : vector<64x32xf32> to vector<1x32xf32>
    %139 = vector.extract_strided_slice %107 {offsets = [31, 0], sizes = [1, 32], strides = [1, 1]} : vector<64x32xf32> to vector<1x32xf32>
    %140 = vector.extract_strided_slice %107 {offsets = [32, 0], sizes = [1, 32], strides = [1, 1]} : vector<64x32xf32> to vector<1x32xf32>
    %141 = vector.extract_strided_slice %107 {offsets = [33, 0], sizes = [1, 32], strides = [1, 1]} : vector<64x32xf32> to vector<1x32xf32>
    %142 = vector.extract_strided_slice %107 {offsets = [34, 0], sizes = [1, 32], strides = [1, 1]} : vector<64x32xf32> to vector<1x32xf32>
    %143 = vector.extract_strided_slice %107 {offsets = [35, 0], sizes = [1, 32], strides = [1, 1]} : vector<64x32xf32> to vector<1x32xf32>
    %144 = vector.extract_strided_slice %107 {offsets = [36, 0], sizes = [1, 32], strides = [1, 1]} : vector<64x32xf32> to vector<1x32xf32>
    %145 = vector.extract_strided_slice %107 {offsets = [37, 0], sizes = [1, 32], strides = [1, 1]} : vector<64x32xf32> to vector<1x32xf32>
    %146 = vector.extract_strided_slice %107 {offsets = [38, 0], sizes = [1, 32], strides = [1, 1]} : vector<64x32xf32> to vector<1x32xf32>
    %147 = vector.extract_strided_slice %107 {offsets = [39, 0], sizes = [1, 32], strides = [1, 1]} : vector<64x32xf32> to vector<1x32xf32>
    %148 = vector.extract_strided_slice %107 {offsets = [40, 0], sizes = [1, 32], strides = [1, 1]} : vector<64x32xf32> to vector<1x32xf32>
    %149 = vector.extract_strided_slice %107 {offsets = [41, 0], sizes = [1, 32], strides = [1, 1]} : vector<64x32xf32> to vector<1x32xf32>
    %150 = vector.extract_strided_slice %107 {offsets = [42, 0], sizes = [1, 32], strides = [1, 1]} : vector<64x32xf32> to vector<1x32xf32>
    %151 = vector.extract_strided_slice %107 {offsets = [43, 0], sizes = [1, 32], strides = [1, 1]} : vector<64x32xf32> to vector<1x32xf32>
    %152 = vector.extract_strided_slice %107 {offsets = [44, 0], sizes = [1, 32], strides = [1, 1]} : vector<64x32xf32> to vector<1x32xf32>
    %153 = vector.extract_strided_slice %107 {offsets = [45, 0], sizes = [1, 32], strides = [1, 1]} : vector<64x32xf32> to vector<1x32xf32>
    %154 = vector.extract_strided_slice %107 {offsets = [46, 0], sizes = [1, 32], strides = [1, 1]} : vector<64x32xf32> to vector<1x32xf32>
    %155 = vector.extract_strided_slice %107 {offsets = [47, 0], sizes = [1, 32], strides = [1, 1]} : vector<64x32xf32> to vector<1x32xf32>
    %156 = vector.extract_strided_slice %107 {offsets = [48, 0], sizes = [1, 32], strides = [1, 1]} : vector<64x32xf32> to vector<1x32xf32>
    %157 = vector.extract_strided_slice %107 {offsets = [49, 0], sizes = [1, 32], strides = [1, 1]} : vector<64x32xf32> to vector<1x32xf32>
    %158 = vector.extract_strided_slice %107 {offsets = [50, 0], sizes = [1, 32], strides = [1, 1]} : vector<64x32xf32> to vector<1x32xf32>
    %159 = vector.extract_strided_slice %107 {offsets = [51, 0], sizes = [1, 32], strides = [1, 1]} : vector<64x32xf32> to vector<1x32xf32>
    %160 = vector.extract_strided_slice %107 {offsets = [52, 0], sizes = [1, 32], strides = [1, 1]} : vector<64x32xf32> to vector<1x32xf32>
    %161 = vector.extract_strided_slice %107 {offsets = [53, 0], sizes = [1, 32], strides = [1, 1]} : vector<64x32xf32> to vector<1x32xf32>
    %162 = vector.extract_strided_slice %107 {offsets = [54, 0], sizes = [1, 32], strides = [1, 1]} : vector<64x32xf32> to vector<1x32xf32>
    %163 = vector.extract_strided_slice %107 {offsets = [55, 0], sizes = [1, 32], strides = [1, 1]} : vector<64x32xf32> to vector<1x32xf32>
    %164 = vector.extract_strided_slice %107 {offsets = [56, 0], sizes = [1, 32], strides = [1, 1]} : vector<64x32xf32> to vector<1x32xf32>
    %165 = vector.extract_strided_slice %107 {offsets = [57, 0], sizes = [1, 32], strides = [1, 1]} : vector<64x32xf32> to vector<1x32xf32>
    %166 = vector.extract_strided_slice %107 {offsets = [58, 0], sizes = [1, 32], strides = [1, 1]} : vector<64x32xf32> to vector<1x32xf32>
    %167 = vector.extract_strided_slice %107 {offsets = [59, 0], sizes = [1, 32], strides = [1, 1]} : vector<64x32xf32> to vector<1x32xf32>
    %168 = vector.extract_strided_slice %107 {offsets = [60, 0], sizes = [1, 32], strides = [1, 1]} : vector<64x32xf32> to vector<1x32xf32>
    %169 = vector.extract_strided_slice %107 {offsets = [61, 0], sizes = [1, 32], strides = [1, 1]} : vector<64x32xf32> to vector<1x32xf32>
    %170 = vector.extract_strided_slice %107 {offsets = [62, 0], sizes = [1, 32], strides = [1, 1]} : vector<64x32xf32> to vector<1x32xf32>
    %171 = vector.extract_strided_slice %107 {offsets = [63, 0], sizes = [1, 32], strides = [1, 1]} : vector<64x32xf32> to vector<1x32xf32>
    %172 = tpu.concatenate %108, %109, %110, %111, %112, %113, %114, %115, %116, %117, %118, %119, %120, %121, %122, %123 in 1 : vector<1x32xf32>, vector<1x32xf32>, vector<1x32xf32>, vector<1x32xf32>, vector<1x32xf32>, vector<1x32xf32>, vector<1x32xf32>, vector<1x32xf32>, vector<1x32xf32>, vector<1x32xf32>, vector<1x32xf32>, vector<1x32xf32>, vector<1x32xf32>, vector<1x32xf32>, vector<1x32xf32>, vector<1x32xf32> -> vector<1x512xf32>
    %173 = tpu.concatenate %124, %125, %126, %127, %128, %129, %130, %131, %132, %133, %134, %135, %136, %137, %138, %139 in 1 : vector<1x32xf32>, vector<1x32xf32>, vector<1x32xf32>, vector<1x32xf32>, vector<1x32xf32>, vector<1x32xf32>, vector<1x32xf32>, vector<1x32xf32>, vector<1x32xf32>, vector<1x32xf32>, vector<1x32xf32>, vector<1x32xf32>, vector<1x32xf32>, vector<1x32xf32>, vector<1x32xf32>, vector<1x32xf32> -> vector<1x512xf32>
    %174 = tpu.concatenate %140, %141, %142, %143, %144, %145, %146, %147, %148, %149, %150, %151, %152, %153, %154, %155 in 1 : vector<1x32xf32>, vector<1x32xf32>, vector<1x32xf32>, vector<1x32xf32>, vector<1x32xf32>, vector<1x32xf32>, vector<1x32xf32>, vector<1x32xf32>, vector<1x32xf32>, vector<1x32xf32>, vector<1x32xf32>, vector<1x32xf32>, vector<1x32xf32>, vector<1x32xf32>, vector<1x32xf32>, vector<1x32xf32> -> vector<1x512xf32>
    %175 = tpu.concatenate %156, %157, %158, %159, %160, %161, %162, %163, %164, %165, %166, %167, %168, %169, %170, %171 in 1 : vector<1x32xf32>, vector<1x32xf32>, vector<1x32xf32>, vector<1x32xf32>, vector<1x32xf32>, vector<1x32xf32>, vector<1x32xf32>, vector<1x32xf32>, vector<1x32xf32>, vector<1x32xf32>, vector<1x32xf32>, vector<1x32xf32>, vector<1x32xf32>, vector<1x32xf32>, vector<1x32xf32>, vector<1x32xf32> -> vector<1x512xf32>
    %176 = tpu.concatenate %172, %173, %174, %175 in 1 : vector<1x512xf32>, vector<1x512xf32>, vector<1x512xf32>, vector<1x512xf32> -> vector<1x2048xf32>
    %c0_64 = arith.constant 0 : index
    %c0_65 = arith.constant 0 : index
    %177 = vector.load %arg13[%c0_64, %c0_65] : memref<2048x32xf32, #tpu.memory_space<vmem>>, vector<2048x32xf32>
    %cst_66 = arith.constant dense<0.000000e+00> : vector<1x32xf32>
    %178 = tpu.matmul %176, %177, %cst_66 {dimension_numbers = #tpu.dot_dimension_numbers<[1], [0], [0], [1], [0, 0, 1, 1], [], []>} : vector<1x2048xf32>, vector<2048x32xf32>, vector<1x32xf32> -> vector<1x32xf32>
    %c0_67 = arith.constant 0 : index
    %c0_68 = arith.constant 0 : index
    %179 = vector.load %arg14[%c0_67, %c0_68] : memref<1x32xf32, #tpu.memory_space<vmem>>, vector<1x32xf32>
    %180 = arith.addf %178, %179 : vector<1x32xf32>
    %c0_69 = arith.constant 0 : index
    %c0_70 = arith.constant 0 : index
    %c0_71 = arith.constant 0 : index
    %181 = vector.load %arg15[%c0_69, %c0_70, %c0_71] : memref<1x1x32xf32, #tpu.memory_space<vmem>>, vector<1x1x32xf32>
    %182 = vector.shape_cast %181 : vector<1x1x32xf32> to vector<1x32xf32>
    %183 = vector.shape_cast %180 : vector<1x32xf32> to vector<1x1x32xf32>
    tpu.vector_store %arg15[%c0_69, %c0_70, %c0_71], %183 {strides = array<i32>} : memref<1x1x32xf32, #tpu.memory_space<vmem>>, vector<1x1x32xf32>,
    return
  }
  func.func @transform_0(%arg0: i32) -> (i32, i32, i32) {
    %c0_i32 = arith.constant 0 : i32
    %c0_i32_0 = arith.constant 0 : i32
    %c0_i32_1 = arith.constant 0 : i32
    return %arg0, %c0_i32, %c0_i32_0 : i32, i32, i32
  }
  func.func @transform_1(%arg0: i32) -> (i32, i32) {
    %c0_i32 = arith.constant 0 : i32
    %c0_i32_0 = arith.constant 0 : i32
    %c0_i32_1 = arith.constant 0 : i32
    return %c0_i32, %c0_i32_0 : i32, i32
  }
  func.func @transform_2(%arg0: i32) -> (i32, i32) {
    %c0_i32 = arith.constant 0 : i32
    %c0_i32_0 = arith.constant 0 : i32
    %c0_i32_1 = arith.constant 0 : i32
    return %c0_i32, %c0_i32_0 : i32, i32
  }
  func.func @transform_3(%arg0: i32) -> (i32, i32) {
    %c0_i32 = arith.constant 0 : i32
    %c0_i32_0 = arith.constant 0 : i32
    %c0_i32_1 = arith.constant 0 : i32
    return %c0_i32, %c0_i32_0 : i32, i32
  }
  func.func @transform_4(%arg0: i32) -> (i32, i32) {
    %c0_i32 = arith.constant 0 : i32
    %c0_i32_0 = arith.constant 0 : i32
    %c0_i32_1 = arith.constant 0 : i32
    return %c0_i32, %c0_i32_0 : i32, i32
  }
  func.func @transform_5(%arg0: i32) -> (i32, i32) {
    %c0_i32 = arith.constant 0 : i32
    %c0_i32_0 = arith.constant 0 : i32
    %c0_i32_1 = arith.constant 0 : i32
    return %c0_i32, %c0_i32_0 : i32, i32
  }
  func.func @transform_6(%arg0: i32) -> (i32, i32) {
    %c0_i32 = arith.constant 0 : i32
    %c0_i32_0 = arith.constant 0 : i32
    %c0_i32_1 = arith.constant 0 : i32
    return %c0_i32, %c0_i32_0 : i32, i32
  }
  func.func @transform_7(%arg0: i32) -> (i32, i32) {
    %c0_i32 = arith.constant 0 : i32
    %c0_i32_0 = arith.constant 0 : i32
    %c0_i32_1 = arith.constant 0 : i32
    return %c0_i32, %c0_i32_0 : i32, i32
  }
  func.func @transform_8(%arg0: i32) -> (i32, i32) {
    %c0_i32 = arith.constant 0 : i32
    %c0_i32_0 = arith.constant 0 : i32
    %c0_i32_1 = arith.constant 0 : i32
    return %c0_i32, %c0_i32_0 : i32, i32
  }
  func.func @transform_9(%arg0: i32) -> (i32, i32) {
    %c0_i32 = arith.constant 0 : i32
    %c0_i32_0 = arith.constant 0 : i32
    %c0_i32_1 = arith.constant 0 : i32
    return %c0_i32, %c0_i32_0 : i32, i32
  }
  func.func @transform_10(%arg0: i32) -> (i32, i32) {
    %c0_i32 = arith.constant 0 : i32
    %c0_i32_0 = arith.constant 0 : i32
    %c0_i32_1 = arith.constant 0 : i32
    return %c0_i32, %c0_i32_0 : i32, i32
  }
  func.func @transform_11(%arg0: i32) -> (i32, i32) {
    %c0_i32 = arith.constant 0 : i32
    %c0_i32_0 = arith.constant 0 : i32
    %c0_i32_1 = arith.constant 0 : i32
    return %c0_i32, %c0_i32_0 : i32, i32
  }
  func.func @transform_12(%arg0: i32) -> (i32, i32) {
    %c0_i32 = arith.constant 0 : i32
    %c0_i32_0 = arith.constant 0 : i32
    %c0_i32_1 = arith.constant 0 : i32
    return %c0_i32, %c0_i32_0 : i32, i32
  }
  func.func @transform_13(%arg0: i32) -> (i32, i32) {
    %c0_i32 = arith.constant 0 : i32
    %c0_i32_0 = arith.constant 0 : i32
    %c0_i32_1 = arith.constant 0 : i32
    return %c0_i32, %c0_i32_0 : i32, i32
  }
  func.func @transform_14(%arg0: i32) -> (i32, i32, i32) {
    %c0_i32 = arith.constant 0 : i32
    %c0_i32_0 = arith.constant 0 : i32
    %c0_i32_1 = arith.constant 0 : i32
    return %arg0, %c0_i32, %c0_i32_0 : i32, i32, i32
  }
}

</mosaic_0001>

<bundles_post_ra>
// kernel: extractor_forward.1
= control target key start
LH: loop header
LB: loop body
LE: loop exit
PB: predicated region body
PF: predicated region fallthrough
CT: control target
= control target key end

     0   :  { %s7265_s0 = inlined_call_operand.vmem [shape: f32[2,1,512], index: 0, kind: input, shape index: {}]   ;;  %s7266_s1 = inlined_call_operand.vmem [shape: f32[512,256], index: 1, kind: input, shape index: {}]   ;;  %s7267_s2 = inlined_call_operand.vmem [shape: f32[512,256], index: 2, kind: input, shape index: {}]   ;;  %s7268_s3 = inlined_call_operand.vmem [shape: f32[512,256], index: 3, kind: input, shape index: {}]   ;;  %s7269_s4 = inlined_call_operand.vmem [shape: f32[24,1], index: 4, kind: input, shape index: {}]   ;;  %s7270_s5 = inlined_call_operand.vmem [shape: f32[8,1], index: 5, kind: input, shape index: {}]   ;;  %s7271_s6 = inlined_call_operand.vmem [shape: f32[48,8], index: 6, kind: input, shape index: {}]   ;;  %s7272_s7 = inlined_call_operand.vmem [shape: f32[16,1], index: 7, kind: input, shape index: {}]   ;;  %s7273_s8 = inlined_call_operand.vmem [shape: f32[96,16], index: 8, kind: input, shape index: {}]   ;;  %s7274_s9 = inlined_call_operand.vmem [shape: f32[32,1], index: 9, kind: input, shape index: {}]   ;;  %s7275_s10 = inlined_call_operand.vmem [shape: f32[192,32], index: 10, kind: input, shape index: {}]   ;;  %s7276_s11 = inlined_call_operand.vmem [shape: f32[64,1], index: 11, kind: input, shape index: {}]   ;;  %s7277_s12 = inlined_call_operand.vmem [shape: f32[2048,32], index: 12, kind: input, shape index: {}]   ;;  %s7278_s13 = inlined_call_operand.vmem [shape: f32[1,32], index: 13, kind: input, shape index: {}]   ;;  %s7279_s14 = inlined_call_operand.hbm [shape: f32[2,1,32], index: 14, kind: output, shape index: {}]  }
   0x1   :  { %7293 = sst [smem:[#allocation10_spill]] %s7265_s0 }
   0x2   :  { %7294 = sst [smem:[#allocation11_spill]] %s7266_s1 }
   0x3   :  { %7295 = sst [smem:[#allocation12_spill]] %s7267_s2 }
   0x4   :  { %19 = vsyncpa [#allocation3], 0 }
   0x5   :  { %21 = vsyncpa [#allocation3 + $0x1], 0  ;;  %s4131_s29 = smov 0   ;;  %s4133_s30 = smov 0  }
   0x6   :  { %s4135_s15 = smov 0   ;;  %s4137_s16 = smov 0  }
   0x7 LB: > { %7296 = sst [smem:[#allocation5_spill]] %s4046_s15  ;;  %s4152_s17 = sadd.s32 4294967295, %s4050_s16   ;;  %s4050_s16 = sphi %s4137_s16, %s7311_s16   ;;  %s4046_s15 = sphi %s4135_s15, %s7313_s15   ;;  %s4042_s30 = sphi %s4133_s30, %s7315_s30   ;;  %s4038_s29 = sphi %s4131_s29, %s7314_s29  }
   0x8   : > { %s3644_s18 = sadd.s32 4294967294, %s4050_s16   ;;  %s4156_s19 = sadd.s32 1, %s4050_s16  }
   0x9   : > { %7297 = sst [smem:[#allocation6_spill]] %s4156_s19  ;;  %s333_s20 = sadd.s32 1, %s4046_s15 }
   0xa   : > { %s330_s21 = ssub.s32 %s4050_s16, %s4156_s19  ;;  %p343_p0 = scmp.ne.s32.totalorder %s4046_s15, %s4042_s30 }
   0xb   : > { %p331_p1 = scmp.eq.s32.totalorder %s330_s21, 0  ;;  %p344_p2 = scmp.eq.s32.totalorder %s4152_s17, 1 }
   0xc   : > { %p349_p3 = scmp.ne.s32.totalorder %s4042_s30, %s4038_s29  ;;  %p350_p4 = scmp.eq.s32.totalorder %s3644_s18, 1 }
   0xd   : > { %s4167_s22 = scalar_select %p331_p1, %s4046_s15, %s333_s20  }
   0xe   : > { %p4169_p5 = por %p344_p2, %p343_p0  ;;  %p4173_p6 = por %p350_p4, %p349_p3 }
   0xf   : > { %7298 = sst [smem:[#allocation7_spill]] %s4167_s22  ;;  %p3647_p7 = scmp.ge.s32.totalorder %s4050_s16, 1 }
  0x10   : > { %p414_p8 = scmp.lt.s32.totalorder %s4050_s16, 3 }
  0x12   : > { %p415_p9 = pnand %p3647_p7, %p414_p8 }
  0x14   : > { %418 = sbr.rel (%p415_p9) target bundleno = 1985 (0x7c1), region = 76 }
  0x19   : > { %v464_v0 = vld [vmem:[%s7269_s4 + $0x8] sm:$0xff]  ;;  %v4052_v1 = vmov 0   ;;  %v463_v2 = vld [vmem:[%s7269_s4] sm:$0xff]  ;;  %s7301_s2 = sld [smem:[#allocation12_spill]]  ;;  %v2033_v17 = vld [vmem:[%s7274_s9 + $0x18] sm:$0xff]  ;;  %p458_p10 = scmp.lt.s32.totalorder %s4152_s17, 1 }
  0x1a   : > { %3767 = vset.pattern.permute.xlu0 %v4052_v1  ;;  %3768 = vset.pattern.permute.xlu1 %v4052_v1  ;;  %v2030_v33 = vld [vmem:[%s7274_s9] sm:$0xff]  ;;  %v2542_v49 = vld [vmem:[%s7276_s11 + $0x10] sm:$0xff]  ;;  %s7302_s0 = sld [smem:[#allocation10_spill]]  ;;  %vm1416_vm1 = vcmask 64512   ;;  %vm1801_vm5 = vcmask 130048   ;;  %vm2150_vm10 = vcmask 261120  }
  0x1b   : > { %473 = vperm.xlu0 %3767, %v464_v0   ;;  %3769 = vset.pattern.permute.xlu2 %v4052_v1  ;;  %v465_v50 = vld [vmem:[%s7269_s4 + $0x10] sm:$0xff]  ;;  %s459_s15 = scalar_select %p458_p10, %s4152_s17, 1  ;;  %vm2328_vm11 = vcmask 523264  }
  0x1c   : > { %478 = vperm.xlu1 %3768, %v465_v50   ;;  %v2546_v1 = vld [vmem:[%s7276_s11 + $0x30] sm:$0xff]  ;;  %s7303_s1 = sld [smem:[#allocation11_spill]]  ;;  %s7291_s27 = smov 64  }
  0x1d   : > { %s3648_s19 = sshll.u32 %s459_s15, 2  ;;  %s7289_s28 = smov 32  }
  0x1e   : > { %s7308_s20 = smov 96   ;;  %s7310_s22 = smov 64  }
  0x1f   : > { %v660_v3 = vld [vmem:[%s7301_s2 + $0xf0] sm:$0xff]  ;;  %v658_v7 = vld [vmem:[%s7301_s2 + $0xe0] sm:$0xff]  ;;  %v739_v50 = vld [vmem:[%s7301_s2 + $0x368] sm:$0xff] }
  0x20   : > { %v692_v4 = vld [vmem:[%s7301_s2 + $0x1f0] sm:$0xff]  ;;  %758 = vmatpush.msra.mxu0 %v660_v3  ;;  %v690_v8 = vld [vmem:[%s7301_s2 + $0x1e0] sm:$0xff]  ;;  %s461_s18 = scalar_lea.vmem %s7302_s0, %s3648_s19  ;;  %s7287_s19 = smov 96  }
  0x21   : > { %v724_v5 = vld [vmem:[%s7301_s2 + $0x2f0] sm:$0xff]  ;;  %778 = vmatpush.msra.mxu1 %v692_v4  ;;  %v722_v9 = vld [vmem:[%s7301_s2 + $0x2e0] sm:$0xff] }
  0x22   : > { %v756_v6 = vld [vmem:[%s7301_s2 + $0x3f0] sm:$0xff]  ;;  %798 = vmatpush.msra.mxu2 %v724_v5  ;;  %v754_v10 = vld [vmem:[%s7301_s2 + $0x3e0] sm:$0xff]  ;;  %759 = vmatpush.msra.mxu0 %v658_v7 }
  0x23   : > { %468 = vperm.xlu0 %3767, %v463_v2   ;;  %818 = vmatpush.msra.mxu3 %v756_v6  ;;  %v656_v11 = vld [vmem:[%s7301_s2 + $0xd0] sm:$0xff]  ;;  %v654_v15 = vld [vmem:[%s7301_s2 + $0xc0] sm:$0xff] }
  0x24   : > { %779 = vmatpush.msra.mxu1 %v690_v8  ;;  %v688_v12 = vld [vmem:[%s7301_s2 + $0x1d0] sm:$0xff]  ;;  %799 = vmatpush.msra.mxu2 %v722_v9  ;;  %v686_v16 = vld [vmem:[%s7301_s2 + $0x1c0] sm:$0xff]  ;;  %v661_v9 = vld [vmem:[%s7301_s2 + $0xf8] sm:$0xff] }
  0x25   : > { %v720_v13 = vld [vmem:[%s7301_s2 + $0x2d0] sm:$0xff]  ;;  %819 = vmatpush.msra.mxu3 %v754_v10  ;;  %760 = vmatpush.msra.mxu0 %v656_v11  ;;  %v718_v18 = vld [vmem:[%s7301_s2 + $0x2c0] sm:$0xff]  ;;  %v693_v10 = vld [vmem:[%s7301_s2 + $0x1f8] sm:$0xff] }
  0x26   : > { %v752_v14 = vld [vmem:[%s7301_s2 + $0x3d0] sm:$0xff]  ;;  %780 = vmatpush.msra.mxu1 %v688_v12  ;;  %800 = vmatpush.msra.mxu2 %v720_v13  ;;  %v750_v19 = vld [vmem:[%s7301_s2 + $0x3c0] sm:$0xff]  ;;  %v725_v11 = vld [vmem:[%s7301_s2 + $0x2f8] sm:$0xff] }
  0x27   : > { %820 = vmatpush.msra.mxu3 %v752_v14  ;;  %v652_v20 = vld [vmem:[%s7301_s2 + $0xb0] sm:$0xff]  ;;  %761 = vmatpush.msra.mxu0 %v654_v15  ;;  %v650_v24 = vld [vmem:[%s7301_s2 + $0xa0] sm:$0xff]  ;;  %v757_v12 = vld [vmem:[%s7301_s2 + $0x3f8] sm:$0xff] }
  0x28   : > { %781 = vmatpush.msra.mxu1 %v686_v16  ;;  %v684_v21 = vld [vmem:[%s7301_s2 + $0x1b0] sm:$0xff]  ;;  %801 = vmatpush.msra.mxu2 %v718_v18  ;;  %v682_v25 = vld [vmem:[%s7301_s2 + $0x1a0] sm:$0xff]  ;;  %v659_v13 = vld [vmem:[%s7301_s2 + $0xe8] sm:$0xff] }
  0x29   : > { %v716_v22 = vld [vmem:[%s7301_s2 + $0x2b0] sm:$0xff]  ;;  %821 = vmatpush.msra.mxu3 %v750_v19  ;;  %762 = vmatpush.msra.mxu0 %v652_v20  ;;  %v714_v26 = vld [vmem:[%s7301_s2 + $0x2a0] sm:$0xff]  ;;  %v691_v14 = vld [vmem:[%s7301_s2 + $0x1e8] sm:$0xff] }
  0x2a   : > { %v748_v23 = vld [vmem:[%s7301_s2 + $0x3b0] sm:$0xff]  ;;  %782 = vmatpush.msra.mxu1 %v684_v21  ;;  %802 = vmatpush.msra.mxu2 %v716_v22  ;;  %v746_v27 = vld [vmem:[%s7301_s2 + $0x3a0] sm:$0xff]  ;;  %v723_v15 = vld [vmem:[%s7301_s2 + $0x2e8] sm:$0xff] }
  0x2b   : > { %2051 = vperm.xlu0 %3767, %v2033_v17   ;;  %v648_v28 = vld [vmem:[%s7301_s2 + $0x90] sm:$0xff]  ;;  %822 = vmatpush.msra.mxu3 %v748_v23  ;;  %v646_v32 = vld [vmem:[%s7301_s2 + $0x80] sm:$0xff]  ;;  %v755_v16 = vld [vmem:[%s7301_s2 + $0x3e8] sm:$0xff] }
  0x2c   : > { %763 = vmatpush.msra.mxu0 %v650_v24  ;;  %v680_v29 = vld [vmem:[%s7301_s2 + $0x190] sm:$0xff]  ;;  %783 = vmatpush.msra.mxu1 %v682_v25  ;;  %v678_v34 = vld [vmem:[%s7301_s2 + $0x180] sm:$0xff]  ;;  %v657_v17 = vld [vmem:[%s7301_s2 + $0xd8] sm:$0xff] }
  0x2d   : > { %v712_v30 = vld [vmem:[%s7301_s2 + $0x290] sm:$0xff]  ;;  %803 = vmatpush.msra.mxu2 %v714_v26  ;;  %823 = vmatpush.msra.mxu3 %v746_v27  ;;  %v710_v35 = vld [vmem:[%s7301_s2 + $0x280] sm:$0xff]  ;;  %v689_v18 = vld [vmem:[%s7301_s2 + $0x1d8] sm:$0xff] }
  0x2e   : > { %v744_v31 = vld [vmem:[%s7301_s2 + $0x390] sm:$0xff]  ;;  %764 = vmatpush.msra.mxu0 %v648_v28  ;;  %784 = vmatpush.msra.mxu1 %v680_v29  ;;  %v742_v36 = vld [vmem:[%s7301_s2 + $0x380] sm:$0xff]  ;;  %v721_v19 = vld [vmem:[%s7301_s2 + $0x2d8] sm:$0xff] }
  0x2f   : > { %804 = vmatpush.msra.mxu2 %v712_v30  ;;  %824 = vmatpush.msra.mxu3 %v744_v31  ;;  %v644_v37 = vld [vmem:[%s7301_s2 + $0x70] sm:$0xff]  ;;  %v642_v41 = vld [vmem:[%s7301_s2 + $0x60] sm:$0xff]  ;;  %v753_v20 = vld [vmem:[%s7301_s2 + $0x3d8] sm:$0xff] }
  0x30   : > { %765 = vmatpush.msra.mxu0 %v646_v32  ;;  %v676_v38 = vld [vmem:[%s7301_s2 + $0x170] sm:$0xff]  ;;  %785 = vmatpush.msra.mxu1 %v678_v34  ;;  %v674_v42 = vld [vmem:[%s7301_s2 + $0x160] sm:$0xff]  ;;  %v655_v21 = vld [vmem:[%s7301_s2 + $0xc8] sm:$0xff] }
  0x31   : > { %v708_v39 = vld [vmem:[%s7301_s2 + $0x270] sm:$0xff]  ;;  %805 = vmatpush.msra.mxu2 %v710_v35  ;;  %825 = vmatpush.msra.mxu3 %v742_v36  ;;  %v706_v43 = vld [vmem:[%s7301_s2 + $0x260] sm:$0xff]  ;;  %v687_v22 = vld [vmem:[%s7301_s2 + $0x1c8] sm:$0xff] }
  0x32   : > { %v740_v40 = vld [vmem:[%s7301_s2 + $0x370] sm:$0xff]  ;;  %766 = vmatpush.msra.mxu0 %v644_v37  ;;  %786 = vmatpush.msra.mxu1 %v676_v38  ;;  %v738_v44 = vld [vmem:[%s7301_s2 + $0x360] sm:$0xff]  ;;  %v719_v23 = vld [vmem:[%s7301_s2 + $0x2c8] sm:$0xff] }
  0x33   : > { %2036 = vperm.xlu0 %3767, %v2030_v33   ;;  %806 = vmatpush.msra.mxu2 %v708_v39  ;;  %v640_v45 = vld [vmem:[%s7301_s2 + $0x50] sm:$0xff]  ;;  %v638_v51 = vld [vmem:[%s7301_s2 + $0x40] sm:$0xff]  ;;  %v751_v24 = vld [vmem:[%s7301_s2 + $0x3c8] sm:$0xff] }
  0x34   : > { %826 = vmatpush.msra.mxu3 %v740_v40  ;;  %v672_v46 = vld [vmem:[%s7301_s2 + $0x150] sm:$0xff]  ;;  %767 = vmatpush.msra.mxu0 %v642_v41  ;;  %v670_v52 = vld [vmem:[%s7301_s2 + $0x140] sm:$0xff]  ;;  %v653_v26 = vld [vmem:[%s7301_s2 + $0xb8] sm:$0xff] }
  0x35   : > { %787 = vmatpush.msra.mxu1 %v674_v42  ;;  %v704_v47 = vld [vmem:[%s7301_s2 + $0x250] sm:$0xff]  ;;  %807 = vmatpush.msra.mxu2 %v706_v43  ;;  %v702_v53 = vld [vmem:[%s7301_s2 + $0x240] sm:$0xff]  ;;  %v685_v27 = vld [vmem:[%s7301_s2 + $0x1b8] sm:$0xff] }
  0x36   : > { %v736_v48 = vld [vmem:[%s7301_s2 + $0x350] sm:$0xff]  ;;  %827 = vmatpush.msra.mxu3 %v738_v44  ;;  %768 = vmatpush.msra.mxu0 %v640_v45  ;;  %v734_v54 = vld [vmem:[%s7301_s2 + $0x340] sm:$0xff]  ;;  %v717_v28 = vld [vmem:[%s7301_s2 + $0x2b8] sm:$0xff] }
  0x37   : > { %788 = vmatpush.msra.mxu1 %v672_v46  ;;  %808 = vmatpush.msra.mxu2 %v704_v47  ;;  %v636_v55 = vld [vmem:[%s7301_s2 + $0x30] sm:$0xff]  ;;  %v634_v59 = vld [vmem:[%s7301_s2 + $0x20] sm:$0xff]  ;;  %v749_v29 = vld [vmem:[%s7301_s2 + $0x3b8] sm:$0xff] }
  0x38   : > { %828 = vmatpush.msra.mxu3 %v736_v48  ;;  %v668_v56 = vld [vmem:[%s7301_s2 + $0x130] sm:$0xff]  ;;  %769 = vmatpush.msra.mxu0 %v638_v51  ;;  %v666_v60 = vld [vmem:[%s7301_s2 + $0x120] sm:$0xff]  ;;  %v651_v30 = vld [vmem:[%s7301_s2 + $0xa8] sm:$0xff] }
  0x39   : > { %789 = vmatpush.msra.mxu1 %v670_v52  ;;  %v700_v57 = vld [vmem:[%s7301_s2 + $0x230] sm:$0xff]  ;;  %809 = vmatpush.msra.mxu2 %v702_v53  ;;  %v698_v61 = vld [vmem:[%s7301_s2 + $0x220] sm:$0xff]  ;;  %v683_v31 = vld [vmem:[%s7301_s2 + $0x1a8] sm:$0xff] }
  0x3a   : > { %v732_v58 = vld [vmem:[%s7301_s2 + $0x330] sm:$0xff]  ;;  %829 = vmatpush.msra.mxu3 %v734_v54  ;;  %770 = vmatpush.msra.mxu0 %v636_v55  ;;  %v730_v62 = vld [vmem:[%s7301_s2 + $0x320] sm:$0xff]  ;;  %v715_v32 = vld [vmem:[%s7301_s2 + $0x2a8] sm:$0xff] }
  0x3b   : > { %2560 = vperm.xlu0 %3767, %v2542_v49   ;;  %790 = vmatpush.msra.mxu1 %v668_v56  ;;  %v632_v63 = vld [vmem:[%s7301_s2 + $0x10] sm:$0xff]  ;;  %v1368_v4 = vld [vmem:[%s7270_s5] sm:$0xff]  ;;  %v747_v33 = vld [vmem:[%s7301_s2 + $0x3a8] sm:$0xff] }
  0x3c   : > { %810 = vmatpush.msra.mxu2 %v700_v57  ;;  %830 = vmatpush.msra.mxu3 %v732_v58  ;;  %v664_v0 = vld [vmem:[%s7301_s2 + $0x110] sm:$0xff]  ;;  %v630_v5 = vld [vmem:[%s7301_s2] sm:$0xff]  ;;  %v649_v34 = vld [vmem:[%s7301_s2 + $0x98] sm:$0xff] }
  0x3d   : > { %771 = vmatpush.msra.mxu0 %v634_v59  ;;  %791 = vmatpush.msra.mxu1 %v666_v60  ;;  %v696_v2 = vld [vmem:[%s7301_s2 + $0x210] sm:$0xff]  ;;  %v662_v6 = vld [vmem:[%s7301_s2 + $0x100] sm:$0xff]  ;;  %v681_v35 = vld [vmem:[%s7301_s2 + $0x198] sm:$0xff] }
  0x3e   : > { %811 = vmatpush.msra.mxu2 %v698_v61  ;;  %831 = vmatpush.msra.mxu3 %v730_v62  ;;  %v728_v3 = vld [vmem:[%s7301_s2 + $0x310] sm:$0xff]  ;;  %v694_v7 = vld [vmem:[%s7301_s2 + $0x200] sm:$0xff]  ;;  %v713_v36 = vld [vmem:[%s7301_s2 + $0x298] sm:$0xff] }
  0x3f   : > { %772 = vmatpush.msra.mxu0 %v632_v63  ;;  %792 = vmatpush.msra.mxu1 %v664_v0  ;;  %v726_v8 = vld [vmem:[%s7301_s2 + $0x300] sm:$0xff]  ;;  %v2032_v25 = vld [vmem:[%s7274_s9 + $0x10] sm:$0xff]  ;;  %v745_v37 = vld [vmem:[%s7301_s2 + $0x398] sm:$0xff] }
  0x40   : > { %812 = vmatpush.msra.mxu2 %v696_v2  ;;  %832 = vmatpush.msra.mxu3 %v728_v3  ;;  %v647_v38 = vld [vmem:[%s7301_s2 + $0x88] sm:$0xff]  ;;  %v2540_v42 = vld [vmem:[%s7276_s11] sm:$0xff]  ;;  %v645_v43 = vld [vmem:[%s7301_s2 + $0x78] sm:$0xff] }
  0x41   : > { %1371 = vperm.xlu1 %3768, %v1368_v4   ;;  %773 = vmatpush.msra.mxu0 %v630_v5  ;;  %v679_v39 = vld [vmem:[%s7301_s2 + $0x188] sm:$0xff]  ;;  %v677_v44 = vld [vmem:[%s7301_s2 + $0x178] sm:$0xff] }
  0x42   : > { %793 = vmatpush.msra.mxu1 %v662_v6  ;;  %813 = vmatpush.msra.mxu2 %v694_v7  ;;  %v711_v40 = vld [vmem:[%s7301_s2 + $0x288] sm:$0xff]  ;;  %v709_v45 = vld [vmem:[%s7301_s2 + $0x278] sm:$0xff] }
  0x43   : > { %2580 = vperm.xlu0 %3767, %v2546_v1   ;;  %833 = vmatpush.msra.mxu3 %v726_v8  ;;  %v743_v41 = vld [vmem:[%s7301_s2 + $0x388] sm:$0xff]  ;;  %v741_v46 = vld [vmem:[%s7301_s2 + $0x378] sm:$0xff] }
  0x44   : > { %838 = vmatpush.msrb.mxu0 %v661_v9  ;;  %858 = vmatpush.msrb.mxu1 %v693_v10  ;;  %v643_v47 = vld [vmem:[%s7301_s2 + $0x68] sm:$0xff]  ;;  %v641_v51 = vld [vmem:[%s7301_s2 + $0x58] sm:$0xff] }
  0x45   : > { %878 = vmatpush.msrb.mxu2 %v725_v11  ;;  %898 = vmatpush.msrb.mxu3 %v757_v12  ;;  %v675_v48 = vld [vmem:[%s7301_s2 + $0x168] sm:$0xff]  ;;  %v673_v52 = vld [vmem:[%s7301_s2 + $0x158] sm:$0xff] }
  0x46   : > { %839 = vmatpush.msrb.mxu0 %v659_v13  ;;  %859 = vmatpush.msrb.mxu1 %v691_v14  ;;  %v707_v49 = vld [vmem:[%s7301_s2 + $0x268] sm:$0xff]  ;;  %v705_v53 = vld [vmem:[%s7301_s2 + $0x258] sm:$0xff]  ;;  %v462_v13 = vld [vmem:[%s461_s18] sm:$0xf] }
  0x47   : > { %879 = vmatpush.msrb.mxu2 %v723_v15  ;;  %899 = vmatpush.msrb.mxu3 %v755_v16  ;;  %v737_v54 = vld [vmem:[%s7301_s2 + $0x358] sm:$0xff]  ;;  %v639_v55 = vld [vmem:[%s7301_s2 + $0x48] sm:$0xff]  ;;  %v4604_v14 = vperm.slane %v462_v13, 0  ;;  %v4606_v15 = vperm.slane %v462_v13, 1  ;;  %v4608_v16 = vperm.slane %v462_v13, 2 }
  0x48   : > { %840 = vmatpush.msrb.mxu0 %v657_v17  ;;  %860 = vmatpush.msrb.mxu1 %v689_v18  ;;  %v671_v56 = vld [vmem:[%s7301_s2 + $0x148] sm:$0xff]  ;;  %v2543_v59 = vld [vmem:[%s7276_s11 + $0x18] sm:$0xff]  ;;  %v4610_v17 = vperm.slane %v462_v13, 3  ;;  %v570_v13 = vld [vmem:[%s7303_s1 + $0x220] sm:$0xff] }
  0x49   : > { %880 = vmatpush.msrb.mxu2 %v721_v19  ;;  %900 = vmatpush.msrb.mxu3 %v753_v20  ;;  %v703_v57 = vld [vmem:[%s7301_s2 + $0x248] sm:$0xff]  ;;  %v637_v60 = vld [vmem:[%s7301_s2 + $0x38] sm:$0xff] }
  0x4a   : > { %841 = vmatpush.msrb.mxu0 %v655_v21  ;;  %861 = vmatpush.msrb.mxu1 %v687_v22  ;;  %v735_v58 = vld [vmem:[%s7301_s2 + $0x348] sm:$0xff]  ;;  %v669_v61 = vld [vmem:[%s7301_s2 + $0x138] sm:$0xff] }
  0x4b   : > { %881 = vmatpush.msrb.mxu2 %v719_v23  ;;  %901 = vmatpush.msrb.mxu3 %v751_v24  ;;  %v701_v62 = vld [vmem:[%s7301_s2 + $0x238] sm:$0xff]  ;;  %v635_v0 = vld [vmem:[%s7301_s2 + $0x28] sm:$0xff]  ;;  %v532_v23 = vld [vmem:[%s7303_s1 + $0xf0] sm:$0xff] }
  0x4c   : > { %2046 = vperm.xlu1 %3768, %v2032_v25   ;;  %842 = vmatpush.msrb.mxu0 %v653_v26  ;;  %v733_v63 = vld [vmem:[%s7301_s2 + $0x338] sm:$0xff]  ;;  %v667_v1 = vld [vmem:[%s7301_s2 + $0x128] sm:$0xff]  ;;  %v564_v24 = vld [vmem:[%s7303_s1 + $0x1f0] sm:$0xff] }
  0x4d   : > { %862 = vmatpush.msrb.mxu1 %v685_v27  ;;  %882 = vmatpush.msrb.mxu2 %v717_v28  ;;  %v699_v2 = vld [vmem:[%s7301_s2 + $0x228] sm:$0xff]  ;;  %v633_v4 = vld [vmem:[%s7301_s2 + $0x18] sm:$0xff]  ;;  %v596_v25 = vld [vmem:[%s7303_s1 + $0x2f0] sm:$0xff] }
  0x4e   : > { %902 = vmatpush.msrb.mxu3 %v749_v29  ;;  %843 = vmatpush.msrb.mxu0 %v651_v30  ;;  %v731_v3 = vld [vmem:[%s7301_s2 + $0x328] sm:$0xff]  ;;  %v665_v5 = vld [vmem:[%s7301_s2 + $0x118] sm:$0xff]  ;;  %v628_v26 = vld [vmem:[%s7303_s1 + $0x3f0] sm:$0xff] }
  0x4f   : > { %863 = vmatpush.msrb.mxu1 %v683_v31  ;;  %883 = vmatpush.msrb.mxu2 %v715_v32  ;;  %v697_v6 = vld [vmem:[%s7301_s2 + $0x218] sm:$0xff]  ;;  %v631_v8 = vld [vmem:[%s7301_s2 + $0x8] sm:$0xff]  ;;  %v530_v27 = vld [vmem:[%s7303_s1 + $0xe0] sm:$0xff] }
  0x50   : > { %903 = vmatpush.msrb.mxu3 %v747_v33  ;;  %844 = vmatpush.msrb.mxu0 %v649_v34  ;;  %v729_v7 = vld [vmem:[%s7301_s2 + $0x318] sm:$0xff]  ;;  %v663_v9 = vld [vmem:[%s7301_s2 + $0x108] sm:$0xff]  ;;  %v562_v28 = vld [vmem:[%s7303_s1 + $0x1e0] sm:$0xff] }
  0x51   : > { %864 = vmatpush.msrb.mxu1 %v681_v35  ;;  %884 = vmatpush.msrb.mxu2 %v713_v36  ;;  %v695_v10 = vld [vmem:[%s7301_s2 + $0x208] sm:$0xff]  ;;  %v594_v29 = vld [vmem:[%s7303_s1 + $0x2e0] sm:$0xff]  ;;  %v528_v31 = vld [vmem:[%s7303_s1 + $0xd0] sm:$0xff] }
  0x52   : > { %904 = vmatpush.msrb.mxu3 %v745_v37  ;;  %845 = vmatpush.msrb.mxu0 %v647_v38  ;;  %v727_v11 = vld [vmem:[%s7301_s2 + $0x308] sm:$0xff]  ;;  %v626_v30 = vld [vmem:[%s7303_s1 + $0x3e0] sm:$0xff]  ;;  %v560_v32 = vld [vmem:[%s7303_s1 + $0x1d0] sm:$0xff] }
  0x53   : > { %865 = vmatpush.msrb.mxu1 %v679_v39  ;;  %885 = vmatpush.msrb.mxu2 %v711_v40  ;;  %v2545_v12 = vld [vmem:[%s7276_s11 + $0x28] sm:$0xff]  ;;  %v592_v33 = vld [vmem:[%s7303_s1 + $0x2d0] sm:$0xff]  ;;  %v526_v35 = vld [vmem:[%s7303_s1 + $0xc0] sm:$0xff] }
  0x54   : > { %905 = vmatpush.msrb.mxu3 %v743_v41  ;;  %2550 = vperm.xlu1 %3768, %v2540_v42   ;;  %v624_v34 = vld [vmem:[%s7303_s1 + $0x3d0] sm:$0xff]  ;;  %v558_v36 = vld [vmem:[%s7303_s1 + $0x1c0] sm:$0xff] }
  0x55   : > { %846 = vmatpush.msrb.mxu0 %v645_v43  ;;  %866 = vmatpush.msrb.mxu1 %v677_v44  ;;  %v590_v37 = vld [vmem:[%s7303_s1 + $0x2c0] sm:$0xff]  ;;  %v524_v39 = vld [vmem:[%s7303_s1 + $0xb0] sm:$0xff] }
  0x56   : > { %886 = vmatpush.msrb.mxu2 %v709_v45  ;;  %906 = vmatpush.msrb.mxu3 %v741_v46  ;;  %v622_v38 = vld [vmem:[%s7303_s1 + $0x3c0] sm:$0xff]  ;;  %v556_v40 = vld [vmem:[%s7303_s1 + $0x1b0] sm:$0xff] }
  0x57   : > { %847 = vmatpush.msrb.mxu0 %v643_v47  ;;  %867 = vmatpush.msrb.mxu1 %v675_v48  ;;  %v588_v41 = vld [vmem:[%s7303_s1 + $0x2b0] sm:$0xff]  ;;  %v522_v43 = vld [vmem:[%s7303_s1 + $0xa0] sm:$0xff] }
  0x58   : > { %887 = vmatpush.msrb.mxu2 %v707_v49  ;;  %907 = vmatpush.msrb.mxu3 %v739_v50  ;;  %v620_v42 = vld [vmem:[%s7303_s1 + $0x3b0] sm:$0xff]  ;;  %v554_v44 = vld [vmem:[%s7303_s1 + $0x1a0] sm:$0xff] }
  0x59   : > { %848 = vmatpush.msrb.mxu0 %v641_v51  ;;  %868 = vmatpush.msrb.mxu1 %v673_v52  ;;  %v586_v45 = vld [vmem:[%s7303_s1 + $0x2a0] sm:$0xff]  ;;  %v520_v47 = vld [vmem:[%s7303_s1 + $0x90] sm:$0xff] }
  0x5a   : > { %888 = vmatpush.msrb.mxu2 %v705_v53  ;;  %908 = vmatpush.msrb.mxu3 %v737_v54  ;;  %v618_v46 = vld [vmem:[%s7303_s1 + $0x3a0] sm:$0xff]  ;;  %v552_v48 = vld [vmem:[%s7303_s1 + $0x190] sm:$0xff] }
  0x5b   : > { %849 = vmatpush.msrb.mxu0 %v639_v55  ;;  %869 = vmatpush.msrb.mxu1 %v671_v56  ;;  %v584_v49 = vld [vmem:[%s7303_s1 + $0x290] sm:$0xff]  ;;  %v518_v51 = vld [vmem:[%s7303_s1 + $0x80] sm:$0xff] }
  0x5c   : > { %889 = vmatpush.msrb.mxu2 %v703_v57  ;;  %909 = vmatpush.msrb.mxu3 %v735_v58  ;;  %v616_v50 = vld [vmem:[%s7303_s1 + $0x390] sm:$0xff]  ;;  %v550_v52 = vld [vmem:[%s7303_s1 + $0x180] sm:$0xff] }
  0x5d   : > { %2565 = vperm.xlu1 %3768, %v2543_v59   ;;  %850 = vmatpush.msrb.mxu0 %v637_v60  ;;  %v582_v53 = vld [vmem:[%s7303_s1 + $0x280] sm:$0xff]  ;;  %v516_v55 = vld [vmem:[%s7303_s1 + $0x70] sm:$0xff] }
  0x5e   : > { %870 = vmatpush.msrb.mxu1 %v669_v61  ;;  %890 = vmatpush.msrb.mxu2 %v701_v62  ;;  %v614_v54 = vld [vmem:[%s7303_s1 + $0x380] sm:$0xff]  ;;  %v548_v56 = vld [vmem:[%s7303_s1 + $0x170] sm:$0xff] }
  0x5f   : > { %910 = vmatpush.msrb.mxu3 %v733_v63  ;;  %851 = vmatpush.msrb.mxu0 %v635_v0  ;;  %v580_v57 = vld [vmem:[%s7303_s1 + $0x270] sm:$0xff]  ;;  %v514_v59 = vld [vmem:[%s7303_s1 + $0x60] sm:$0xff] }
  0x60   : > { %871 = vmatpush.msrb.mxu1 %v667_v1  ;;  %891 = vmatpush.msrb.mxu2 %v699_v2  ;;  %v612_v58 = vld [vmem:[%s7303_s1 + $0x370] sm:$0xff]  ;;  %v546_v60 = vld [vmem:[%s7303_s1 + $0x160] sm:$0xff] }
  0x61   : > { %911 = vmatpush.msrb.mxu3 %v731_v3  ;;  %852 = vmatpush.msrb.mxu0 %v633_v4  ;;  %v578_v61 = vld [vmem:[%s7303_s1 + $0x260] sm:$0xff]  ;;  %v512_v63 = vld [vmem:[%s7303_s1 + $0x50] sm:$0xff] }
  0x62   : > { %872 = vmatpush.msrb.mxu1 %v665_v5  ;;  %892 = vmatpush.msrb.mxu2 %v697_v6  ;;  %v610_v62 = vld [vmem:[%s7303_s1 + $0x360] sm:$0xff]  ;;  %v544_v0 = vld [vmem:[%s7303_s1 + $0x150] sm:$0xff] }
  0x63   : > { %912 = vmatpush.msrb.mxu3 %v729_v7  ;;  %853 = vmatpush.msrb.mxu0 %v631_v8  ;;  %v576_v1 = vld [vmem:[%s7303_s1 + $0x250] sm:$0xff]  ;;  %v510_v3 = vld [vmem:[%s7303_s1 + $0x40] sm:$0xff] }
  0x64   : > { %873 = vmatpush.msrb.mxu1 %v663_v9  ;;  %893 = vmatpush.msrb.mxu2 %v695_v10  ;;  %v608_v2 = vld [vmem:[%s7303_s1 + $0x350] sm:$0xff]  ;;  %v542_v4 = vld [vmem:[%s7303_s1 + $0x140] sm:$0xff] }
  0x65   : > { %913 = vmatpush.msrb.mxu3 %v727_v11  ;;  %2575 = vperm.xlu1 %3768, %v2545_v12   ;;  %v574_v5 = vld [vmem:[%s7303_s1 + $0x240] sm:$0xff]  ;;  %v508_v7 = vld [vmem:[%s7303_s1 + $0x30] sm:$0xff] }
  0x66   : > { %v606_v6 = vld [vmem:[%s7303_s1 + $0x340] sm:$0xff]  ;;  %v540_v8 = vld [vmem:[%s7303_s1 + $0x130] sm:$0xff] }
  0x67   : > { %v572_v9 = vld [vmem:[%s7303_s1 + $0x230] sm:$0xff]  ;;  %v506_v11 = vld [vmem:[%s7303_s1 + $0x20] sm:$0xff] }
  0x68   : > { %v604_v10 = vld [vmem:[%s7303_s1 + $0x330] sm:$0xff]  ;;  %v538_v12 = vld [vmem:[%s7303_s1 + $0x120] sm:$0xff] }
  0x8d   : > { %v474_v18 = vpop.permute.xlu0 %473 }
  0x8e   : > { %v494_v19 = vmul.f32 %v4604_v14, %v474_v18  ;;  %v495_v20 = vmul.f32 %v4606_v15, %v474_v18  ;;  %v496_v21 = vmul.f32 %v4608_v16, %v474_v18  ;;  %v497_v22 = vmul.f32 %v4610_v17, %v474_v18  ;;  %v602_v18 = vld [vmem:[%s7303_s1 + $0x320] sm:$0xff] }
  0x90   : > { %774 = vmatmul.f32.vlgmr.msra.gmra.mxu0 %v494_v19  ;;  %794 = vmatmul.f32.vlgmr.msra.gmra.mxu1 %v495_v20 }
  0x91   : > { %814 = vmatmul.f32.vlgmr.msra.gmra.mxu2 %v496_v21  ;;  %834 = vmatmul.f32.vlgmr.msra.gmra.mxu3 %v497_v22 }
  0x92   : > { %918 = vmatpush.msra.mxu0 %v532_v23  ;;  %938 = vmatpush.msra.mxu1 %v564_v24  ;;  %v502_v24 = vld [vmem:[%s7303_s1] sm:$0xff] }
  0x93   : > { %958 = vmatpush.msra.mxu2 %v596_v25  ;;  %978 = vmatpush.msra.mxu3 %v628_v26  ;;  %v534_v25 = vld [vmem:[%s7303_s1 + $0x100] sm:$0xff] }
  0x94   : > { %919 = vmatpush.msra.mxu0 %v530_v27  ;;  %939 = vmatpush.msra.mxu1 %v562_v28  ;;  %v566_v26 = vld [vmem:[%s7303_s1 + $0x200] sm:$0xff] }
  0x95   : > { %959 = vmatpush.msra.mxu2 %v594_v29  ;;  %979 = vmatpush.msra.mxu3 %v626_v30  ;;  %v469_v23 = vpop.permute.xlu0 %468  ;;  %v598_v27 = vld [vmem:[%s7303_s1 + $0x300] sm:$0xff] }
  0x96   : > { %920 = vmatpush.msra.mxu0 %v528_v31  ;;  %940 = vmatpush.msra.mxu1 %v560_v32  ;;  %v4809_v28 = vmul.f32 %v4604_v14, %v469_v23  ;;  %v4812_v29 = vmul.f32 %v4606_v15, %v469_v23  ;;  %v4815_v30 = vmul.f32 %v4608_v16, %v469_v23  ;;  %v533_v32 = vld [vmem:[%s7303_s1 + $0xf8] sm:$0xff] }
  0x97   : > { %960 = vmatpush.msra.mxu2 %v592_v33  ;;  %980 = vmatpush.msra.mxu3 %v624_v34  ;;  %v4818_v31 = vmul.f32 %v4610_v17, %v469_v23  ;;  %v565_v33 = vld [vmem:[%s7303_s1 + $0x1f8] sm:$0xff] }
  0x98   : > { %921 = vmatpush.msra.mxu0 %v526_v35  ;;  %941 = vmatpush.msra.mxu1 %v558_v36  ;;  %v597_v34 = vld [vmem:[%s7303_s1 + $0x2f8] sm:$0xff]  ;;  %v531_v36 = vld [vmem:[%s7303_s1 + $0xe8] sm:$0xff] }
  0x99   : > { %961 = vmatpush.msra.mxu2 %v590_v37  ;;  %981 = vmatpush.msra.mxu3 %v622_v38  ;;  %v629_v35 = vld [vmem:[%s7303_s1 + $0x3f8] sm:$0xff]  ;;  %v563_v37 = vld [vmem:[%s7303_s1 + $0x1e8] sm:$0xff] }
  0x9a   : > { %854 = vmatmul.f32.vlgmr.msrb.gmra.mxu0 %v494_v19  ;;  %874 = vmatmul.f32.vlgmr.msrb.gmra.mxu1 %v495_v20  ;;  %v504_v19 = vld [vmem:[%s7303_s1 + $0x10] sm:$0xff]  ;;  %v595_v38 = vld [vmem:[%s7303_s1 + $0x2e8] sm:$0xff]  ;;  %v605_v23 = vld [vmem:[%s7303_s1 + $0x338] sm:$0xff] }
  0x9b   : > { %894 = vmatmul.f32.vlgmr.msrb.gmra.mxu2 %v496_v21  ;;  %914 = vmatmul.f32.vlgmr.msrb.gmra.mxu3 %v497_v22  ;;  %v536_v20 = vld [vmem:[%s7303_s1 + $0x110] sm:$0xff] }
  0x9c   : > { %922 = vmatpush.msra.mxu0 %v524_v39  ;;  %942 = vmatpush.msra.mxu1 %v556_v40  ;;  %v568_v21 = vld [vmem:[%s7303_s1 + $0x210] sm:$0xff]  ;;  %v627_v39 = vld [vmem:[%s7303_s1 + $0x3e8] sm:$0xff]  ;;  %v529_v40 = vld [vmem:[%s7303_s1 + $0xd8] sm:$0xff] }
  0x9d   : > { %962 = vmatpush.msra.mxu2 %v588_v41  ;;  %982 = vmatpush.msra.mxu3 %v620_v42  ;;  %v600_v22 = vld [vmem:[%s7303_s1 + $0x310] sm:$0xff]  ;;  %v561_v41 = vld [vmem:[%s7303_s1 + $0x1d8] sm:$0xff] }
  0x9e   : > { %923 = vmatpush.msra.mxu0 %v522_v43  ;;  %943 = vmatpush.msra.mxu1 %v554_v44  ;;  %v593_v42 = vld [vmem:[%s7303_s1 + $0x2d8] sm:$0xff]  ;;  %v527_v44 = vld [vmem:[%s7303_s1 + $0xc8] sm:$0xff] }
  0x9f   : > { %963 = vmatpush.msra.mxu2 %v586_v45  ;;  %983 = vmatpush.msra.mxu3 %v618_v46  ;;  %v625_v43 = vld [vmem:[%s7303_s1 + $0x3d8] sm:$0xff]  ;;  %v559_v45 = vld [vmem:[%s7303_s1 + $0x1c8] sm:$0xff] }
  0xa0   : > { %924 = vmatpush.msra.mxu0 %v520_v47  ;;  %944 = vmatpush.msra.mxu1 %v552_v48  ;;  %v591_v46 = vld [vmem:[%s7303_s1 + $0x2c8] sm:$0xff]  ;;  %v525_v48 = vld [vmem:[%s7303_s1 + $0xb8] sm:$0xff] }
  0xa1   : > { %964 = vmatpush.msra.mxu2 %v584_v49  ;;  %984 = vmatpush.msra.mxu3 %v616_v50  ;;  %v623_v47 = vld [vmem:[%s7303_s1 + $0x3c8] sm:$0xff]  ;;  %v557_v49 = vld [vmem:[%s7303_s1 + $0x1b8] sm:$0xff] }
  0xa2   : > { %925 = vmatpush.msra.mxu0 %v518_v51  ;;  %945 = vmatpush.msra.mxu1 %v550_v52  ;;  %v589_v50 = vld [vmem:[%s7303_s1 + $0x2b8] sm:$0xff]  ;;  %v523_v52 = vld [vmem:[%s7303_s1 + $0xa8] sm:$0xff] }
  0xa3   : > { %965 = vmatpush.msra.mxu2 %v582_v53  ;;  %985 = vmatpush.msra.mxu3 %v614_v54  ;;  %v621_v51 = vld [vmem:[%s7303_s1 + $0x3b8] sm:$0xff]  ;;  %v555_v53 = vld [vmem:[%s7303_s1 + $0x1a8] sm:$0xff] }
  0xa4   : > { %926 = vmatpush.msra.mxu0 %v516_v55  ;;  %946 = vmatpush.msra.mxu1 %v548_v56  ;;  %v587_v54 = vld [vmem:[%s7303_s1 + $0x2a8] sm:$0xff]  ;;  %v521_v56 = vld [vmem:[%s7303_s1 + $0x98] sm:$0xff] }
  0xa5   : > { %966 = vmatpush.msra.mxu2 %v580_v57  ;;  %986 = vmatpush.msra.mxu3 %v612_v58  ;;  %v619_v55 = vld [vmem:[%s7303_s1 + $0x3a8] sm:$0xff]  ;;  %v553_v57 = vld [vmem:[%s7303_s1 + $0x198] sm:$0xff] }
  0xa6   : > { %927 = vmatpush.msra.mxu0 %v514_v59  ;;  %947 = vmatpush.msra.mxu1 %v546_v60  ;;  %v585_v58 = vld [vmem:[%s7303_s1 + $0x298] sm:$0xff]  ;;  %v519_v60 = vld [vmem:[%s7303_s1 + $0x88] sm:$0xff] }
  0xa7   : > { %967 = vmatpush.msra.mxu2 %v578_v61  ;;  %987 = vmatpush.msra.mxu3 %v610_v62  ;;  %v617_v59 = vld [vmem:[%s7303_s1 + $0x398] sm:$0xff]  ;;  %v551_v61 = vld [vmem:[%s7303_s1 + $0x188] sm:$0xff] }
  0xa8   : > { %928 = vmatpush.msra.mxu0 %v512_v63  ;;  %948 = vmatpush.msra.mxu1 %v544_v0  ;;  %v583_v62 = vld [vmem:[%s7303_s1 + $0x288] sm:$0xff]  ;;  %v517_v0 = vld [vmem:[%s7303_s1 + $0x78] sm:$0xff] }
  0xa9   : > { %968 = vmatpush.msra.mxu2 %v576_v1  ;;  %988 = vmatpush.msra.mxu3 %v608_v2  ;;  %v615_v63 = vld [vmem:[%s7303_s1 + $0x388] sm:$0xff]  ;;  %v549_v1 = vld [vmem:[%s7303_s1 + $0x178] sm:$0xff] }
  0xaa   : > { %929 = vmatpush.msra.mxu0 %v510_v3  ;;  %949 = vmatpush.msra.mxu1 %v542_v4  ;;  %v581_v2 = vld [vmem:[%s7303_s1 + $0x278] sm:$0xff]  ;;  %v515_v4 = vld [vmem:[%s7303_s1 + $0x68] sm:$0xff] }
  0xab   : > { %969 = vmatpush.msra.mxu2 %v574_v5  ;;  %989 = vmatpush.msra.mxu3 %v606_v6  ;;  %v613_v3 = vld [vmem:[%s7303_s1 + $0x378] sm:$0xff]  ;;  %v547_v5 = vld [vmem:[%s7303_s1 + $0x168] sm:$0xff] }
  0xac   : > { %930 = vmatpush.msra.mxu0 %v508_v7  ;;  %950 = vmatpush.msra.mxu1 %v540_v8  ;;  %v579_v6 = vld [vmem:[%s7303_s1 + $0x268] sm:$0xff]  ;;  %v513_v8 = vld [vmem:[%s7303_s1 + $0x58] sm:$0xff] }
  0xad   : > { %970 = vmatpush.msra.mxu2 %v572_v9  ;;  %990 = vmatpush.msra.mxu3 %v604_v10  ;;  %v611_v7 = vld [vmem:[%s7303_s1 + $0x368] sm:$0xff]  ;;  %v545_v9 = vld [vmem:[%s7303_s1 + $0x158] sm:$0xff] }
  0xae   : > { %931 = vmatpush.msra.mxu0 %v506_v11  ;;  %951 = vmatpush.msra.mxu1 %v538_v12  ;;  %v577_v10 = vld [vmem:[%s7303_s1 + $0x258] sm:$0xff]  ;;  %v511_v12 = vld [vmem:[%s7303_s1 + $0x48] sm:$0xff] }
  0xaf   : > { %971 = vmatpush.msra.mxu2 %v570_v13  ;;  %991 = vmatpush.msra.mxu3 %v602_v18  ;;  %v609_v11 = vld [vmem:[%s7303_s1 + $0x358] sm:$0xff]  ;;  %v543_v13 = vld [vmem:[%s7303_s1 + $0x148] sm:$0xff] }
  0xb0   : > { %932 = vmatpush.msra.mxu0 %v504_v19  ;;  %952 = vmatpush.msra.mxu1 %v536_v20  ;;  %v575_v18 = vld [vmem:[%s7303_s1 + $0x248] sm:$0xff]  ;;  %v509_v20 = vld [vmem:[%s7303_s1 + $0x38] sm:$0xff] }
  0xb1   : > { %972 = vmatpush.msra.mxu2 %v568_v21  ;;  %992 = vmatpush.msra.mxu3 %v600_v22  ;;  %v607_v19 = vld [vmem:[%s7303_s1 + $0x348] sm:$0xff]  ;;  %v541_v21 = vld [vmem:[%s7303_s1 + $0x138] sm:$0xff] }
  0xb2   : > { %933 = vmatpush.msra.mxu0 %v502_v24  ;;  %953 = vmatpush.msra.mxu1 %v534_v25  ;;  %v573_v22 = vld [vmem:[%s7303_s1 + $0x238] sm:$0xff]  ;;  %v507_v24 = vld [vmem:[%s7303_s1 + $0x28] sm:$0xff] }
  0xb3   : > { %973 = vmatpush.msra.mxu2 %v566_v26  ;;  %993 = vmatpush.msra.mxu3 %v598_v27  ;;  %v539_v25 = vld [vmem:[%s7303_s1 + $0x128] sm:$0xff] }
  0xb4   : > { %934 = vmatmul.f32.vlgmr.msra.gmra.mxu0 %v4809_v28  ;;  %954 = vmatmul.f32.vlgmr.msra.gmra.mxu1 %v4812_v29  ;;  %v571_v26 = vld [vmem:[%s7303_s1 + $0x228] sm:$0xff] }
  0xb5   : > { %974 = vmatmul.f32.vlgmr.msra.gmra.mxu2 %v4815_v30  ;;  %994 = vmatmul.f32.vlgmr.msra.gmra.mxu3 %v4818_v31  ;;  %v603_v27 = vld [vmem:[%s7303_s1 + $0x328] sm:$0xff] }
  0xb6   : > { %998 = vmatpush.msrb.mxu0 %v533_v32  ;;  %1018 = vmatpush.msrb.mxu1 %v565_v33  ;;  %v505_v32 = vld [vmem:[%s7303_s1 + $0x18] sm:$0xff] }
  0xb7   : > { %1038 = vmatpush.msrb.mxu2 %v597_v34  ;;  %1058 = vmatpush.msrb.mxu3 %v629_v35  ;;  %v537_v33 = vld [vmem:[%s7303_s1 + $0x118] sm:$0xff] }
  0xb8   : > { %999 = vmatpush.msrb.mxu0 %v531_v36  ;;  %1019 = vmatpush.msrb.mxu1 %v563_v37  ;;  %v569_v34 = vld [vmem:[%s7303_s1 + $0x218] sm:$0xff]  ;;  %v503_v36 = vld [vmem:[%s7303_s1 + $0x8] sm:$0xff] }
  0xb9   : > { %1039 = vmatpush.msrb.mxu2 %v595_v38  ;;  %1059 = vmatpush.msrb.mxu3 %v627_v39  ;;  %v601_v35 = vld [vmem:[%s7303_s1 + $0x318] sm:$0xff]  ;;  %v535_v37 = vld [vmem:[%s7303_s1 + $0x108] sm:$0xff] }
  0xba   : > { %1000 = vmatpush.msrb.mxu0 %v529_v40  ;;  %1020 = vmatpush.msrb.mxu1 %v561_v41  ;;  %v567_v38 = vld [vmem:[%s7303_s1 + $0x208] sm:$0xff]  ;;  %v1108_v40 = vld [vmem:[%s7268_s3 + $0xf0] sm:$0xff] }
  0xbb   : > { %1040 = vmatpush.msrb.mxu2 %v593_v42  ;;  %1060 = vmatpush.msrb.mxu3 %v625_v43  ;;  %v599_v39 = vld [vmem:[%s7303_s1 + $0x308] sm:$0xff]  ;;  %v1140_v41 = vld [vmem:[%s7268_s3 + $0x1f0] sm:$0xff] }
  0xbc   : > { %1001 = vmatpush.msrb.mxu0 %v527_v44  ;;  %1021 = vmatpush.msrb.mxu1 %v559_v45  ;;  %v1172_v42 = vld [vmem:[%s7268_s3 + $0x2f0] sm:$0xff]  ;;  %v5035_v44 = vld [vmem:[%s7268_s3 + $0xe0] sm:$0xff] }
  0xbd   : > { %1041 = vmatpush.msrb.mxu2 %v591_v46  ;;  %1061 = vmatpush.msrb.mxu3 %v623_v47  ;;  %v1204_v43 = vld [vmem:[%s7268_s3 + $0x3f0] sm:$0xff] }
  0xbe   : > { %1002 = vmatpush.msrb.mxu0 %v525_v48  ;;  %1022 = vmatpush.msrb.mxu1 %v557_v49  ;;  %v5056_v45 = vld [vmem:[%s7268_s3 + $0x1d0] sm:$0xff]  ;;  %v5069_v48 = vld [vmem:[%s7268_s3 + $0xc0] sm:$0xff] }
  0xbf   : > { %1042 = vmatpush.msrb.mxu2 %v589_v50  ;;  %1062 = vmatpush.msrb.mxu3 %v621_v51  ;;  %v1168_v46 = vld [vmem:[%s7268_s3 + $0x2d0] sm:$0xff]  ;;  %v5074_v49 = vld [vmem:[%s7268_s3 + $0x1c0] sm:$0xff] }
  0xc0   : > { %1003 = vmatpush.msrb.mxu0 %v523_v52  ;;  %1023 = vmatpush.msrb.mxu1 %v555_v53  ;;  %v1200_v47 = vld [vmem:[%s7268_s3 + $0x3d0] sm:$0xff]  ;;  %v1166_v50 = vld [vmem:[%s7268_s3 + $0x2c0] sm:$0xff] }
  0xc1   : > { %1043 = vmatpush.msrb.mxu2 %v587_v54  ;;  %1063 = vmatpush.msrb.mxu3 %v619_v55  ;;  %v1198_v51 = vld [vmem:[%s7268_s3 + $0x3c0] sm:$0xff]  ;;  %v5087_v52 = vld [vmem:[%s7268_s3 + $0xb0] sm:$0xff] }
  0xc2   : > { %1004 = vmatpush.msrb.mxu0 %v521_v56  ;;  %1024 = vmatpush.msrb.mxu1 %v553_v57  ;;  %v5092_v53 = vld [vmem:[%s7268_s3 + $0x1b0] sm:$0xff]  ;;  %v5105_v56 = vld [vmem:[%s7268_s3 + $0xa0] sm:$0xff] }
  0xc3   : > { %1044 = vmatpush.msrb.mxu2 %v585_v58  ;;  %1064 = vmatpush.msrb.mxu3 %v617_v59  ;;  %v1164_v54 = vld [vmem:[%s7268_s3 + $0x2b0] sm:$0xff]  ;;  %v5110_v57 = vld [vmem:[%s7268_s3 + $0x1a0] sm:$0xff] }
  0xc4   : > { %1005 = vmatpush.msrb.mxu0 %v519_v60  ;;  %1025 = vmatpush.msrb.mxu1 %v551_v61  ;;  %v1196_v55 = vld [vmem:[%s7268_s3 + $0x3b0] sm:$0xff]  ;;  %v1162_v58 = vld [vmem:[%s7268_s3 + $0x2a0] sm:$0xff] }
  0xc5   : > { %1045 = vmatpush.msrb.mxu2 %v583_v62  ;;  %1065 = vmatpush.msrb.mxu3 %v615_v63  ;;  %v1194_v59 = vld [vmem:[%s7268_s3 + $0x3a0] sm:$0xff]  ;;  %v5123_v60 = vld [vmem:[%s7268_s3 + $0x90] sm:$0xff] }
  0xc6   : > { %1006 = vmatpush.msrb.mxu0 %v517_v0  ;;  %1026 = vmatpush.msrb.mxu1 %v549_v1  ;;  %v5128_v61 = vld [vmem:[%s7268_s3 + $0x190] sm:$0xff]  ;;  %v5141_v0 = vld [vmem:[%s7268_s3 + $0x80] sm:$0xff] }
  0xc7   : > { %1046 = vmatpush.msrb.mxu2 %v581_v2  ;;  %1066 = vmatpush.msrb.mxu3 %v613_v3  ;;  %v1160_v62 = vld [vmem:[%s7268_s3 + $0x290] sm:$0xff]  ;;  %v5146_v1 = vld [vmem:[%s7268_s3 + $0x180] sm:$0xff] }
  0xc8   : > { %1007 = vmatpush.msrb.mxu0 %v515_v4  ;;  %1027 = vmatpush.msrb.mxu1 %v547_v5  ;;  %v1192_v63 = vld [vmem:[%s7268_s3 + $0x390] sm:$0xff]  ;;  %v1158_v2 = vld [vmem:[%s7268_s3 + $0x280] sm:$0xff] }
  0xc9   : > { %1047 = vmatpush.msrb.mxu2 %v579_v6  ;;  %1067 = vmatpush.msrb.mxu3 %v611_v7  ;;  %v1190_v3 = vld [vmem:[%s7268_s3 + $0x380] sm:$0xff]  ;;  %v5159_v4 = vld [vmem:[%s7268_s3 + $0x70] sm:$0xff] }
  0xca   : > { %1008 = vmatpush.msrb.mxu0 %v513_v8  ;;  %1028 = vmatpush.msrb.mxu1 %v545_v9  ;;  %v5164_v5 = vld [vmem:[%s7268_s3 + $0x170] sm:$0xff]  ;;  %v5177_v8 = vld [vmem:[%s7268_s3 + $0x60] sm:$0xff] }
  0xcb   : > { %1048 = vmatpush.msrb.mxu2 %v577_v10  ;;  %1068 = vmatpush.msrb.mxu3 %v609_v11  ;;  %v1156_v6 = vld [vmem:[%s7268_s3 + $0x270] sm:$0xff]  ;;  %v5182_v9 = vld [vmem:[%s7268_s3 + $0x160] sm:$0xff] }
  0xcc   : > { %1009 = vmatpush.msrb.mxu0 %v511_v12  ;;  %1029 = vmatpush.msrb.mxu1 %v543_v13  ;;  %v1188_v7 = vld [vmem:[%s7268_s3 + $0x370] sm:$0xff]  ;;  %v1154_v10 = vld [vmem:[%s7268_s3 + $0x260] sm:$0xff] }
  0xcd   : > { %1049 = vmatpush.msrb.mxu2 %v575_v18  ;;  %1069 = vmatpush.msrb.mxu3 %v607_v19  ;;  %v1186_v11 = vld [vmem:[%s7268_s3 + $0x360] sm:$0xff]  ;;  %v5195_v12 = vld [vmem:[%s7268_s3 + $0x50] sm:$0xff] }
  0xce   : > { %1010 = vmatpush.msrb.mxu0 %v509_v20  ;;  %1030 = vmatpush.msrb.mxu1 %v541_v21  ;;  %v5200_v13 = vld [vmem:[%s7268_s3 + $0x150] sm:$0xff]  ;;  %v5213_v20 = vld [vmem:[%s7268_s3 + $0x40] sm:$0xff] }
  0xcf   : > { %1050 = vmatpush.msrb.mxu2 %v573_v22  ;;  %1070 = vmatpush.msrb.mxu3 %v605_v23  ;;  %v1152_v18 = vld [vmem:[%s7268_s3 + $0x250] sm:$0xff]  ;;  %v5218_v21 = vld [vmem:[%s7268_s3 + $0x140] sm:$0xff] }
  0xd0   : > { %1011 = vmatpush.msrb.mxu0 %v507_v24  ;;  %1031 = vmatpush.msrb.mxu1 %v539_v25  ;;  %v1184_v19 = vld [vmem:[%s7268_s3 + $0x350] sm:$0xff]  ;;  %v1150_v22 = vld [vmem:[%s7268_s3 + $0x240] sm:$0xff] }
  0xd1   : > { %1051 = vmatpush.msrb.mxu2 %v571_v26  ;;  %1071 = vmatpush.msrb.mxu3 %v603_v27  ;;  %v1182_v23 = vld [vmem:[%s7268_s3 + $0x340] sm:$0xff]  ;;  %v5231_v24 = vld [vmem:[%s7268_s3 + $0x30] sm:$0xff] }
  0xd2   : > { %1012 = vmatpush.msrb.mxu0 %v505_v32  ;;  %1032 = vmatpush.msrb.mxu1 %v537_v33  ;;  %v5236_v25 = vld [vmem:[%s7268_s3 + $0x130] sm:$0xff]  ;;  %v5249_v32 = vld [vmem:[%s7268_s3 + $0x20] sm:$0xff] }
  0xd3   : > { %1052 = vmatpush.msrb.mxu2 %v569_v34  ;;  %1072 = vmatpush.msrb.mxu3 %v601_v35  ;;  %v1148_v26 = vld [vmem:[%s7268_s3 + $0x230] sm:$0xff]  ;;  %v5254_v33 = vld [vmem:[%s7268_s3 + $0x120] sm:$0xff] }
  0xd4   : > { %1013 = vmatpush.msrb.mxu0 %v503_v36  ;;  %1033 = vmatpush.msrb.mxu1 %v535_v37  ;;  %v1180_v27 = vld [vmem:[%s7268_s3 + $0x330] sm:$0xff]  ;;  %v1146_v34 = vld [vmem:[%s7268_s3 + $0x220] sm:$0xff] }
  0xd5   : > { %1053 = vmatpush.msrb.mxu2 %v567_v38  ;;  %1073 = vmatpush.msrb.mxu3 %v599_v39  ;;  %v1178_v35 = vld [vmem:[%s7268_s3 + $0x320] sm:$0xff]  ;;  %v5267_v36 = vld [vmem:[%s7268_s3 + $0x10] sm:$0xff] }
  0xd6   : > { %1014 = vmatmul.f32.vlgmr.msrb.gmra.mxu0 %v4809_v28  ;;  %1034 = vmatmul.f32.vlgmr.msrb.gmra.mxu1 %v4812_v29  ;;  %v5040_v28 = vld [vmem:[%s7268_s3 + $0x1e0] sm:$0xff]  ;;  %v5272_v37 = vld [vmem:[%s7268_s3 + $0x110] sm:$0xff] }
  0xd7   : > { %1054 = vmatmul.f32.vlgmr.msrb.gmra.mxu2 %v4815_v30  ;;  %1074 = vmatmul.f32.vlgmr.msrb.gmra.mxu3 %v4818_v31  ;;  %v1170_v29 = vld [vmem:[%s7268_s3 + $0x2e0] sm:$0xff]  ;;  %v5051_v31 = vld [vmem:[%s7268_s3 + $0xd0] sm:$0xff] }
  0xd8   : > { %1206 = vmatpush.msra.mxu0 %v1108_v40  ;;  %1226 = vmatpush.msra.mxu1 %v1140_v41  ;;  %v1202_v30 = vld [vmem:[%s7268_s3 + $0x3e0] sm:$0xff]  ;;  %v1144_v38 = vld [vmem:[%s7268_s3 + $0x210] sm:$0xff]  ;;  %v479_v40 = vpop.permute.xlu1 %478 }
  0xd9   : > { %1246 = vmatpush.msra.mxu2 %v1172_v42  ;;  %1266 = vmatpush.msra.mxu3 %v1204_v43  ;;  %v1176_v39 = vld [vmem:[%s7268_s3 + $0x310] sm:$0xff]  ;;  %v5285_v41 = vld [vmem:[%s7268_s3] sm:$0xff]  ;;  %v5293_v43 = vmul.f32 %v4608_v16, %v479_v40  ;;  %v1141_v16 = vld [vmem:[%s7268_s3 + $0x1f8] sm:$0xff] }
  0xda   : > { %1207 = vmatpush.msra.mxu0 %v5035_v44  ;;  %1227 = vmatpush.msra.mxu1 %v5040_v28  ;;  %v5290_v42 = vld [vmem:[%s7268_s3 + $0x100] sm:$0xff] }
  0xdb   : > { %1247 = vmatpush.msra.mxu2 %v1170_v29  ;;  %1267 = vmatpush.msra.mxu3 %v1202_v30  ;;  %v1142_v29 = vld [vmem:[%s7268_s3 + $0x200] sm:$0xff] }
  0xdc   : > { %1208 = vmatpush.msra.mxu0 %v5051_v31  ;;  %1228 = vmatpush.msra.mxu1 %v5056_v45  ;;  %v1174_v30 = vld [vmem:[%s7268_s3 + $0x300] sm:$0xff] }
  0xdd   : > { %1248 = vmatpush.msra.mxu2 %v1168_v46  ;;  %1268 = vmatpush.msra.mxu3 %v1200_v47  ;;  %v1109_v46 = vld [vmem:[%s7268_s3 + $0xf8] sm:$0xff] }
  0xde   : > { %1209 = vmatpush.msra.mxu0 %v5069_v48  ;;  %1229 = vmatpush.msra.mxu1 %v5074_v49  ;;  %v1173_v47 = vld [vmem:[%s7268_s3 + $0x2f8] sm:$0xff] }
  0xdf   : > { %1249 = vmatpush.msra.mxu2 %v1166_v50  ;;  %1269 = vmatpush.msra.mxu3 %v1198_v51  ;;  %v5315_v50 = vmul.f32 %v4610_v17, %v479_v40  ;;  %v1205_v51 = vld [vmem:[%s7268_s3 + $0x3f8] sm:$0xff]  ;;  %v5328_v17 = vmul.f32 %v4604_v14, %v479_v40 }
  0xe0   : > { %1210 = vmatpush.msra.mxu0 %v5087_v52  ;;  %1230 = vmatpush.msra.mxu1 %v5092_v53  ;;  %v1105_v14 = vld [vmem:[%s7268_s3 + $0xd8] sm:$0xff] }
  0xe1   : > { %1250 = vmatpush.msra.mxu2 %v1164_v54  ;;  %1270 = vmatpush.msra.mxu3 %v1196_v55  ;;  %v1107_v54 = vld [vmem:[%s7268_s3 + $0xe8] sm:$0xff] }
  0xe2   : > { %1211 = vmatpush.msra.mxu0 %v5105_v56  ;;  %1231 = vmatpush.msra.mxu1 %v5110_v57  ;;  %v1139_v55 = vld [vmem:[%s7268_s3 + $0x1e8] sm:$0xff] }
  0xe3   : > { %1251 = vmatpush.msra.mxu2 %v1162_v58  ;;  %1271 = vmatpush.msra.mxu3 %v1194_v59  ;;  %v5331_v58 = vmul.f32 %v4606_v15, %v479_v40  ;;  %v1171_v59 = vld [vmem:[%s7268_s3 + $0x2e8] sm:$0xff]  ;;  %v1137_v15 = vld [vmem:[%s7268_s3 + $0x1d8] sm:$0xff] }
  0xe4   : > { %1212 = vmatpush.msra.mxu0 %v5123_v60  ;;  %1232 = vmatpush.msra.mxu1 %v5128_v61  ;;  %v1193_v40 = vld [vmem:[%s7268_s3 + $0x398] sm:$0xff] }
  0xe5   : > { %1252 = vmatpush.msra.mxu2 %v1160_v62  ;;  %1272 = vmatpush.msra.mxu3 %v1192_v63  ;;  %v1203_v62 = vld [vmem:[%s7268_s3 + $0x3e8] sm:$0xff]  ;;  %v1169_v63 = vld [vmem:[%s7268_s3 + $0x2d8] sm:$0xff] }
  0xe6   : > { %1213 = vmatpush.msra.mxu0 %v5141_v0  ;;  %1233 = vmatpush.msra.mxu1 %v5146_v1 }
  0xe7   : > { %1253 = vmatpush.msra.mxu2 %v1158_v2  ;;  %1273 = vmatpush.msra.mxu3 %v1190_v3  ;;  %v1201_v2 = vld [vmem:[%s7268_s3 + $0x3d8] sm:$0xff]  ;;  %v1103_v3 = vld [vmem:[%s7268_s3 + $0xc8] sm:$0xff] }
  0xe8   : > { %1214 = vmatpush.msra.mxu0 %v5159_v4  ;;  %1234 = vmatpush.msra.mxu1 %v5164_v5 }
  0xe9   : > { %1254 = vmatpush.msra.mxu2 %v1156_v6  ;;  %1274 = vmatpush.msra.mxu3 %v1188_v7  ;;  %v1135_v6 = vld [vmem:[%s7268_s3 + $0x1c8] sm:$0xff] }
  0xea   : > { %1215 = vmatpush.msra.mxu0 %v5177_v8  ;;  %1235 = vmatpush.msra.mxu1 %v5182_v9  ;;  %v1167_v7 = vld [vmem:[%s7268_s3 + $0x2c8] sm:$0xff] }
  0xeb   : > { %1255 = vmatpush.msra.mxu2 %v1154_v10  ;;  %1275 = vmatpush.msra.mxu3 %v1186_v11  ;;  %v1199_v10 = vld [vmem:[%s7268_s3 + $0x3c8] sm:$0xff]  ;;  %v1101_v11 = vld [vmem:[%s7268_s3 + $0xb8] sm:$0xff] }
  0xec   : > { %1216 = vmatpush.msra.mxu0 %v5195_v12  ;;  %1236 = vmatpush.msra.mxu1 %v5200_v13 }
  0xed   : > { %1256 = vmatpush.msra.mxu2 %v1152_v18  ;;  %1276 = vmatpush.msra.mxu3 %v1184_v19  ;;  %v1133_v18 = vld [vmem:[%s7268_s3 + $0x1b8] sm:$0xff] }
  0xee   : > { %1217 = vmatpush.msra.mxu0 %v5213_v20  ;;  %1237 = vmatpush.msra.mxu1 %v5218_v21  ;;  %v1165_v19 = vld [vmem:[%s7268_s3 + $0x2b8] sm:$0xff] }
  0xef   : > { %1257 = vmatpush.msra.mxu2 %v1150_v22  ;;  %1277 = vmatpush.msra.mxu3 %v1182_v23  ;;  %v1197_v22 = vld [vmem:[%s7268_s3 + $0x3b8] sm:$0xff]  ;;  %v1099_v23 = vld [vmem:[%s7268_s3 + $0xa8] sm:$0xff] }
  0xf0   : > { %1218 = vmatpush.msra.mxu0 %v5231_v24  ;;  %1238 = vmatpush.msra.mxu1 %v5236_v25 }
  0xf1   : > { %1258 = vmatpush.msra.mxu2 %v1148_v26  ;;  %1278 = vmatpush.msra.mxu3 %v1180_v27  ;;  %v1131_v26 = vld [vmem:[%s7268_s3 + $0x1a8] sm:$0xff] }
  0xf2   : > { %1219 = vmatpush.msra.mxu0 %v5249_v32  ;;  %1239 = vmatpush.msra.mxu1 %v5254_v33  ;;  %v1163_v27 = vld [vmem:[%s7268_s3 + $0x2a8] sm:$0xff] }
  0xf3   : > { %1259 = vmatpush.msra.mxu2 %v1146_v34  ;;  %1279 = vmatpush.msra.mxu3 %v1178_v35  ;;  %v1195_v34 = vld [vmem:[%s7268_s3 + $0x3a8] sm:$0xff]  ;;  %v1097_v35 = vld [vmem:[%s7268_s3 + $0x98] sm:$0xff] }
  0xf4   : > { %1220 = vmatpush.msra.mxu0 %v5267_v36  ;;  %1240 = vmatpush.msra.mxu1 %v5272_v37 }
  0xf5   : > { %1260 = vmatpush.msra.mxu2 %v1144_v38  ;;  %1280 = vmatpush.msra.mxu3 %v1176_v39  ;;  %v1129_v38 = vld [vmem:[%s7268_s3 + $0x198] sm:$0xff] }
  0xf6   : > { %1221 = vmatpush.msra.mxu0 %v5285_v41  ;;  %1241 = vmatpush.msra.mxu1 %v5290_v42  ;;  %v1161_v39 = vld [vmem:[%s7268_s3 + $0x298] sm:$0xff] }
  0xf7   : > { %1261 = vmatpush.msra.mxu2 %v1142_v29  ;;  %1281 = vmatpush.msra.mxu3 %v1174_v30  ;;  %v1095_v29 = vld [vmem:[%s7268_s3 + $0x88] sm:$0xff] }
  0xf8   : > { %1262 = vmatmul.f32.vlgmr.msra.gmra.mxu2 %v5293_v43  ;;  %1286 = vmatpush.msrb.mxu0 %v1109_v46  ;;  %v1127_v30 = vld [vmem:[%s7268_s3 + $0x188] sm:$0xff] }
  0xf9   : > { %1306 = vmatpush.msrb.mxu1 %v1141_v16  ;;  %1326 = vmatpush.msrb.mxu2 %v1173_v47  ;;  %v1159_v46 = vld [vmem:[%s7268_s3 + $0x288] sm:$0xff]  ;;  %v1093_v47 = vld [vmem:[%s7268_s3 + $0x78] sm:$0xff] }
  0xfa   : > { %1346 = vmatpush.msrb.mxu3 %v1205_v51  ;;  %1287 = vmatpush.msrb.mxu0 %v1107_v54  ;;  %v1191_v16 = vld [vmem:[%s7268_s3 + $0x388] sm:$0xff]  ;;  %v1125_v51 = vld [vmem:[%s7268_s3 + $0x178] sm:$0xff] }
  0xfb   : > { %1282 = vmatmul.f32.vlgmr.msra.gmra.mxu3 %v5315_v50  ;;  %1307 = vmatpush.msrb.mxu1 %v1139_v55  ;;  %v1157_v54 = vld [vmem:[%s7268_s3 + $0x278] sm:$0xff] }
  0xfc   : > { %1327 = vmatpush.msrb.mxu2 %v1171_v59  ;;  %1347 = vmatpush.msrb.mxu3 %v1203_v62  ;;  %v1189_v55 = vld [vmem:[%s7268_s3 + $0x378] sm:$0xff]  ;;  %v1091_v59 = vld [vmem:[%s7268_s3 + $0x68] sm:$0xff] }
  0xfd   : > { %1222 = vmatmul.f32.vlgmr.msra.gmra.mxu0 %v5328_v17  ;;  %1242 = vmatmul.f32.vlgmr.msra.gmra.mxu1 %v5331_v58  ;;  %v1123_v62 = vld [vmem:[%s7268_s3 + $0x168] sm:$0xff] }
  0xfe   : > { %1288 = vmatpush.msrb.mxu0 %v1105_v14  ;;  %1308 = vmatpush.msrb.mxu1 %v1137_v15  ;;  %v1155_v14 = vld [vmem:[%s7268_s3 + $0x268] sm:$0xff] }
  0xff   : > { %1328 = vmatpush.msrb.mxu2 %v1169_v63  ;;  %1348 = vmatpush.msrb.mxu3 %v1201_v2  ;;  %v1187_v15 = vld [vmem:[%s7268_s3 + $0x368] sm:$0xff]  ;;  %v1089_v63 = vld [vmem:[%s7268_s3 + $0x58] sm:$0xff] }
 0x100   : > { %1289 = vmatpush.msrb.mxu0 %v1103_v3  ;;  %1309 = vmatpush.msrb.mxu1 %v1135_v6  ;;  %v1121_v2 = vld [vmem:[%s7268_s3 + $0x158] sm:$0xff] }
 0x101   : > { %1329 = vmatpush.msrb.mxu2 %v1167_v7  ;;  %1349 = vmatpush.msrb.mxu3 %v1199_v10  ;;  %v1153_v3 = vld [vmem:[%s7268_s3 + $0x258] sm:$0xff]  ;;  %v1087_v7 = vld [vmem:[%s7268_s3 + $0x48] sm:$0xff] }
 0x102   : > { %1290 = vmatpush.msrb.mxu0 %v1101_v11  ;;  %1310 = vmatpush.msrb.mxu1 %v1133_v18  ;;  %v1185_v6 = vld [vmem:[%s7268_s3 + $0x358] sm:$0xff]  ;;  %v1119_v10 = vld [vmem:[%s7268_s3 + $0x148] sm:$0xff] }
 0x103   : > { %1330 = vmatpush.msrb.mxu2 %v1165_v19  ;;  %1350 = vmatpush.msrb.mxu3 %v1197_v22  ;;  %v1151_v11 = vld [vmem:[%s7268_s3 + $0x248] sm:$0xff]  ;;  %v1085_v19 = vld [vmem:[%s7268_s3 + $0x38] sm:$0xff] }
 0x104   : > { %1291 = vmatpush.msrb.mxu0 %v1099_v23  ;;  %1311 = vmatpush.msrb.mxu1 %v1131_v26  ;;  %v1183_v18 = vld [vmem:[%s7268_s3 + $0x348] sm:$0xff]  ;;  %v1117_v22 = vld [vmem:[%s7268_s3 + $0x138] sm:$0xff] }
 0x105   : > { %1331 = vmatpush.msrb.mxu2 %v1163_v27  ;;  %1351 = vmatpush.msrb.mxu3 %v1195_v34  ;;  %v1149_v23 = vld [vmem:[%s7268_s3 + $0x238] sm:$0xff]  ;;  %v1083_v27 = vld [vmem:[%s7268_s3 + $0x28] sm:$0xff] }
 0x106   : > { %1292 = vmatpush.msrb.mxu0 %v1097_v35  ;;  %1312 = vmatpush.msrb.mxu1 %v1129_v38  ;;  %v1181_v26 = vld [vmem:[%s7268_s3 + $0x338] sm:$0xff]  ;;  %v1115_v34 = vld [vmem:[%s7268_s3 + $0x128] sm:$0xff] }
 0x107   : > { %1332 = vmatpush.msrb.mxu2 %v1161_v39  ;;  %1352 = vmatpush.msrb.mxu3 %v1193_v40  ;;  %v1147_v35 = vld [vmem:[%s7268_s3 + $0x228] sm:$0xff]  ;;  %v1081_v39 = vld [vmem:[%s7268_s3 + $0x18] sm:$0xff] }
 0x108   : > { %1293 = vmatpush.msrb.mxu0 %v1095_v29  ;;  %1313 = vmatpush.msrb.mxu1 %v1127_v30  ;;  %v1179_v38 = vld [vmem:[%s7268_s3 + $0x328] sm:$0xff]  ;;  %v1113_v40 = vld [vmem:[%s7268_s3 + $0x118] sm:$0xff] }
 0x109   : > { %1333 = vmatpush.msrb.mxu2 %v1159_v46  ;;  %1353 = vmatpush.msrb.mxu3 %v1191_v16  ;;  %v1145_v29 = vld [vmem:[%s7268_s3 + $0x218] sm:$0xff]  ;;  %v1079_v46 = vld [vmem:[%s7268_s3 + $0x8] sm:$0xff] }
 0x10a   : > { %1294 = vmatpush.msrb.mxu0 %v1093_v47  ;;  %1314 = vmatpush.msrb.mxu1 %v1125_v51  ;;  %v1177_v30 = vld [vmem:[%s7268_s3 + $0x318] sm:$0xff]  ;;  %v1111_v16 = vld [vmem:[%s7268_s3 + $0x108] sm:$0xff] }
 0x10b   : > { %1334 = vmatpush.msrb.mxu2 %v1157_v54  ;;  %1354 = vmatpush.msrb.mxu3 %v1189_v55  ;;  %v1143_v47 = vld [vmem:[%s7268_s3 + $0x208] sm:$0xff] }
 0x10c   : > { %1295 = vmatpush.msrb.mxu0 %v1091_v59  ;;  %1315 = vmatpush.msrb.mxu1 %v1123_v62  ;;  %v1175_v51 = vld [vmem:[%s7268_s3 + $0x308] sm:$0xff] }
 0x10d   : > { %1335 = vmatpush.msrb.mxu2 %v1155_v14  ;;  %1355 = vmatpush.msrb.mxu3 %v1187_v15  ;;  %v775_v54 = vpop.f32.mrf.mxu0  ;;  %v795_v55 = vpop.f32.mrf.mxu1 }
 0x10e   : > { %1296 = vmatpush.msrb.mxu0 %v1089_v63  ;;  %1316 = vmatpush.msrb.mxu1 %v1121_v2 }
 0x10f   : > { %1336 = vmatpush.msrb.mxu2 %v1153_v3  ;;  %1356 = vmatpush.msrb.mxu3 %v1185_v6 }
 0x110   : > { %1297 = vmatpush.msrb.mxu0 %v1087_v7  ;;  %1317 = vmatpush.msrb.mxu1 %v1119_v10  ;;  %v796_v10 = vadd.f32 %v795_v55, %v775_v54 }
 0x111   : > { %1337 = vmatpush.msrb.mxu2 %v1151_v11  ;;  %1357 = vmatpush.msrb.mxu3 %v1183_v18 }
 0x112   : > { %1298 = vmatpush.msrb.mxu0 %v1085_v19  ;;  %1318 = vmatpush.msrb.mxu1 %v1117_v22 }
 0x113   : > { %1338 = vmatpush.msrb.mxu2 %v1149_v23  ;;  %1358 = vmatpush.msrb.mxu3 %v1181_v26 }
 0x114   : > { %1299 = vmatpush.msrb.mxu0 %v1083_v27  ;;  %1319 = vmatpush.msrb.mxu1 %v1115_v34  ;;  %v815_v59 = vpop.f32.mrf.mxu2  ;;  %v835_v62 = vpop.f32.mrf.mxu3 }
 0x115   : > { %1339 = vmatpush.msrb.mxu2 %v1147_v35  ;;  %1359 = vmatpush.msrb.mxu3 %v1179_v38 }
 0x116   : > { %1300 = vmatpush.msrb.mxu0 %v1081_v39  ;;  %1320 = vmatpush.msrb.mxu1 %v1113_v40 }
 0x117   : > { %1340 = vmatpush.msrb.mxu2 %v1145_v29  ;;  %1360 = vmatpush.msrb.mxu3 %v1177_v30  ;;  %v855_v14 = vpop.f32.mrf.mxu0  ;;  %v875_v15 = vpop.f32.mrf.mxu1 }
 0x118   : > { %1301 = vmatpush.msrb.mxu0 %v1079_v46  ;;  %1321 = vmatpush.msrb.mxu1 %v1111_v16  ;;  %v1372_v16 = vpop.permute.xlu1 %1371 }
 0x119   : > { %1341 = vmatpush.msrb.mxu2 %v1143_v47  ;;  %1361 = vmatpush.msrb.mxu3 %v1175_v51 }
 0x11a   : > { %1302 = vmatmul.f32.vlgmr.msrb.gmra.mxu0 %v5328_v17  ;;  %1322 = vmatmul.f32.vlgmr.msrb.gmra.mxu1 %v5331_v58  ;;  %v816_v17 = vadd.f32 %v815_v59, %v796_v10  ;;  %v876_v59 = vadd.f32 %v875_v15, %v855_v14 }
 0x11b   : > { %1342 = vmatmul.f32.vlgmr.msrb.gmra.mxu2 %v5293_v43  ;;  %1362 = vmatmul.f32.vlgmr.msrb.gmra.mxu3 %v5315_v50 }
 0x11c   : > { %v836_v19 = vadd.f32 %v835_v62, %v816_v17 }
 0x11e   : > { %v895_v63 = vpop.f32.mrf.mxu2  ;;  %v915_v2 = vpop.f32.mrf.mxu3 }
 0x131   : > { %v935_v3 = vpop.f32.mrf.mxu0  ;;  %v955_v6 = vpop.f32.mrf.mxu1 }
 0x132   : > { %v936_v22 = vadd.f32 %v935_v3, %v836_v19  ;;  %v896_v3 = vadd.f32 %v895_v63, %v876_v59 }
 0x134   : > { %v956_v23 = vadd.f32 %v955_v6, %v936_v22 }
 0x138   : > { %v975_v7 = vpop.f32.mrf.mxu2  ;;  %v995_v11 = vpop.f32.mrf.mxu3 }
 0x139   : > { %v976_v34 = vadd.f32 %v975_v7, %v956_v23  ;;  %v916_v7 = vadd.f32 %v915_v2, %v896_v3 }
 0x13b   : > { %v996_v29 = vadd.f32 %v995_v11, %v976_v34 }
 0x153   : > { %v1015_v18 = vpop.f32.mrf.mxu0  ;;  %v1035_v58 = vpop.f32.mrf.mxu1 }
 0x154   : > { %v1016_v17 = vadd.f32 %v1015_v18, %v916_v7 }
 0x15a   : > { %v1055_v43 = vpop.f32.mrf.mxu2  ;;  %v1075_v50 = vpop.f32.mrf.mxu3 }
 0x17a   : > { %v1223_v26 = vpop.f32.mrf.mxu0  ;;  %v1243_v27 = vpop.f32.mrf.mxu1 }
 0x17b   : > { %v1244_v35 = vadd.f32 %v1243_v27, %v1223_v26  ;;  %v1263_v38 = vpop.f32.mrf.mxu2  ;;  %v1036_v27 = vadd.f32 %v1035_v58, %v1016_v17 }
 0x17d   : > { %v1264_v39 = vadd.f32 %v1263_v38, %v1244_v35 }
 0x17e   : > { %v1283_v40 = vpop.f32.mrf.mxu3 }
 0x17f   : > { %v1284_v30 = vadd.f32 %v1283_v40, %v1264_v39  ;;  %v1056_v39 = vadd.f32 %v1055_v43, %v1036_v27  ;;  %v1410_v43 = vld [vmem:[%s7271_s6] sm:$0xff]  ;;  %v5535_v27 = vld [vmem:[%s7271_s6 + $0x18] sm:$0xff] }
 0x181   : > { %v1366_v46 = vadd.f32 %v1284_v30, %v996_v29  ;;  %v1076_v2 = vadd.f32 %v1075_v50, %v1056_v39  ;;  %v5521_v50 = vld [vmem:[%s7271_s6 + $0x8] sm:$0xff]  ;;  %v1567_v39 = vld [vmem:[%s7301_s2 + $0x1e0] sm:$0xff] }
 0x183   : > { %v1374_v47 = vadd.f32 %v1372_v16, %v1366_v46 }
 0x185   : > { %v1376_v51 = vand.u32 2147483647, %v1374_v47  ;;  %v1402_v38 = vmax.f32 %v1374_v47, 0.0 }
 0x187   : > { %v1378_v54 = vsub.f32 0.0, %v1376_v51 }
 0x189   : > { %v1380_v55 = vmul.f32 1.442695, %v1378_v54 }
 0x18b   : > { %3890 = vpow2.f32 %v1380_v55 }
 0x191   : > { %v3891_v62 = vpop.eup %3890 }
 0x192   : > { %v1384_v6 = vadd.f32 1.0, %v3891_v62  ;;  %v1387_v10 = vmul.f32 -0.5, %v3891_v62  ;;  %v1390_v22 = vand.u32 2147483647, %v3891_v62 }
 0x194   : > { %3892 = vlog2.f32 %v1384_v6  ;;  %v1388_v19 = vadd.f32 1.0, %v1387_v10  ;;  %vm1391_vm0 = vcmp.lt.f32.partialorder %v1390_v22, 0.0004427343  ;;  %v5528_v10 = vld [vmem:[%s7271_s6 + $0x10] sm:$0xff] }
 0x196   : > { %v1389_v35 = vmul.f32 %v3891_v62, %v1388_v19 }
 0x197   : > { %v1303_v11 = vpop.f32.mrf.mxu0  ;;  %v1323_v26 = vpop.f32.mrf.mxu1 }
 0x198   : > { %v1324_v14 = vadd.f32 %v1323_v26, %v1303_v11 }
 0x19a   : > { %v3893_v23 = vpop.eup %3892 }
 0x19b   : > { %v1386_v34 = vmul.f32 0.6931472, %v3893_v23 }
 0x19d   : > { %v1392_v40 = vsel %vm1391_vm0, %v1389_v35, %v1386_v34  ;;  %v5542_v34 = vld [vmem:[%s7303_s1 + $0xf0] sm:$0xff] }
 0x19e   : > { %v1404_v15 = vadd.f32 %v1402_v38, %v1392_v40  ;;  %v1343_v63 = vpop.f32.mrf.mxu2  ;;  %v1363_v30 = vpop.f32.mrf.mxu3  ;;  %v1568_v35 = vld [vmem:[%s7301_s2 + $0x1f0] sm:$0xff]  ;;  %v5551_v38 = vld [vmem:[%s7303_s1 + $0xe0] sm:$0xff] }
 0x19f   : > { %v1344_v29 = vadd.f32 %v1343_v63, %v1324_v14  ;;  %1592 = vmatpush.msra.mxu3 %v1568_v35  ;;  %v5560_v40 = vld [vmem:[%s7303_s1 + $0xd0] sm:$0xff] }
 0x1a0   : > { %3894 = vtanh.f32 %v1404_v15  ;;  %v1566_v15 = vld [vmem:[%s7301_s2 + $0x1d0] sm:$0xff] }
 0x1a1   : > { %v1364_v18 = vadd.f32 %v1363_v30, %v1344_v29  ;;  %1593 = vmatpush.msra.mxu3 %v1567_v39  ;;  %v1414_v29 = vld [vmem:[%s7271_s6 + $0x20] sm:$0xff]  ;;  %v1536_v30 = vld [vmem:[%s7303_s1 + $0x1f0] sm:$0xff] }
 0x1a2   : > { %v1530_v35 = vld [vmem:[%s7303_s1 + $0x190] sm:$0xff] }
 0x1a3   : > { %v1367_v46 = vadd.f32 %v1364_v18, %v1076_v2  ;;  %1594 = vmatpush.msra.mxu3 %v1566_v15  ;;  %v5575_v2 = vld [vmem:[%s7301_s2 + $0xf0] sm:$0xff]  ;;  %v5580_v18 = vld [vmem:[%s7303_s1 + $0xc0] sm:$0xff] }
 0x1a4   : > { %v5682_v39 = vld [vmem:[%s7303_s1 + $0x70] sm:$0xff] }
 0x1a5   : > { %v1375_v51 = vadd.f32 %v1372_v16, %v1367_v46  ;;  %v1535_v46 = vld [vmem:[%s7303_s1 + $0x1e0] sm:$0xff]  ;;  %v1560_v15 = vld [vmem:[%s7301_s2 + $0x170] sm:$0xff] }
 0x1a6   : > { %v3895_v54 = vpop.eup %3894 }
 0x1a7   : > { %v1377_v55 = vand.u32 2147483647, %v1375_v51  ;;  %v1408_v59 = vmul.f32 %v3895_v54, %v1374_v47  ;;  %v1403_v23 = vmax.f32 %v1375_v51, 0.0  ;;  %v5594_v54 = vld [vmem:[%s7301_s2 + $0xe0] sm:$0xff] }
 0x1a9   : > { %v1379_v58 = vsub.f32 0.0, %v1377_v55  ;;  %1450 = vmatpush.msra.mxu0 %v1408_v59  ;;  %v5599_v55 = vld [vmem:[%s7303_s1 + $0xb0] sm:$0xff] }
 0x1aa   : > { %3649 = vmatmul.msk.f32.vlgmr.msra.gmra.mxu0 %vm1416_vm1, %v1410_v43  ;;  %v1534_v59 = vld [vmem:[%s7303_s1 + $0x1d0] sm:$0xff] }
 0x1ab   : > { %v1382_v62 = vmul.f32 1.442695, %v1379_v58  ;;  %1615 = vmatpush.msrb.mxu0 %v5542_v34  ;;  %v1564_v58 = vld [vmem:[%s7301_s2 + $0x1b0] sm:$0xff] }
 0x1ad   : > { %3896 = vpow2.f32 %v1382_v62  ;;  %1616 = vmatpush.msrb.mxu0 %v5551_v38  ;;  %v5612_v62 = vld [vmem:[%s7301_s2 + $0xd0] sm:$0xff] }
 0x1af   : > { %1617 = vmatpush.msrb.mxu0 %v5560_v40 }
 0x1b1   : > { %1618 = vmatpush.msrb.mxu0 %v5580_v18 }
 0x1b2   : > { %3650 = vmatmul.msk.f32.gmra.mxu0 %vm1416_vm1, %v5521_v50 }
 0x1b3   : > { %v3897_v16 = vpop.eup %3896  ;;  %1619 = vmatpush.msrb.mxu0 %v5599_v55 }
 0x1b4   : > { %v1393_v3 = vadd.f32 1.0, %v3897_v16  ;;  %v1396_v47 = vmul.f32 -0.5, %v3897_v16  ;;  %v1399_v7 = vand.u32 2147483647, %v3897_v16 }
 0x1b6   : > { %3898 = vlog2.f32 %v1393_v3  ;;  %v1397_v6 = vadd.f32 1.0, %v1396_v47  ;;  %vm1400_vm2 = vcmp.lt.f32.partialorder %v1399_v7, 0.0004427343  ;;  %v1563_v3 = vld [vmem:[%s7301_s2 + $0x1a0] sm:$0xff]  ;;  %v1415_v47 = vld [vmem:[%s7271_s6 + $0x28] sm:$0xff]  ;;  %v1532_v7 = vld [vmem:[%s7303_s1 + $0x1b0] sm:$0xff] }
 0x1b8   : > { %v1398_v22 = vmul.f32 %v3897_v16, %v1397_v6  ;;  %v1533_v16 = vld [vmem:[%s7303_s1 + $0x1c0] sm:$0xff] }
 0x1b9   : > { %v5634_v6 = vld [vmem:[%s7301_s2 + $0xc0] sm:$0xff] }
 0x1ba   : > { %3651 = vmatmul.msk.f32.gmra.mxu0 %vm1416_vm1, %v5528_v10 }
 0x1bc   : > { %v3899_v17 = vpop.eup %3898 }
 0x1bd   : > { %v1395_v19 = vmul.f32 0.6931472, %v3899_v17  ;;  %v5643_v17 = vld [vmem:[%s7303_s1 + $0x90] sm:$0xff] }
 0x1bf   : > { %v1401_v11 = vsel %vm1400_vm2, %v1398_v22, %v1395_v19  ;;  %v5651_v19 = vld [vmem:[%s7301_s2 + $0xb0] sm:$0xff] }
 0x1c0   : > { %v1405_v26 = vadd.f32 %v1403_v23, %v1401_v11  ;;  %v1562_v22 = vld [vmem:[%s7301_s2 + $0x190] sm:$0xff]  ;;  %v1531_v23 = vld [vmem:[%s7303_s1 + $0x1a0] sm:$0xff] }
 0x1c1   : > { %v5669_v11 = vld [vmem:[%s7301_s2 + $0xa0] sm:$0xff] }
 0x1c2   : > { %3900 = vtanh.f32 %v1405_v26  ;;  %3652 = vmatmul.msk.f32.gmra.mxu0 %vm1416_vm1, %v5535_v27  ;;  %v1561_v26 = vld [vmem:[%s7301_s2 + $0x180] sm:$0xff] }
 0x1c8   : > { %v3901_v14 = vpop.eup %3900 }
 0x1c9   : > { %v1409_v63 = vmul.f32 %v3901_v14, %v1375_v51  ;;  %v1565_v51 = vld [vmem:[%s7301_s2 + $0x1c0] sm:$0xff]  ;;  %v5687_v14 = vld [vmem:[%s7301_s2 + $0x90] sm:$0xff] }
 0x1ca   : > { %3653 = vmatmul.msk.f32.gmra.mxu0 %vm1416_vm1, %v1414_v29  ;;  %1595 = vmatpush.msra.mxu3 %v1565_v51  ;;  %v5715_v51 = vld [vmem:[%s7303_s1 + $0x50] sm:$0xff] }
 0x1cb   : > { %1485 = vmatpush.msra.mxu1 %v1409_v63  ;;  %3723 = vmatpush.msra.mxu2 %v1409_v63  ;;  %v5697_v63 = vld [vmem:[%s7303_s1 + $0x60] sm:$0xff] }
 0x1cc   : > { %3655 = vmatmul.msk.f32.vlgmr.msra.gmra.mxu1 %vm1416_vm1, %v1410_v43  ;;  %3659 = vmatmul.msk.f32.vlgmr.msra.gmra.mxu2 %vm1416_vm1, %v1414_v29  ;;  %v5617_v43 = vld [vmem:[%s7303_s1 + $0xa0] sm:$0xff] }
 0x1cd   : > { %1638 = vmatpush.msrb.mxu1 %v1536_v30  ;;  %1569 = vmatpush.msrb.mxu2 %v5575_v2  ;;  %v1529_v29 = vld [vmem:[%s7303_s1 + $0x180] sm:$0xff] }
 0x1ce   : > { %1596 = vmatpush.msra.mxu3 %v1564_v58  ;;  %1620 = vmatpush.msrb.mxu0 %v5617_v43  ;;  %v5705_v30 = vld [vmem:[%s7301_s2 + $0x80] sm:$0xff]  ;;  %v5725_v58 = vld [vmem:[%s7301_s2 + $0x70] sm:$0xff] }
 0x1cf   : > { %1639 = vmatpush.msrb.mxu1 %v1535_v46  ;;  %1570 = vmatpush.msrb.mxu2 %v5594_v54  ;;  %v1559_v46 = vld [vmem:[%s7301_s2 + $0x160] sm:$0xff] }
 0x1d0   : > { %1597 = vmatpush.msra.mxu3 %v1563_v3  ;;  %1621 = vmatpush.msrb.mxu0 %v5643_v17  ;;  %v1527_v3 = vld [vmem:[%s7303_s1 + $0x160] sm:$0xff] }
 0x1d1   : > { %1640 = vmatpush.msrb.mxu1 %v1534_v59  ;;  %1571 = vmatpush.msrb.mxu2 %v5612_v62  ;;  %v1528_v59 = vld [vmem:[%s7303_s1 + $0x170] sm:$0xff] }
 0x1d2   : > { %3654 = vmatmul.msk.f32.gmra.mxu0 %vm1416_vm1, %v1415_v47  ;;  %1598 = vmatpush.msra.mxu3 %v1562_v22  ;;  %v5753_v22 = vld [vmem:[%s7303_s1 + $0x30] sm:$0xff] }
 0x1d3   : > { %1641 = vmatpush.msrb.mxu1 %v1533_v16  ;;  %1572 = vmatpush.msrb.mxu2 %v5634_v6  ;;  %v1558_v16 = vld [vmem:[%s7301_s2 + $0x150] sm:$0xff] }
 0x1d4   : > { %3656 = vmatmul.msk.f32.gmra.mxu1 %vm1416_vm1, %v5521_v50  ;;  %3660 = vmatmul.msk.f32.gmra.mxu2 %vm1416_vm1, %v1415_v47  ;;  %v5664_v50 = vld [vmem:[%s7303_s1 + $0x80] sm:$0xff] }
 0x1d5   : > { %1642 = vmatpush.msrb.mxu1 %v1532_v7  ;;  %1573 = vmatpush.msrb.mxu2 %v5651_v19  ;;  %v5743_v47 = vld [vmem:[%s7301_s2 + $0x60] sm:$0xff] }
 0x1d6   : > { %1622 = vmatpush.msrb.mxu0 %v5664_v50  ;;  %1599 = vmatpush.msra.mxu3 %v1561_v26  ;;  %v1557_v7 = vld [vmem:[%s7301_s2 + $0x140] sm:$0xff]  ;;  %v5761_v26 = vld [vmem:[%s7301_s2 + $0x50] sm:$0xff] }
 0x1d7   : > { %1643 = vmatpush.msrb.mxu1 %v1531_v23  ;;  %1574 = vmatpush.msrb.mxu2 %v5669_v11  ;;  %v1526_v23 = vld [vmem:[%s7303_s1 + $0x150] sm:$0xff] }
 0x1d8   : > { %1623 = vmatpush.msrb.mxu0 %v5682_v39  ;;  %1600 = vmatpush.msra.mxu3 %v1560_v15  ;;  %v1525_v15 = vld [vmem:[%s7303_s1 + $0x140] sm:$0xff] }
 0x1d9   : > { %1644 = vmatpush.msrb.mxu1 %v1530_v35  ;;  %1575 = vmatpush.msrb.mxu2 %v5687_v14  ;;  %v1556_v35 = vld [vmem:[%s7301_s2 + $0x130] sm:$0xff] }
 0x1da   : > { %1624 = vmatpush.msrb.mxu0 %v5697_v63  ;;  %1601 = vmatpush.msra.mxu3 %v1559_v46  ;;  %v5781_v46 = vld [vmem:[%s7303_s1 + $0x20] sm:$0xff] }
 0x1db   : > { %1645 = vmatpush.msrb.mxu1 %v1529_v29  ;;  %1576 = vmatpush.msrb.mxu2 %v5705_v30  ;;  %v5774_v29 = vld [vmem:[%s7301_s2 + $0x40] sm:$0xff]  ;;  %7304 = vst [vmem:[#allocation8_spill] sm:$0xff] %v5781_v46 }
 0x1dc   : > { %3657 = vmatmul.msk.f32.gmra.mxu1 %vm1416_vm1, %v5528_v10  ;;  %v5735_v10 = vld [vmem:[%s7303_s1 + $0x40] sm:$0xff]  ;;  %1625 = vmatpush.msrb.mxu0 %v5715_v51 }
 0x1dd   : > { %1646 = vmatpush.msrb.mxu1 %v1528_v59  ;;  %1577 = vmatpush.msrb.mxu2 %v5725_v58  ;;  %v1555_v59 = vld [vmem:[%s7301_s2 + $0x120] sm:$0xff] }
 0x1de   : > { %1602 = vmatpush.msra.mxu3 %v1558_v16  ;;  %1626 = vmatpush.msrb.mxu0 %v5735_v10  ;;  %v1524_v16 = vld [vmem:[%s7303_s1 + $0x130] sm:$0xff] }
 0x1df   : > { %1647 = vmatpush.msrb.mxu1 %v1527_v3  ;;  %1578 = vmatpush.msrb.mxu2 %v5743_v47  ;;  %v5794_v3 = vld [vmem:[%s7301_s2 + $0x30] sm:$0xff] }
 0x1e0   : > { %1603 = vmatpush.msra.mxu3 %v1557_v7  ;;  %1627 = vmatpush.msrb.mxu0 %v5753_v22  ;;  %v5800_v7 = vld [vmem:[%s7303_s1 + $0x10] sm:$0xff] }
 0x1e1   : > { %1648 = vmatpush.msrb.mxu1 %v1526_v23  ;;  %1579 = vmatpush.msrb.mxu2 %v5761_v26  ;;  %7305 = vst [vmem:[#allocation9_spill] sm:$0xff] %v5800_v7  ;;  %v1523_v23 = vld [vmem:[%s7303_s1 + $0x120] sm:$0xff] }
 0x1e2   : > { %1604 = vmatpush.msra.mxu3 %v1556_v35  ;;  %1628 = vmatpush.msrb.mxu0 %v5781_v46  ;;  %v5812_v35 = vld [vmem:[%s7301_s2 + $0x20] sm:$0xff]  ;;  %v5822_v46 = vld [vmem:[%s7301_s2 + $0x10] sm:$0xff] }
 0x1e3   : > { %1649 = vmatpush.msrb.mxu1 %v1525_v15  ;;  %1580 = vmatpush.msrb.mxu2 %v5774_v29  ;;  %v1522_v15 = vld [vmem:[%s7303_s1 + $0x110] sm:$0xff] }
 0x1e4   : > { %3658 = vmatmul.msk.f32.gmra.mxu1 %vm1416_vm1, %v5535_v27  ;;  %v1554_v27 = vld [vmem:[%s7301_s2 + $0x110] sm:$0xff]  ;;  %1605 = vmatpush.msra.mxu3 %v1555_v59  ;;  %v5829_v59 = vld [vmem:[%s7303_s1] sm:$0xff] }
 0x1e5   : > { %1650 = vmatpush.msrb.mxu1 %v1524_v16  ;;  %1581 = vmatpush.msrb.mxu2 %v5794_v3  ;;  %v1521_v16 = vld [vmem:[%s7303_s1 + $0x100] sm:$0xff]  ;;  %s3585_s1 = scalar_lea.hbm %s7279_s14, %s4152_s17 }
 0x1e6   : > { %1629 = vmatpush.msrb.mxu0 %v5800_v7  ;;  %1606 = vmatpush.msra.mxu3 %v1554_v27  ;;  %v5838_v27 = vld [vmem:[%s7301_s2] sm:$0xff]  ;;  %s3589_s21 = sshll.u32 %s3585_s1, 4  ;;  %s3590_s21 = int_to_ptr.hbm [resolvable:$true] %s3589_s21 }
 0x1e7   : > { %1651 = vmatpush.msrb.mxu1 %v1523_v23  ;;  %1582 = vmatpush.msrb.mxu2 %v5812_v35  ;;  %v1553_v23 = vld [vmem:[%s7301_s2 + $0x100] sm:$0xff] }
 0x1e8   : > { %1630 = vmatpush.msrb.mxu0 %v5829_v59  ;;  %1607 = vmatpush.msra.mxu3 %v1553_v23 }
 0x1e9   : > { %1652 = vmatpush.msrb.mxu1 %v1522_v15  ;;  %1583 = vmatpush.msrb.mxu2 %v5822_v46  ;;  %v3986_v15 = vld [vmem:[%s7268_s3 + $0xf0] sm:$0xff] }
 0x1eb   : > { %1653 = vmatpush.msrb.mxu1 %v1521_v16  ;;  %1584 = vmatpush.msrb.mxu2 %v5838_v27  ;;  %v3987_v16 = vld [vmem:[%s7268_s3 + $0x1f0] sm:$0xff] }
 0x1ec   : > { %1716 = vmatpush.msrb.mxu3 %v3987_v16 }
 0x1ed   : > { %1693 = vmatpush.msra.mxu2 %v3986_v15  ;;  %1923 = vmatpush.msra.mxu1 %v5575_v2 }
 0x1ee   : > { %1717 = vmatpush.msrb.mxu3 %v5040_v28 }
 0x1ef   : > { %1694 = vmatpush.msra.mxu2 %v5035_v44  ;;  %1924 = vmatpush.msra.mxu1 %v5594_v54 }
 0x1f0   : > { %1718 = vmatpush.msrb.mxu3 %v5056_v45 }
 0x1f1   : > { %1695 = vmatpush.msra.mxu2 %v5051_v31  ;;  %1925 = vmatpush.msra.mxu1 %v5612_v62 }
 0x1f2   : > { %1719 = vmatpush.msrb.mxu3 %v5074_v49 }
 0x1f3   : > { %1696 = vmatpush.msra.mxu2 %v5069_v48  ;;  %1926 = vmatpush.msra.mxu1 %v5634_v6  ;;  %v1742_v48 = vld [vmem:[%s7272_s7 + $0x8] sm:$0xff] }
 0x1f4   : > { %1720 = vmatpush.msrb.mxu3 %v5092_v53  ;;  %1750 = vperm.xlu2 %3769, %v1742_v48   ;;  %v1741_v53 = vld [vmem:[%s7272_s7] sm:$0xff] }
 0x1f5   : > { %1697 = vmatpush.msra.mxu2 %v5087_v52  ;;  %1927 = vmatpush.msra.mxu1 %v5651_v19 }
 0x1f6   : > { %1721 = vmatpush.msrb.mxu3 %v5110_v57 }
 0x1f7   : > { %1698 = vmatpush.msra.mxu2 %v5105_v56  ;;  %1928 = vmatpush.msra.mxu1 %v5669_v11  ;;  %v2031_v56 = vld [vmem:[%s7274_s9 + $0x8] sm:$0xff] }
 0x1f8   : > { %1722 = vmatpush.msrb.mxu3 %v5128_v61 }
 0x1f9   : > { %1699 = vmatpush.msra.mxu2 %v5123_v60  ;;  %1929 = vmatpush.msra.mxu1 %v5687_v14  ;;  %v2541_v60 = vld [vmem:[%s7276_s11 + $0x8] sm:$0xff] }
 0x1fa   : > { %1723 = vmatpush.msrb.mxu3 %v5146_v1  ;;  %v7306_v1 = vld [vmem:[#allocation8_spill] sm:$0xff] }
 0x1fb   : > { %1700 = vmatpush.msra.mxu2 %v5141_v0  ;;  %1930 = vmatpush.msra.mxu1 %v5705_v30 }
 0x1fc   : > { %1724 = vmatpush.msrb.mxu3 %v5164_v5  ;;  %1745 = vperm.xlu2 %3769, %v1741_v53   ;;  %v7307_v5 = vld [vmem:[#allocation9_spill] sm:$0xff] }
 0x1fd   : > { %1701 = vmatpush.msra.mxu2 %v5159_v4  ;;  %1931 = vmatpush.msra.mxu1 %v5725_v58  ;;  %v2544_v4 = vld [vmem:[%s7276_s11 + $0x20] sm:$0xff] }
 0x1fe   : > { %1725 = vmatpush.msrb.mxu3 %v5182_v9  ;;  %v2547_v9 = vld [vmem:[%s7276_s11 + $0x38] sm:$0xff] }
 0x1ff   : > { %1702 = vmatpush.msra.mxu2 %v5177_v8  ;;  %1932 = vmatpush.msra.mxu1 %v5743_v47 }
 0x200   : > { %1726 = vmatpush.msrb.mxu3 %v5200_v13 }
 0x201   : > { %1703 = vmatpush.msra.mxu2 %v5195_v12  ;;  %1933 = vmatpush.msra.mxu1 %v5761_v26 }
 0x202   : > { %1727 = vmatpush.msrb.mxu3 %v5218_v21 }
 0x203   : > { %1704 = vmatpush.msra.mxu2 %v5213_v20  ;;  %1934 = vmatpush.msra.mxu1 %v5774_v29 }
 0x204   : > { %1728 = vmatpush.msrb.mxu3 %v5236_v25  ;;  %2041 = vperm.xlu2 %3769, %v2031_v56  }
 0x205   : > { %1705 = vmatpush.msra.mxu2 %v5231_v24  ;;  %1935 = vmatpush.msra.mxu1 %v5794_v3 }
 0x206   : > { %1729 = vmatpush.msrb.mxu3 %v5254_v33 }
 0x207   : > { %1706 = vmatpush.msra.mxu2 %v5249_v32  ;;  %1936 = vmatpush.msra.mxu1 %v5812_v35 }
 0x208   : > { %1730 = vmatpush.msrb.mxu3 %v5272_v37 }
 0x209   : > { %1707 = vmatpush.msra.mxu2 %v5267_v36  ;;  %1937 = vmatpush.msra.mxu1 %v5822_v46 }
 0x20a   : > { %1731 = vmatpush.msrb.mxu3 %v5290_v42 }
 0x20b   : > { %1708 = vmatpush.msra.mxu2 %v5285_v41  ;;  %1938 = vmatpush.msra.mxu1 %v5838_v27 }
 0x20c   : > { %2555 = vperm.xlu2 %3769, %v2541_v60  }
 0x214   : > { %2570 = vperm.xlu2 %3769, %v2544_v4  }
 0x21c   : > { %2585 = vperm.xlu2 %3769, %v2547_v9  }
 0x227   : > { %v1452_v7 = vpop.f32.mrf.mxu0 }
 0x228   : > { %1631 = vmatmul.f32.vlgmr.msrb.gmra.mxu0 %v1452_v7 }
 0x22f   : > { %v1455_v7 = vpop.f32.mrf.mxu0 }
 0x230   : > { %1634 = vmatmul.f32.gmra.mxu0 %v1455_v7 }
 0x237   : > { %v1458_v44 = vpop.f32.mrf.mxu0 }
 0x238   : > { %1585 = vmatmul.f32.vlgmr.msrb.gmra.mxu2 %v1458_v44 }
 0x239   : > { %1952 = vmatpush.msrb.mxu2 %v5542_v34 }
 0x23b   : > { %1953 = vmatpush.msrb.mxu2 %v5551_v38 }
 0x23d   : > { %1954 = vmatpush.msrb.mxu2 %v5560_v40 }
 0x23f   : > { %v1461_v28 = vpop.f32.mrf.mxu0  ;;  %1955 = vmatpush.msrb.mxu2 %v5580_v18 }
 0x240   : > { %1588 = vmatmul.f32.gmra.mxu2 %v1461_v28 }
 0x241   : > { %1956 = vmatpush.msrb.mxu2 %v5599_v55 }
 0x243   : > { %1957 = vmatpush.msrb.mxu2 %v5617_v43 }
 0x245   : > { %1958 = vmatpush.msrb.mxu2 %v5643_v17 }
 0x247   : > { %v1464_v45 = vpop.f32.mrf.mxu0  ;;  %1959 = vmatpush.msrb.mxu2 %v5664_v50 }
 0x248   : > { %1709 = vmatmul.f32.vlgmr.msra.gmra.mxu2 %v1464_v45 }
 0x249   : > { %v1487_v31 = vpop.f32.mrf.mxu1  ;;  %1960 = vmatpush.msrb.mxu2 %v5682_v39 }
 0x24a   : > { %1654 = vmatmul.f32.vlgmr.msrb.gmra.mxu1 %v1487_v31 }
 0x24b   : > { %1961 = vmatpush.msrb.mxu2 %v5697_v63 }
 0x24d   : > { %1962 = vmatpush.msrb.mxu2 %v5715_v51 }
 0x24e   : > { %v1751_v32 = vpop.permute.xlu2 %1750 }
 0x24f   : > { %v1467_v52 = vpop.f32.mrf.mxu0  ;;  %1963 = vmatpush.msrb.mxu2 %v5735_v10  ;;  %v1499_v0 = vpop.f32.mrf.mxu2 }
 0x250   : > { %1712 = vmatmul.f32.gmra.mxu2 %v1467_v52 }
 0x251   : > { %v1490_v49 = vpop.f32.mrf.mxu1  ;;  %1964 = vmatpush.msrb.mxu2 %v5753_v22 }
 0x252   : > { %1657 = vmatmul.f32.gmra.mxu1 %v1490_v49 }
 0x253   : > { %1965 = vmatpush.msrb.mxu2 %v7306_v1 }
 0x255   : > { %1966 = vmatpush.msrb.mxu2 %v7307_v5 }
 0x256   : > { %v1746_v18 = vpop.permute.xlu2 %1745 }
 0x257   : > { %1967 = vmatpush.msrb.mxu2 %v5829_v59  ;;  %v1502_v8 = vpop.f32.mrf.mxu2 }
 0x259   : > { %v1493_v57 = vpop.f32.mrf.mxu1 }
 0x25a   : > { %1608 = vmatmul.f32.vlgmr.msra.gmra.mxu3 %v1493_v57 }
 0x261   : > { %v1496_v61 = vpop.f32.mrf.mxu1 }
 0x262   : > { %1611 = vmatmul.f32.gmra.mxu3 %v1496_v61 }
 0x26a   : > { %1732 = vmatmul.f32.vlgmr.msrb.gmra.mxu3 %v1499_v0 }
 0x272   : > { %1735 = vmatmul.f32.gmra.mxu3 %v1502_v8 }
 0x2a5   : > { %v1632_v25 = vpop.f32.mrf.mxu0 }
 0x2ad   : > { %v1635_v2 = vpop.f32.mrf.mxu0 }
 0x2bb   : > { %v1586_v12 = vpop.f32.mrf.mxu2 }
 0x2c3   : > { %v1589_v20 = vpop.f32.mrf.mxu2 }
 0x2c7   : > { %v1655_v37 = vpop.f32.mrf.mxu1 }
 0x2cb   : > { %v1710_v33 = vpop.f32.mrf.mxu2 }
 0x2cf   : > { %v1658_v6 = vpop.f32.mrf.mxu1 }
 0x2d3   : > { %v1713_v62 = vpop.f32.mrf.mxu2 }
 0x2dd   : > { %v1609_v13 = vpop.f32.mrf.mxu3 }
 0x2de   : > { %v1610_v24 = vadd.f32 %v1609_v13, %v1586_v12 }
 0x2e0   : > { %v1633_v36 = vadd.f32 %v1632_v25, %v1610_v24  ;;  %v1790_v24 = vld [vmem:[%s7273_s8 + $0x8] sm:$0xff]  ;;  %v1791_v25 = vld [vmem:[%s7273_s8 + $0x10] sm:$0xff] }
 0x2e2   : > { %v1656_v34 = vadd.f32 %v1655_v37, %v1633_v36  ;;  %v1794_v36 = vld [vmem:[%s7273_s8 + $0x28] sm:$0xff]  ;;  %v1795_v37 = vld [vmem:[%s7273_s8 + $0x30] sm:$0xff] }
 0x2e5   : > { %v1612_v21 = vpop.f32.mrf.mxu3 }
 0x2e6   : > { %v1613_v42 = vadd.f32 %v1612_v21, %v1589_v20  ;;  %v1789_v21 = vld [vmem:[%s7273_s8] sm:$0xff] }
 0x2e8   : > { %v1636_v54 = vadd.f32 %v1635_v2, %v1613_v42  ;;  %v1797_v42 = vld [vmem:[%s7273_s8 + $0x40] sm:$0xff] }
 0x2ea   : > { %v1659_v50 = vadd.f32 %v1658_v6, %v1636_v54  ;;  %v1995_v54 = vld [vmem:[%s7268_s3 + $0xe0] sm:$0xff]  ;;  %v1992_v6 = vld [vmem:[%s7268_s3 + $0xb0] sm:$0xff] }
 0x2ed   : > { %v1733_v41 = vpop.f32.mrf.mxu3 }
 0x2ee   : > { %v1734_v38 = vadd.f32 %v1733_v41, %v1710_v33  ;;  %v1793_v33 = vld [vmem:[%s7273_s8 + $0x20] sm:$0xff]  ;;  %v1796_v41 = vld [vmem:[%s7273_s8 + $0x38] sm:$0xff] }
 0x2f0   : > { %v1739_v40 = vadd.f32 %v1734_v38, %v1656_v34  ;;  %v1798_v34 = vld [vmem:[%s7273_s8 + $0x48] sm:$0xff]  ;;  %v1799_v38 = vld [vmem:[%s7273_s8 + $0x50] sm:$0xff] }
 0x2f2   : > { %v1753_v55 = vadd.f32 %v1746_v18, %v1739_v40  ;;  %v1800_v40 = vld [vmem:[%s7273_s8 + $0x58] sm:$0xff]  ;;  %v1996_v18 = vld [vmem:[%s7268_s3 + $0xf0] sm:$0xff] }
 0x2f3   : > { %1997 = vmatpush.msra.mxu3 %v1996_v18 }
 0x2f4   : > { %v1755_v43 = vand.u32 2147483647, %v1753_v55  ;;  %v1781_v53 = vmax.f32 %v1753_v55, 0.0 }
 0x2f5   : > { %v1736_v17 = vpop.f32.mrf.mxu3  ;;  %1998 = vmatpush.msra.mxu3 %v1995_v54 }
 0x2f6   : > { %v1757_v19 = vsub.f32 0.0, %v1755_v43  ;;  %v1737_v11 = vadd.f32 %v1736_v17, %v1713_v62  ;;  %v1993_v62 = vld [vmem:[%s7268_s3 + $0xc0] sm:$0xff] }
 0x2f7   : > { %v1991_v17 = vld [vmem:[%s7268_s3 + $0xa0] sm:$0xff] }
 0x2f8   : > { %v1759_v14 = vmul.f32 1.442695, %v1757_v19  ;;  %v1740_v30 = vadd.f32 %v1737_v11, %v1659_v50  ;;  %v1990_v19 = vld [vmem:[%s7268_s3 + $0x90] sm:$0xff]  ;;  %v1989_v50 = vld [vmem:[%s7268_s3 + $0x80] sm:$0xff] }
 0x2fa   : > { %3902 = vpow2.f32 %v1759_v14  ;;  %v1754_v58 = vadd.f32 %v1751_v32, %v1740_v30  ;;  %v1792_v32 = vld [vmem:[%s7273_s8 + $0x18] sm:$0xff]  ;;  %v1988_v14 = vld [vmem:[%s7268_s3 + $0x70] sm:$0xff]  ;;  %v1987_v30 = vld [vmem:[%s7268_s3 + $0x60] sm:$0xff] }
 0x2fc   : > { %v1756_v47 = vand.u32 2147483647, %v1754_v58  ;;  %v1782_v0 = vmax.f32 %v1754_v58, 0.0 }
 0x2fe   : > { %v1758_v26 = vsub.f32 0.0, %v1756_v47  ;;  %v1985_v47 = vld [vmem:[%s7268_s3 + $0x40] sm:$0xff] }
 0x300   : > { %v3903_v29 = vpop.eup %3902  ;;  %v1761_v46 = vmul.f32 1.442695, %v1758_v26 }
 0x301   : > { %v1763_v3 = vadd.f32 1.0, %v3903_v29  ;;  %v1766_v35 = vmul.f32 -0.5, %v3903_v29  ;;  %v1769_v44 = vand.u32 2147483647, %v3903_v29 }
 0x302   : > { %3904 = vpow2.f32 %v1761_v46  ;;  %v1983_v46 = vld [vmem:[%s7268_s3 + $0x20] sm:$0xff] }
 0x303   : > { %3906 = vlog2.f32 %v1763_v3  ;;  %v1767_v16 = vadd.f32 1.0, %v1766_v35  ;;  %vm1770_vm3 = vcmp.lt.f32.partialorder %v1769_v44, 0.0004427343  ;;  %v1982_v3 = vld [vmem:[%s7268_s3 + $0x10] sm:$0xff]  ;;  %v1981_v35 = vld [vmem:[%s7268_s3] sm:$0xff] }
 0x305   : > { %v1768_v45 = vmul.f32 %v3903_v29, %v1767_v16  ;;  %v1984_v29 = vld [vmem:[%s7268_s3 + $0x30] sm:$0xff] }
 0x308   : > { %v3905_v23 = vpop.eup %3904 }
 0x309   : > { %v3907_v15 = vpop.eup %3906  ;;  %v1772_v7 = vadd.f32 1.0, %v3905_v23  ;;  %v1775_v28 = vmul.f32 -0.5, %v3905_v23  ;;  %v1778_v52 = vand.u32 2147483647, %v3905_v23 }
 0x30a   : > { %v1765_v31 = vmul.f32 0.6931472, %v3907_v15 }
 0x30b   : > { %3908 = vlog2.f32 %v1772_v7  ;;  %v1776_v48 = vadd.f32 1.0, %v1775_v28  ;;  %vm1779_vm4 = vcmp.lt.f32.partialorder %v1778_v52, 0.0004427343  ;;  %v2052_v28 = vpop.permute.xlu0 %2051 }
 0x30c   : > { %v1771_v49 = vsel %vm1770_vm3, %v1768_v45, %v1765_v31 }
 0x30d   : > { %v1783_v57 = vadd.f32 %v1781_v53, %v1771_v49  ;;  %v1777_v61 = vmul.f32 %v3905_v23, %v1776_v48 }
 0x30f   : > { %3910 = vtanh.f32 %v1783_v57 }
 0x311   : > { %v3909_v56 = vpop.eup %3908 }
 0x312   : > { %v1774_v60 = vmul.f32 0.6931472, %v3909_v56  ;;  %v2042_v56 = vpop.permute.xlu2 %2041 }
 0x313   : > { %v2037_v52 = vpop.permute.xlu0 %2036 }
 0x314   : > { %v1780_v4 = vsel %vm1779_vm4, %v1777_v61, %v1774_v60  ;;  %vm2788_vm4 = vcmask 785408  }
 0x315   : > { %v1784_v8 = vadd.f32 %v1782_v0, %v1780_v4  ;;  %v3911_v9 = vpop.eup %3910 }
 0x316   : > { %v1787_v20 = vmul.f32 %v3911_v9, %v1753_v55  ;;  %v1994_v55 = vld [vmem:[%s7268_s3 + $0xd0] sm:$0xff] }
 0x317   : > { %3912 = vtanh.f32 %v1784_v8  ;;  %1999 = vmatpush.msra.mxu3 %v1994_v55 }
 0x319   : > { %2000 = vmatpush.msra.mxu3 %v1993_v62 }
 0x31b   : > { %2001 = vmatpush.msra.mxu3 %v1992_v6 }
 0x31d   : > { %v3913_v12 = vpop.eup %3912  ;;  %2002 = vmatpush.msra.mxu3 %v1991_v17 }
 0x31e   : > { %v1788_v13 = vmul.f32 %v3913_v12, %v1754_v58  ;;  %v1986_v58 = vld [vmem:[%s7268_s3 + $0x50] sm:$0xff] }
 0x31f   : > { %2003 = vmatpush.msra.mxu3 %v1990_v19 }
 0x320   : > { %1852 = vmatpush.msra.mxu0 %v1788_v13 }
 0x321   : > { %2004 = vmatpush.msra.mxu3 %v1989_v50 }
 0x322   : > { %1853 = vmatpush.msra.mxu0 %v1787_v20 }
 0x323   : > { %3661 = vmatmul.msk.f32.vlgmr.msra.gmra.mxu0 %vm1801_vm5, %v1789_v21  ;;  %2005 = vmatpush.msra.mxu3 %v1988_v14  ;;  %v2047_v21 = vpop.permute.xlu1 %2046 }
 0x324   : > { %2499 = vmatpush.msrb.mxu0 %v1988_v14 }
 0x325   : > { %2006 = vmatpush.msra.mxu3 %v1987_v30 }
 0x326   : > { %2500 = vmatpush.msrb.mxu0 %v1987_v30 }
 0x327   : > { %2007 = vmatpush.msra.mxu3 %v1986_v58 }
 0x328   : > { %2501 = vmatpush.msrb.mxu0 %v1986_v58 }
 0x329   : > { %2008 = vmatpush.msra.mxu3 %v1985_v47 }
 0x32a   : > { %2502 = vmatpush.msrb.mxu0 %v1985_v47 }
 0x32b   : > { %3662 = vmatmul.msk.f32.gmra.mxu0 %vm1801_vm5, %v1790_v24  ;;  %2009 = vmatpush.msra.mxu3 %v1984_v29 }
 0x32c   : > { %2503 = vmatpush.msrb.mxu0 %v1984_v29 }
 0x32d   : > { %2010 = vmatpush.msra.mxu3 %v1983_v46 }
 0x32e   : > { %2504 = vmatpush.msrb.mxu0 %v1983_v46 }
 0x32f   : > { %2011 = vmatpush.msra.mxu3 %v1982_v3 }
 0x330   : > { %2505 = vmatpush.msrb.mxu0 %v1982_v3 }
 0x331   : > { %2012 = vmatpush.msra.mxu3 %v1981_v35 }
 0x332   : > { %2506 = vmatpush.msrb.mxu0 %v1981_v35 }
 0x333   : > { %3663 = vmatmul.msk.f32.gmra.mxu0 %vm1801_vm5, %v1791_v25  ;;  %2426 = vmatpush.msrb.mxu3 %v5682_v39 }
 0x335   : > { %2427 = vmatpush.msrb.mxu3 %v5697_v63 }
 0x337   : > { %2428 = vmatpush.msrb.mxu3 %v5715_v51 }
 0x339   : > { %2429 = vmatpush.msrb.mxu3 %v5735_v10 }
 0x33b   : > { %3664 = vmatmul.msk.f32.gmra.mxu0 %vm1801_vm5, %v1792_v32  ;;  %2430 = vmatpush.msrb.mxu3 %v5753_v22 }
 0x33d   : > { %2431 = vmatpush.msrb.mxu3 %v7306_v1 }
 0x33f   : > { %2432 = vmatpush.msrb.mxu3 %v7307_v5 }
 0x341   : > { %2433 = vmatpush.msrb.mxu3 %v5829_v59 }
 0x343   : > { %3665 = vmatmul.msk.f32.gmra.mxu0 %vm1801_vm5, %v1793_v33 }
 0x34b   : > { %3666 = vmatmul.msk.f32.gmra.mxu0 %vm1801_vm5, %v1794_v36 }
 0x353   : > { %3667 = vmatmul.msk.f32.gmra.mxu0 %vm1801_vm5, %v1795_v37 }
 0x35b   : > { %3668 = vmatmul.msk.f32.gmra.mxu0 %vm1801_vm5, %v1796_v41 }
 0x363   : > { %3669 = vmatmul.msk.f32.gmra.mxu0 %vm1801_vm5, %v1797_v42 }
 0x36b   : > { %3670 = vmatmul.msk.f32.gmra.mxu0 %vm1801_vm5, %v1798_v34 }
 0x373   : > { %3671 = vmatmul.msk.f32.gmra.mxu0 %vm1801_vm5, %v1799_v38 }
 0x37b   : > { %3672 = vmatmul.msk.f32.gmra.mxu0 %vm1801_vm5, %v1800_v40  ;;  %vm3574_vm5 = vcmask 253952  }
 0x3a0   : > { %v1855_v2 = vpop.f32.mrf.mxu0 }
 0x3a1   : > { %1968 = vmatmul.f32.vlgmr.msrb.gmra.mxu2 %v1855_v2 }
 0x3a8   : > { %v1858_v43 = vpop.f32.mrf.mxu0 }
 0x3a9   : > { %1971 = vmatmul.f32.gmra.mxu2 %v1858_v43 }
 0x3b0   : > { %v1861_v11 = vpop.f32.mrf.mxu0 }
 0x3b1   : > { %1974 = vmatmul.f32.gmra.mxu2 %v1861_v11 }
 0x3b8   : > { %v1864_v26 = vpop.f32.mrf.mxu0 }
 0x3b9   : > { %1977 = vmatmul.f32.gmra.mxu2 %v1864_v26 }
 0x3c0   : > { %v1867_v23 = vpop.f32.mrf.mxu0 }
 0x3c1   : > { %1939 = vmatmul.f32.vlgmr.msra.gmra.mxu1 %v1867_v23 }
 0x3c8   : > { %v1870_v15 = vpop.f32.mrf.mxu0 }
 0x3c9   : > { %1942 = vmatmul.f32.gmra.mxu1 %v1870_v15 }
 0x3d0   : > { %v1873_v16 = vpop.f32.mrf.mxu0 }
 0x3d1   : > { %1945 = vmatmul.f32.gmra.mxu1 %v1873_v16 }
 0x3d8   : > { %v1876_v7 = vpop.f32.mrf.mxu0 }
 0x3d9   : > { %1948 = vmatmul.f32.gmra.mxu1 %v1876_v7 }
 0x3e0   : > { %v1879_v39 = vpop.f32.mrf.mxu0 }
 0x3e1   : > { %2013 = vmatmul.f32.vlgmr.msra.gmra.mxu3 %v1879_v39 }
 0x3e8   : > { %v1882_v63 = vpop.f32.mrf.mxu0 }
 0x3e9   : > { %2016 = vmatmul.f32.gmra.mxu3 %v1882_v63 }
 0x3f0   : > { %v1885_v51 = vpop.f32.mrf.mxu0 }
 0x3f1   : > { %2019 = vmatmul.f32.gmra.mxu3 %v1885_v51 }
 0x3f8   : > { %v1888_v10 = vpop.f32.mrf.mxu0 }
 0x3f9   : > { %2022 = vmatmul.f32.gmra.mxu3 %v1888_v10 }
 0x424   : > { %v1969_v22 = vpop.f32.mrf.mxu2 }
 0x42c   : > { %v1972_v5 = vpop.f32.mrf.mxu2 }
 0x434   : > { %v1975_v0 = vpop.f32.mrf.mxu2 }
 0x43c   : > { %v1978_v37 = vpop.f32.mrf.mxu2 }
 0x43e   : > { %v1940_v44 = vpop.f32.mrf.mxu1 }
 0x43f   : > { %v1970_v45 = vadd.f32 %v1969_v22, %v1940_v44 }
 0x446   : > { %v1943_v1 = vpop.f32.mrf.mxu1 }
 0x447   : > { %v1973_v48 = vadd.f32 %v1972_v5, %v1943_v1 }
 0x44e   : > { %v1946_v57 = vpop.f32.mrf.mxu1 }
 0x44f   : > { %v1976_v9 = vadd.f32 %v1975_v0, %v1946_v57 }
 0x456   : > { %v1949_v32 = vpop.f32.mrf.mxu1 }
 0x457   : > { %v1979_v42 = vadd.f32 %v1978_v37, %v1949_v32 }
 0x464   : > { %v2014_v31 = vpop.f32.mrf.mxu3 }
 0x465   : > { %v2026_v59 = vadd.f32 %v2014_v31, %v1970_v45 }
 0x467   : > { %v6034_v60 = vadd.f32 %v2037_v52, %v2026_v59 }
 0x469   : > { %v2058_v8 = vand.u32 2147483647, %v6034_v60 }
 0x46b   : > { %v2062_v24 = vsub.f32 0.0, %v2058_v8 }
 0x46c   : > { %v2017_v49 = vpop.f32.mrf.mxu3 }
 0x46d   : > { %v2027_v53 = vadd.f32 %v2017_v49, %v1973_v48  ;;  %v2066_v41 = vmul.f32 1.442695, %v2062_v24 }
 0x46f   : > { %v6036_v61 = vadd.f32 %v2042_v56, %v2027_v53 }
 0x471   : > { %v2059_v4 = vand.u32 2147483647, %v6036_v61  ;;  %v2111_v57 = vmax.f32 %v6036_v61, 0.0 }
 0x473   : > { %v2063_v13 = vsub.f32 0.0, %v2059_v4 }
 0x474   : > { %v2020_v12 = vpop.f32.mrf.mxu3 }
 0x475   : > { %v2028_v20 = vadd.f32 %v2020_v12, %v1976_v9  ;;  %v2068_v33 = vmul.f32 1.442695, %v2063_v13  ;;  %v2110_v9 = vmax.f32 %v6034_v60, 0.0 }
 0x477   : > { %v6040_v25 = vadd.f32 %v2047_v21, %v2028_v20  ;;  %3914 = vpow2.f32 %v2068_v33 }
 0x478   : > { %3916 = vpow2.f32 %v2066_v41 }
 0x479   : > { %v2060_v36 = vand.u32 2147483647, %v6040_v25  ;;  %v2112_v45 = vmax.f32 %v6040_v25, 0.0 }
 0x47b   : > { %v2064_v34 = vsub.f32 0.0, %v2060_v36 }
 0x47c   : > { %v2023_v38 = vpop.f32.mrf.mxu3 }
 0x47d   : > { %v2070_v40 = vmul.f32 1.442695, %v2064_v34  ;;  %v2029_v2 = vadd.f32 %v2023_v38, %v1979_v42  ;;  %v3915_v55 = vpop.eup %3914  ;;  %v2126_v34 = vld [vmem:[%s7275_s10] sm:$0xff]  ;;  %v2127_v38 = vld [vmem:[%s7275_s10 + $0x8] sm:$0xff] }
 0x47e   : > { %v3917_v43 = vpop.eup %3916  ;;  %v2083_v19 = vadd.f32 1.0, %v3915_v55  ;;  %v2086_v58 = vmul.f32 -0.5, %v3915_v55  ;;  %v2089_v63 = vand.u32 2147483647, %v3915_v55 }
 0x47f   : > { %3918 = vpow2.f32 %v2070_v40  ;;  %v6043_v18 = vadd.f32 %v2052_v28, %v2029_v2  ;;  %v2074_v11 = vadd.f32 1.0, %v3917_v43  ;;  %v2077_v26 = vmul.f32 -0.5, %v3917_v43  ;;  %v2131_v40 = vld [vmem:[%s7275_s10 + $0x28] sm:$0xff]  ;;  %v2132_v2 = vld [vmem:[%s7275_s10 + $0x30] sm:$0xff] }
 0x480   : > { %v2087_v16 = vadd.f32 1.0, %v2086_v58  ;;  %v2080_v22 = vand.u32 2147483647, %v3917_v43  ;;  %vm2090_vm7 = vcmp.lt.f32.partialorder %v2089_v63, 0.0004427343  ;;  %v2143_v58 = vld [vmem:[%s7275_s10 + $0x88] sm:$0xff] }
 0x481   : > { %v2061_v54 = vand.u32 2147483647, %v6043_v18  ;;  %v2078_v39 = vadd.f32 1.0, %v2077_v26  ;;  %v2113_v0 = vmax.f32 %v6043_v18, 0.0  ;;  %v2144_v26 = vld [vmem:[%s7275_s10 + $0x90] sm:$0xff] }
 0x482   : > { %v2088_v5 = vmul.f32 %v3915_v55, %v2087_v16  ;;  %vm2081_vm8 = vcmp.lt.f32.partialorder %v2080_v22, 0.0004427343  ;;  %v2135_v55 = vld [vmem:[%s7275_s10 + $0x48] sm:$0xff]  ;;  %v2323_v16 = vld [vmem:[%s7301_s2 + $0x30] sm:$0xff] }
 0x483   : > { %v2065_v62 = vsub.f32 0.0, %v2061_v54  ;;  %v2079_v48 = vmul.f32 %v3917_v43, %v2078_v39  ;;  %v2134_v54 = vld [vmem:[%s7275_s10 + $0x40] sm:$0xff]  ;;  %v2137_v43 = vld [vmem:[%s7275_s10 + $0x58] sm:$0xff]  ;;  %v2321_v39 = vld [vmem:[%s7301_s2 + $0x10] sm:$0xff] }
 0x485   : > { %v3919_v6 = vpop.eup %3918  ;;  %v2072_v17 = vmul.f32 1.442695, %v2065_v62  ;;  %v2136_v62 = vld [vmem:[%s7275_s10 + $0x50] sm:$0xff] }
 0x486   : > { %v2092_v50 = vadd.f32 1.0, %v3919_v6  ;;  %v2095_v14 = vmul.f32 -0.5, %v3919_v6  ;;  %v2098_v3 = vand.u32 2147483647, %v3919_v6 }
 0x487   : > { %3920 = vpow2.f32 %v2072_v17  ;;  %v2139_v17 = vld [vmem:[%s7275_s10 + $0x68] sm:$0xff] }
 0x488   : > { %3922 = vlog2.f32 %v2092_v50  ;;  %v2096_v29 = vadd.f32 1.0, %v2095_v14  ;;  %vm2099_vm6 = vcmp.lt.f32.partialorder %v2098_v3, 0.0004427343  ;;  %v2141_v50 = vld [vmem:[%s7275_s10 + $0x78] sm:$0xff]  ;;  %v2142_v14 = vld [vmem:[%s7275_s10 + $0x80] sm:$0xff]  ;;  %v2325_v3 = vld [vmem:[%s7301_s2 + $0x50] sm:$0xff] }
 0x489   : > { %3924 = vlog2.f32 %v2083_v19  ;;  %v2140_v19 = vld [vmem:[%s7275_s10 + $0x70] sm:$0xff] }
 0x48a   : > { %3926 = vlog2.f32 %v2074_v11  ;;  %v2097_v51 = vmul.f32 %v3919_v6, %v2096_v29  ;;  %v2138_v6 = vld [vmem:[%s7275_s10 + $0x60] sm:$0xff]  ;;  %v2327_v29 = vld [vmem:[%s7301_s2 + $0x70] sm:$0xff] }
 0x48b   : > { %2361 = vmatpush.msra.mxu2 %v2327_v29 }
 0x48d   : > { %v3921_v30 = vpop.eup %3920 }
 0x48e   : > { %v3923_v47 = vpop.eup %3922  ;;  %v2101_v46 = vadd.f32 1.0, %v3921_v30  ;;  %v2104_v35 = vmul.f32 -0.5, %v3921_v30  ;;  %v2107_v1 = vand.u32 2147483647, %v3921_v30 }
 0x48f   : > { %v3925_v23 = vpop.eup %3924  ;;  %v2094_v15 = vmul.f32 0.6931472, %v3923_v47 }
 0x490   : > { %3928 = vlog2.f32 %v2101_v46  ;;  %v3927_v7 = vpop.eup %3926  ;;  %v2085_v10 = vmul.f32 0.6931472, %v3925_v23  ;;  %v2105_v44 = vadd.f32 1.0, %v2104_v35  ;;  %vm2108_vm9 = vcmp.lt.f32.partialorder %v2107_v1, 0.0004427343  ;;  %v2326_v46 = vld [vmem:[%s7301_s2 + $0x60] sm:$0xff] }
 0x491   : > { %v2100_v28 = vsel %vm2099_vm6, %v2097_v51, %v2094_v15  ;;  %v2076_v31 = vmul.f32 0.6931472, %v3927_v7  ;;  %2362 = vmatpush.msra.mxu2 %v2326_v46  ;;  %v2324_v35 = vld [vmem:[%s7301_s2 + $0x40] sm:$0xff]  ;;  %v2145_v15 = vld [vmem:[%s7275_s10 + $0x98] sm:$0xff] }
 0x492   : > { %v2091_v49 = vsel %vm2090_vm7, %v2088_v5, %v2085_v10  ;;  %v2116_v52 = vadd.f32 %v2112_v45, %v2100_v28  ;;  %v2106_v56 = vmul.f32 %v3921_v30, %v2105_v44  ;;  %v2322_v7 = vld [vmem:[%s7301_s2 + $0x20] sm:$0xff]  ;;  %v2147_v44 = vld [vmem:[%s7275_s10 + $0xa8] sm:$0xff]  ;;  %v2148_v28 = vld [vmem:[%s7275_s10 + $0xb0] sm:$0xff] }
 0x493   : > { %v2082_v4 = vsel %vm2081_vm8, %v2079_v48, %v2076_v31  ;;  %v2115_v12 = vadd.f32 %v2111_v57, %v2091_v49  ;;  %2363 = vmatpush.msra.mxu2 %v2325_v3  ;;  %v2146_v51 = vld [vmem:[%s7275_s10 + $0xa0] sm:$0xff]  ;;  %v2149_v1 = vld [vmem:[%s7275_s10 + $0xb8] sm:$0xff] }
 0x494   : > { %3930 = vtanh.f32 %v2116_v52  ;;  %v2114_v20 = vadd.f32 %v2110_v9, %v2082_v4 }
 0x495   : > { %2364 = vmatpush.msra.mxu2 %v2324_v35 }
 0x496   : > { %v3929_v59 = vpop.eup %3928 }
 0x497   : > { %v2103_v53 = vmul.f32 0.6931472, %v3929_v59  ;;  %2365 = vmatpush.msra.mxu2 %v2323_v16 }
 0x499   : > { %v2109_v8 = vsel %vm2108_vm9, %v2106_v56, %v2103_v53  ;;  %2366 = vmatpush.msra.mxu2 %v2322_v7 }
 0x49a   : > { %v2117_v13 = vadd.f32 %v2113_v0, %v2109_v8  ;;  %v3931_v21 = vpop.eup %3930 }
 0x49b   : > { %v2124_v36 = vmul.f32 %v3931_v21, %v6040_v25  ;;  %v2130_v25 = vld [vmem:[%s7275_s10 + $0x20] sm:$0xff]  ;;  %2367 = vmatpush.msra.mxu2 %v2321_v39 }
 0x49c   : > { %3932 = vtanh.f32 %v2117_v13 }
 0x49d   : > { %3934 = vtanh.f32 %v2115_v12  ;;  %2368 = vmatpush.msra.mxu2 %v5838_v27 }
 0x49e   : > { %3936 = vtanh.f32 %v2114_v20 }
 0x4a2   : > { %v3933_v24 = vpop.eup %3932 }
 0x4a3   : > { %v2125_v32 = vmul.f32 %v3933_v24, %v6043_v18  ;;  %v3935_v33 = vpop.eup %3934  ;;  %v2133_v18 = vld [vmem:[%s7275_s10 + $0x38] sm:$0xff] }
 0x4a4   : > { %v3937_v37 = vpop.eup %3936  ;;  %v2123_v41 = vmul.f32 %v3935_v33, %v6036_v61  ;;  %v2128_v61 = vld [vmem:[%s7275_s10 + $0x10] sm:$0xff] }
 0x4a5   : > { %2235 = vmatpush.msrb.mxu1 %v2125_v32  ;;  %v2122_v42 = vmul.f32 %v3937_v37, %v6034_v60  ;;  %v2129_v60 = vld [vmem:[%s7275_s10 + $0x18] sm:$0xff] }
 0x4a7   : > { %2236 = vmatpush.msrb.mxu1 %v2124_v36 }
 0x4a9   : > { %2237 = vmatpush.msrb.mxu1 %v2123_v41  ;;  %v2551_v41 = vpop.permute.xlu1 %2550 }
 0x4ab   : > { %2238 = vmatpush.msrb.mxu1 %v2122_v42 }
 0x4ac   : > { %3673 = vmatmul.msk.f32.vlgmr.msrb.gmra.mxu1 %vm2150_vm10, %v2126_v34 }
 0x4b4   : > { %3674 = vmatmul.msk.f32.gmra.mxu1 %vm2150_vm10, %v2127_v38 }
 0x4bc   : > { %3675 = vmatmul.msk.f32.gmra.mxu1 %vm2150_vm10, %v2128_v61 }
 0x4c4   : > { %3676 = vmatmul.msk.f32.gmra.mxu1 %vm2150_vm10, %v2129_v60 }
 0x4cc   : > { %3677 = vmatmul.msk.f32.gmra.mxu1 %vm2150_vm10, %v2130_v25 }
 0x4d4   : > { %3678 = vmatmul.msk.f32.gmra.mxu1 %vm2150_vm10, %v2131_v40 }
 0x4dc   : > { %3679 = vmatmul.msk.f32.gmra.mxu1 %vm2150_vm10, %v2132_v2 }
 0x4e4   : > { %3680 = vmatmul.msk.f32.gmra.mxu1 %vm2150_vm10, %v2133_v18 }
 0x4ec   : > { %3681 = vmatmul.msk.f32.gmra.mxu1 %vm2150_vm10, %v2134_v54  ;;  %v2556_v54 = vpop.permute.xlu2 %2555 }
 0x4f4   : > { %3682 = vmatmul.msk.f32.gmra.mxu1 %vm2150_vm10, %v2135_v55 }
 0x4fc   : > { %3683 = vmatmul.msk.f32.gmra.mxu1 %vm2150_vm10, %v2136_v62 }
 0x504   : > { %3684 = vmatmul.msk.f32.gmra.mxu1 %vm2150_vm10, %v2137_v43 }
 0x50c   : > { %3685 = vmatmul.msk.f32.gmra.mxu1 %vm2150_vm10, %v2138_v6 }
 0x514   : > { %3686 = vmatmul.msk.f32.gmra.mxu1 %vm2150_vm10, %v2139_v17 }
 0x51c   : > { %3687 = vmatmul.msk.f32.gmra.mxu1 %vm2150_vm10, %v2140_v19 }
 0x524   : > { %3688 = vmatmul.msk.f32.gmra.mxu1 %vm2150_vm10, %v2141_v50 }
 0x529   : > { %v2240_v11 = vpop.f32.mrf.mxu1 }
 0x52a   : > { %3705 = vmatmul.msk.f32.vlgmr.msrb.gmra.mxu3 %vm2328_vm11, %v2240_v11 }
 0x52c   : > { %3689 = vmatmul.msk.f32.gmra.mxu1 %vm2150_vm10, %v2142_v14 }
 0x531   : > { %v2243_v30 = vpop.f32.mrf.mxu1 }
 0x532   : > { %3706 = vmatmul.msk.f32.gmra.mxu3 %vm2328_vm11, %v2243_v30 }
 0x534   : > { %3690 = vmatmul.msk.f32.gmra.mxu1 %vm2150_vm10, %v2143_v58  ;;  %v2561_v58 = vpop.permute.xlu0 %2560 }
 0x539   : > { %v2246_v47 = vpop.f32.mrf.mxu1 }
 0x53a   : > { %3707 = vmatmul.msk.f32.gmra.mxu3 %vm2328_vm11, %v2246_v47 }
 0x53c   : > { %3691 = vmatmul.msk.f32.gmra.mxu1 %vm2150_vm10, %v2144_v26 }
 0x541   : > { %v2249_v23 = vpop.f32.mrf.mxu1 }
 0x542   : > { %3708 = vmatmul.msk.f32.gmra.mxu3 %vm2328_vm11, %v2249_v23 }
 0x544   : > { %3692 = vmatmul.msk.f32.gmra.mxu1 %vm2150_vm10, %v2145_v15 }
 0x549   : > { %v2252_v63 = vpop.f32.mrf.mxu1 }
 0x54a   : > { %3709 = vmatmul.msk.f32.gmra.mxu3 %vm2328_vm11, %v2252_v63 }
 0x54c   : > { %3693 = vmatmul.msk.f32.gmra.mxu1 %vm2150_vm10, %v2146_v51 }
 0x551   : > { %v2255_v10 = vpop.f32.mrf.mxu1 }
 0x552   : > { %3710 = vmatmul.msk.f32.gmra.mxu3 %vm2328_vm11, %v2255_v10 }
 0x554   : > { %3694 = vmatmul.msk.f32.gmra.mxu1 %vm2150_vm10, %v2147_v44 }
 0x559   : > { %v2258_v22 = vpop.f32.mrf.mxu1 }
 0x55a   : > { %3711 = vmatmul.msk.f32.gmra.mxu3 %vm2328_vm11, %v2258_v22  ;;  %v2566_v22 = vpop.permute.xlu1 %2565 }
 0x55c   : > { %3695 = vmatmul.msk.f32.gmra.mxu1 %vm2150_vm10, %v2148_v28 }
 0x561   : > { %v2261_v27 = vpop.f32.mrf.mxu1 }
 0x562   : > { %3712 = vmatmul.msk.f32.gmra.mxu3 %vm2328_vm11, %v2261_v27 }
 0x564   : > { %3696 = vmatmul.msk.f32.gmra.mxu1 %vm2150_vm10, %v2149_v1 }
 0x569   : > { %v2264_v31 = vpop.f32.mrf.mxu1 }
 0x56a   : > { %3697 = vmatmul.msk.f32.vlgmr.msra.gmra.mxu2 %vm2328_vm11, %v2264_v31 }
 0x571   : > { %v2267_v5 = vpop.f32.mrf.mxu1 }
 0x572   : > { %3698 = vmatmul.msk.f32.gmra.mxu2 %vm2328_vm11, %v2267_v5 }
 0x579   : > { %v2270_v45 = vpop.f32.mrf.mxu1 }
 0x57a   : > { %3699 = vmatmul.msk.f32.gmra.mxu2 %vm2328_vm11, %v2270_v45 }
 0x581   : > { %v2273_v59 = vpop.f32.mrf.mxu1 }
 0x582   : > { %3700 = vmatmul.msk.f32.gmra.mxu2 %vm2328_vm11, %v2273_v59 }
 0x589   : > { %v2276_v48 = vpop.f32.mrf.mxu1 }
 0x58a   : > { %3701 = vmatmul.msk.f32.gmra.mxu2 %vm2328_vm11, %v2276_v48 }
 0x591   : > { %v2279_v49 = vpop.f32.mrf.mxu1 }
 0x592   : > { %3702 = vmatmul.msk.f32.gmra.mxu2 %vm2328_vm11, %v2279_v49 }
 0x599   : > { %v2282_v52 = vpop.f32.mrf.mxu1 }
 0x59a   : > { %3703 = vmatmul.msk.f32.gmra.mxu2 %vm2328_vm11, %v2282_v52 }
 0x5a1   : > { %v2285_v53 = vpop.f32.mrf.mxu1 }
 0x5a2   : > { %3704 = vmatmul.msk.f32.gmra.mxu2 %vm2328_vm11, %v2285_v53 }
 0x5a9   : > { %v2288_v56 = vpop.f32.mrf.mxu1 }
 0x5aa   : > { %3713 = vmatmul.msk.f32.vlgmr.msrb.gmra.mxu0 %vm2328_vm11, %v2288_v56 }
 0x5ad   : > { %v2435_v21 = vpop.f32.mrf.mxu3 }
 0x5b1   : > { %v2291_v57 = vpop.f32.mrf.mxu1 }
 0x5b2   : > { %3714 = vmatmul.msk.f32.gmra.mxu0 %vm2328_vm11, %v2291_v57 }
 0x5b5   : > { %v2438_v32 = vpop.f32.mrf.mxu3 }
 0x5b9   : > { %v2294_v0 = vpop.f32.mrf.mxu1 }
 0x5ba   : > { %3715 = vmatmul.msk.f32.gmra.mxu0 %vm2328_vm11, %v2294_v0 }
 0x5bd   : > { %v2441_v38 = vpop.f32.mrf.mxu3 }
 0x5c1   : > { %v2297_v4 = vpop.f32.mrf.mxu1 }
 0x5c2   : > { %3716 = vmatmul.msk.f32.gmra.mxu0 %vm2328_vm11, %v2297_v4 }
 0x5c5   : > { %v2444_v6 = vpop.f32.mrf.mxu3 }
 0x5c9   : > { %v2300_v8 = vpop.f32.mrf.mxu1 }
 0x5ca   : > { %3717 = vmatmul.msk.f32.gmra.mxu0 %vm2328_vm11, %v2300_v8 }
 0x5cd   : > { %v2447_v16 = vpop.f32.mrf.mxu3 }
 0x5d1   : > { %v2303_v9 = vpop.f32.mrf.mxu1 }
 0x5d2   : > { %3718 = vmatmul.msk.f32.gmra.mxu0 %vm2328_vm11, %v2303_v9 }
 0x5d9   : > { %v2306_v12 = vpop.f32.mrf.mxu1 }
 0x5da   : > { %3719 = vmatmul.msk.f32.gmra.mxu0 %vm2328_vm11, %v2306_v12 }
 0x5e1   : > { %v2309_v13 = vpop.f32.mrf.mxu1 }
 0x5e2   : > { %3720 = vmatmul.msk.f32.gmra.mxu0 %vm2328_vm11, %v2309_v13 }
 0x5ed   : > { %v2370_v20 = vpop.f32.mrf.mxu2 }
 0x5ee   : > { %v2436_v33 = vadd.f32 %v2435_v21, %v2370_v20  ;;  %v2571_v20 = vpop.permute.xlu2 %2570  ;;  %v2450_v21 = vpop.f32.mrf.mxu3 }
 0x5f5   : > { %v2373_v24 = vpop.f32.mrf.mxu2 }
 0x5f6   : > { %v2439_v60 = vadd.f32 %v2438_v32, %v2373_v24 }
 0x5fd   : > { %v2376_v42 = vpop.f32.mrf.mxu2 }
 0x5fe   : > { %v2442_v17 = vadd.f32 %v2441_v38, %v2376_v42 }
 0x605   : > { %v2379_v62 = vpop.f32.mrf.mxu2 }
 0x606   : > { %v2445_v23 = vadd.f32 %v2444_v6, %v2379_v62 }
 0x60d   : > { %v2382_v3 = vpop.f32.mrf.mxu2 }
 0x60e   : > { %v2448_v52 = vadd.f32 %v2447_v16, %v2382_v3 }
 0x615   : > { %v2385_v57 = vpop.f32.mrf.mxu2 }
 0x627   : > { %v2508_v36 = vpop.f32.mrf.mxu0 }
 0x628   : > { %v2532_v37 = vadd.f32 %v2508_v36, %v2436_v33 }
 0x62a   : > { %v6196_v34 = vadd.f32 %v2551_v41, %v2532_v37 }
 0x62c   : > { %v2596_v61 = vand.u32 2147483647, %v6196_v34  ;;  %v2700_v45 = vmax.f32 %v6196_v34, 0.0 }
 0x62e   : > { %v2604_v25 = vsub.f32 0.0, %v2596_v61 }
 0x62f   : > { %v2511_v40 = vpop.f32.mrf.mxu0 }
 0x630   : > { %v2612_v2 = vmul.f32 1.442695, %v2604_v25  ;;  %v2533_v18 = vadd.f32 %v2511_v40, %v2439_v60  ;;  %v2451_v40 = vadd.f32 %v2450_v21, %v2385_v57 }
 0x632   : > { %3938 = vpow2.f32 %v2612_v2  ;;  %v6199_v55 = vadd.f32 %v2556_v54, %v2533_v18 }
 0x634   : > { %v2597_v43 = vand.u32 2147483647, %v6199_v55  ;;  %v2701_v41 = vmax.f32 %v6199_v55, 0.0 }
 0x636   : > { %v2605_v19 = vsub.f32 0.0, %v2597_v43 }
 0x637   : > { %v2514_v50 = vpop.f32.mrf.mxu0 }
 0x638   : > { %v3939_v11 = vpop.eup %3938  ;;  %v2614_v14 = vmul.f32 1.442695, %v2605_v19  ;;  %v2534_v30 = vadd.f32 %v2514_v50, %v2442_v17 }
 0x639   : > { %v2628_v47 = vadd.f32 1.0, %v3939_v11  ;;  %v2631_v26 = vmul.f32 -0.5, %v3939_v11  ;;  %v2634_v7 = vand.u32 2147483647, %v3939_v11 }
 0x63a   : > { %3940 = vpow2.f32 %v2614_v14  ;;  %v6202_v29 = vadd.f32 %v2561_v58, %v2534_v30  ;;  %v2576_v14 = vpop.permute.xlu1 %2575  ;;  %v2388_v30 = vpop.f32.mrf.mxu2 }
 0x63b   : > { %3942 = vlog2.f32 %v2628_v47  ;;  %v2632_v35 = vadd.f32 1.0, %v2631_v26  ;;  %vm2635_vm12 = vcmp.lt.f32.partialorder %v2634_v7, 0.0004427343 }
 0x63c   : > { %v2598_v46 = vand.u32 2147483647, %v6202_v29 }
 0x63d   : > { %v2633_v28 = vmul.f32 %v3939_v11, %v2632_v35 }
 0x63e   : > { %v2606_v15 = vsub.f32 0.0, %v2598_v46 }
 0x63f   : > { %v2517_v39 = vpop.f32.mrf.mxu0 }
 0x640   : > { %v3941_v63 = vpop.eup %3940  ;;  %v2616_v51 = vmul.f32 1.442695, %v2606_v15  ;;  %v2535_v10 = vadd.f32 %v2517_v39, %v2445_v23  ;;  %v2453_v23 = vpop.f32.mrf.mxu3  ;;  %v2702_v15 = vmax.f32 %v6202_v29, 0.0 }
 0x641   : > { %v3943_v44 = vpop.eup %3942  ;;  %v2637_v27 = vadd.f32 1.0, %v3941_v63  ;;  %v2640_v31 = vmul.f32 -0.5, %v3941_v63  ;;  %v2643_v0 = vand.u32 2147483647, %v3941_v63 }
 0x642   : > { %v2630_v1 = vmul.f32 0.6931472, %v3943_v44  ;;  %3944 = vpow2.f32 %v2616_v51  ;;  %v6205_v5 = vadd.f32 %v2566_v22, %v2535_v10 }
 0x643   : > { %3946 = vlog2.f32 %v2637_v27  ;;  %v2641_v53 = vadd.f32 1.0, %v2640_v31  ;;  %vm2644_vm13 = vcmp.lt.f32.partialorder %v2643_v0, 0.0004427343  ;;  %v2454_v27 = vadd.f32 %v2453_v23, %v2388_v30 }
 0x644   : > { %v2636_v59 = vsel %vm2635_vm12, %v2633_v28, %v2630_v1  ;;  %v2599_v48 = vand.u32 2147483647, %v6205_v5 }
 0x645   : > { %v2708_v49 = vadd.f32 %v2700_v45, %v2636_v59  ;;  %v2642_v36 = vmul.f32 %v3941_v63, %v2641_v53 }
 0x646   : > { %v2607_v56 = vsub.f32 0.0, %v2599_v48 }
 0x647   : > { %3948 = vtanh.f32 %v2708_v49  ;;  %v2520_v4 = vpop.f32.mrf.mxu0 }
 0x648   : > { %v3945_v8 = vpop.eup %3944  ;;  %v2618_v9 = vmul.f32 1.442695, %v2607_v56  ;;  %v2536_v12 = vadd.f32 %v2520_v4, %v2448_v52  ;;  %v2581_v4 = vpop.permute.xlu0 %2580 }
 0x649   : > { %v3947_v13 = vpop.eup %3946  ;;  %v2646_v24 = vadd.f32 1.0, %v3945_v8  ;;  %v2649_v32 = vmul.f32 -0.5, %v3945_v8  ;;  %v2652_v54 = vand.u32 2147483647, %v3945_v8 }
 0x64a   : > { %v2639_v33 = vmul.f32 0.6931472, %v3947_v13  ;;  %3950 = vpow2.f32 %v2618_v9  ;;  %v6209_v37 = vadd.f32 %v2571_v20, %v2536_v12 }
 0x64b   : > { %3952 = vlog2.f32 %v2646_v24  ;;  %v2650_v25 = vadd.f32 1.0, %v2649_v32  ;;  %vm2653_vm14 = vcmp.lt.f32.partialorder %v2652_v54, 0.0004427343  ;;  %v2391_v24 = vpop.f32.mrf.mxu2  ;;  %v2703_v32 = vmax.f32 %v6205_v5, 0.0 }
 0x64c   : > { %v2645_v42 = vsel %vm2644_vm13, %v2642_v36, %v2639_v33  ;;  %v2600_v38 = vand.u32 2147483647, %v6209_v37 }
 0x64d   : > { %v3949_v61 = vpop.eup %3948  ;;  %v2709_v60 = vadd.f32 %v2701_v41, %v2645_v42  ;;  %v2651_v58 = vmul.f32 %v3945_v8, %v2650_v25 }
 0x64e   : > { %v6214_v2 = vmul.f32 %v3949_v61, %v6196_v34  ;;  %v2608_v18 = vsub.f32 0.0, %v2600_v38  ;;  %v2456_v61 = vpop.f32.mrf.mxu3 }
 0x64f   : > { %3954 = vtanh.f32 %v2709_v60  ;;  %v2523_v62 = vpop.f32.mrf.mxu0  ;;  %v2457_v54 = vadd.f32 %v2456_v61, %v2391_v24 }
 0x650   : > { %v3951_v43 = vpop.eup %3950  ;;  %v2620_v6 = vmul.f32 1.442695, %v2608_v18  ;;  %v2537_v17 = vadd.f32 %v2523_v62, %v2451_v40  ;;  %v2741_v19 = vrot.slane %v6214_v2, 3  ;;  %v2755_v50 = vrot.slane %v6214_v2, 7 }
 0x651   : > { %v3953_v11 = vpop.eup %3952  ;;  %v2655_v47 = vadd.f32 1.0, %v3951_v43  ;;  %v2658_v26 = vmul.f32 -0.5, %v3951_v43  ;;  %v2737_v34 = vrot.slane %v6214_v2, 2  ;;  %v2751_v16 = vrot.slane %v6214_v2, 6 }
 0x652   : > { %v2648_v46 = vmul.f32 0.6931472, %v3953_v11  ;;  %3956 = vpow2.f32 %v2620_v6  ;;  %v6219_v3 = vadd.f32 %v2576_v14, %v2537_v17  ;;  %v3780_v35 = vpack.i.bf16 %v2755_v50, %v2741_v19 }
 0x653   : > { %3958 = vlog2.f32 %v2655_v47  ;;  %v2733_v63 = vrot.slane %v6214_v2, 1  ;;  %v2659_v44 = vadd.f32 1.0, %v2658_v26  ;;  %v3775_v22 = vpack.i.bf16 %v2751_v16, %v2737_v34  ;;  %v2586_v26 = vpop.permute.xlu2 %2585 }
 0x654   : > { %v2654_v7 = vsel %vm2653_vm14, %v2651_v58, %v2648_v46  ;;  %v2601_v39 = vand.u32 2147483647, %v6219_v3  ;;  %3781 = vrot.lane.b32.xlu2 %v3780_v35, %s7287_s19  ;;  %v2747_v28 = vrot.slane %v6214_v2, 5  ;;  %v2661_v45 = vand.u32 2147483647, %v3951_v43 }
 0x655   : > { %v3955_v51 = vpop.eup %3954  ;;  %v2710_v10 = vadd.f32 %v2702_v15, %v2654_v7  ;;  %3776 = vrot.lane.b32.xlu1 %v3775_v22, %s7291_s27  ;;  %v2660_v8 = vmul.f32 %v3951_v43, %v2659_v44  ;;  %v2704_v7 = vmax.f32 %v6209_v37, 0.0 }
 0x656   : > { %v6228_v1 = vmul.f32 %v3955_v51, %v6199_v55  ;;  %v2609_v31 = vsub.f32 0.0, %v2601_v39  ;;  %v3770_v59 = vpack.i.bf16 %v2747_v28, %v2733_v63  ;;  %vm2662_vm15 = vcmp.lt.f32.partialorder %v2661_v45, 0.0004427343 }
 0x657   : > { %3960 = vtanh.f32 %v2710_v10  ;;  %v2526_v48 = vpop.f32.mrf.mxu0 }
 0x658   : > { %v3957_v49 = vpop.eup %3956  ;;  %v2622_v52 = vmul.f32 1.442695, %v2609_v31  ;;  %v2538_v53 = vadd.f32 %v2526_v48, %v2454_v27  ;;  %v2768_v56 = vrot.slane %v6228_v1, 3  ;;  %v2782_v57 = vrot.slane %v6228_v1, 7  ;;  %3771 = vrot.lane.b32.xlu0 %v3770_v59, %s7289_s28  ;;  %v3188_v48 = vld [vmem:[%s7277_s12 + $0x5f8] sm:$0xff] }
 0x659   : > { %v3959_v0 = vpop.eup %3958  ;;  %v2664_v55 = vadd.f32 1.0, %v3957_v49  ;;  %v2667_v9 = vmul.f32 -0.5, %v3957_v49  ;;  %v2764_v12 = vrot.slane %v6228_v1, 2  ;;  %v2778_v33 = vrot.slane %v6228_v1, 6  ;;  %3474 = vmatpush.msra.mxu1 %v3188_v48  ;;  %v3007_v48 = vld [vmem:[%s7277_s12 + $0x50] sm:$0xff] }
 0x65a   : > { %v2657_v13 = vmul.f32 0.6931472, %v3959_v0  ;;  %3962 = vpow2.f32 %v2622_v52  ;;  %v6235_v20 = vadd.f32 %v2581_v4, %v2538_v53  ;;  %v3795_v21 = vpack.i.bf16 %v2782_v57, %v2768_v56 }
 0x65b   : > { %3964 = vlog2.f32 %v2664_v55  ;;  %v2760_v42 = vrot.slane %v6228_v1, 1  ;;  %v2668_v25 = vadd.f32 1.0, %v2667_v9  ;;  %v3790_v40 = vpack.i.bf16 %v2778_v33, %v2764_v12 }
 0x65c   : > { %v2663_v36 = vsel %vm2662_vm15, %v2660_v8, %v2657_v13  ;;  %v2602_v41 = vand.u32 2147483647, %v6235_v20  ;;  %3796 = vrot.lane.b32.xlu2 %v3795_v21, %s7287_s19  ;;  %v2774_v18 = vrot.slane %v6228_v1, 5  ;;  %v2670_v6 = vand.u32 2147483647, %v3957_v49  ;;  %v3186_v8 = vld [vmem:[%s7277_s12 + $0x5e8] sm:$0xff] }
 0x65d   : > { %v3961_v38 = vpop.eup %3960  ;;  %v2711_v60 = vadd.f32 %v2703_v32, %v2663_v36  ;;  %3791 = vrot.lane.b32.xlu1 %v3790_v40, %s7291_s27  ;;  %v2669_v34 = vmul.f32 %v3957_v49, %v2668_v25  ;;  %v3187_v49 = vld [vmem:[%s7277_s12 + $0x5f0] sm:$0xff]  ;;  %v2705_v36 = vmax.f32 %v6219_v3, 0.0  ;;  %v3012_v40 = vld [vmem:[%s7277_s12 + $0x78] sm:$0xff] }
 0x65e   : > { %v6244_v62 = vmul.f32 %v3961_v38, %v6202_v29  ;;  %v2610_v43 = vsub.f32 0.0, %v2602_v41  ;;  %v3785_v17 = vpack.i.bf16 %v2774_v18, %v2760_v42  ;;  %vm2671_vm0 = vcmp.lt.f32.partialorder %v2670_v6, 0.0004427343  ;;  %3475 = vmatpush.msra.mxu1 %v3187_v49  ;;  %v3028_v18 = vld [vmem:[%s7277_s12 + $0xf8] sm:$0xff]  ;;  %3254 = vmatpush.msrb.mxu2 %v3012_v40  ;;  %v3019_v40 = vld [vmem:[%s7277_s12 + $0xb0] sm:$0xff] }
 0x65f   : > { %3966 = vtanh.f32 %v2711_v60  ;;  %v2529_v19 = vpop.f32.mrf.mxu0  ;;  %3274 = vmatpush.msra.mxu3 %v3028_v18  ;;  %v3183_v18 = vld [vmem:[%s7277_s12 + $0x5d0] sm:$0xff] }
 0x660   : > { %v3963_v50 = vpop.eup %3962  ;;  %v2624_v11 = vmul.f32 1.442695, %v2610_v43  ;;  %v2539_v14 = vadd.f32 %v2529_v19, %v2457_v54  ;;  %v2808_v30 = vrot.slane %v6244_v62, 3  ;;  %v2822_v58 = vrot.slane %v6244_v62, 7  ;;  %3786 = vrot.lane.b32.xlu0 %v3785_v17, %s7289_s28  ;;  %3476 = vmatpush.msra.mxu1 %v3186_v8  ;;  %v3011_v54 = vld [vmem:[%s7277_s12 + $0x70] sm:$0xff]  ;;  %v3185_v19 = vld [vmem:[%s7277_s12 + $0x5e0] sm:$0xff] }
 0x661   : > { %v3965_v47 = vpop.eup %3964  ;;  %v2673_v46 = vadd.f32 1.0, %v3963_v50  ;;  %v2676_v29 = vmul.f32 -0.5, %v3963_v50  ;;  %v2804_v35 = vrot.slane %v6244_v62, 2  ;;  %v2818_v39 = vrot.slane %v6244_v62, 6  ;;  %v3027_v17 = vld [vmem:[%s7277_s12 + $0xf0] sm:$0xff]  ;;  %3255 = vmatpush.msrb.mxu2 %v3011_v54  ;;  %v3005_v8 = vld [vmem:[%s7277_s12 + $0x40] sm:$0xff] }
 0x662   : > { %v2666_v23 = vmul.f32 0.6931472, %v3965_v47  ;;  %3968 = vpow2.f32 %v2624_v11  ;;  %v6251_v15 = vadd.f32 %v2586_v26, %v2539_v14  ;;  %v3810_v16 = vpack.i.bf16 %v2808_v30, %v2822_v58  ;;  %3477 = vmatpush.msra.mxu1 %v3185_v19  ;;  %v3026_v11 = vld [vmem:[%s7277_s12 + $0xe8] sm:$0xff]  ;;  %3275 = vmatpush.msra.mxu3 %v3027_v17 }
 0x663   : > { %3970 = vlog2.f32 %v2673_v46  ;;  %v2800_v10 = vrot.slane %v6244_v62, 1  ;;  %v2677_v28 = vadd.f32 1.0, %v2676_v29  ;;  %v3805_v27 = vpack.i.bf16 %v2804_v35, %v2818_v39 }
 0x664   : > { %v2672_v63 = vsel %vm2671_vm0, %v2669_v34, %v2666_v23  ;;  %v2603_v51 = vand.u32 2147483647, %v6251_v15  ;;  %3811 = vrot.lane.b32.xlu2 %v3810_v16, %s7287_s19  ;;  %v2814_v31 = vrot.slane %v6244_v62, 5  ;;  %v2679_v52 = vand.u32 2147483647, %v3963_v50  ;;  %v3009_v23 = vld [vmem:[%s7277_s12 + $0x60] sm:$0xff]  ;;  %3276 = vmatpush.msra.mxu3 %v3026_v11 }
 0x665   : > { %v3967_v44 = vpop.eup %3966  ;;  %v2712_v22 = vadd.f32 %v2704_v7, %v2672_v63  ;;  %3806 = vrot.lane.b32.xlu1 %v3805_v27, %s7291_s27  ;;  %v2678_v9 = vmul.f32 %v3963_v50, %v2677_v28  ;;  %v3018_v11 = vld [vmem:[%s7277_s12 + $0xa8] sm:$0xff] }
 0x666   : > { %v6260_v45 = vmul.f32 %v3967_v44, %v6205_v5  ;;  %v2611_v59 = vsub.f32 0.0, %v2603_v51  ;;  %v3800_v53 = vpack.i.bf16 %v2800_v10, %v2814_v31  ;;  %vm2680_vm1 = vcmp.lt.f32.partialorder %v2679_v52, 0.0004427343  ;;  %v3025_v51 = vld [vmem:[%s7277_s12 + $0xe0] sm:$0xff]  ;;  %v3008_v31 = vld [vmem:[%s7277_s12 + $0x58] sm:$0xff]  ;;  %v3023_v52 = vld [vmem:[%s7277_s12 + $0xd0] sm:$0xff] }
 0x667   : > { %3972 = vtanh.f32 %v2712_v22  ;;  %v2706_v10 = vmax.f32 %v6235_v20, 0.0  ;;  %3277 = vmatpush.msra.mxu3 %v3025_v51 }
 0x668   : > { %v6269_v56 = vpop.eup %3968  ;;  %v2626_v57 = vmul.f32 1.442695, %v2611_v59  ;;  %v2835_v5 = vrot.slane %v6260_v45, 3  ;;  %v2849_v0 = vrot.slane %v6260_v45, 7  ;;  %v2831_v4 = vrot.slane %v6260_v45, 2  ;;  %3801 = vrot.lane.b32.xlu0 %v3800_v53, %s7289_s28  ;;  %v3024_v59 = vld [vmem:[%s7277_s12 + $0xd8] sm:$0xff] }
 0x669   : > { %v3971_v55 = vpop.eup %3970  ;;  %v2682_v12 = vadd.f32 1.0, %v6269_v56  ;;  %v2685_v13 = vmul.f32 -0.5, %v6269_v56  ;;  %v2845_v21 = vrot.slane %v6260_v45, 6  ;;  %v2827_v33 = vrot.slane %v6260_v45, 1  ;;  %3278 = vmatpush.msra.mxu3 %v3024_v59 }
 0x66a   : > { %v2675_v24 = vmul.f32 0.6931472, %v3971_v55  ;;  %3974 = vpow2.f32 %v2626_v57  ;;  %v3825_v32 = vpack.i.bf16 %v2849_v0, %v2835_v5  ;;  %v2841_v38 = vrot.slane %v6260_v45, 5  ;;  %v3006_v57 = vld [vmem:[%s7277_s12 + $0x48] sm:$0xff]  ;;  %v3184_v5 = vld [vmem:[%s7277_s12 + $0x5d8] sm:$0xff] }
 0x66b   : > { %3976 = vlog2.f32 %v2682_v12  ;;  %v3820_v41 = vpack.i.bf16 %v2845_v21, %v2831_v4  ;;  %v2686_v25 = vadd.f32 1.0, %v2685_v13  ;;  %v2688_v50 = vand.u32 2147483647, %v6269_v56  ;;  %v3022_v0 = vld [vmem:[%s7277_s12 + $0xc8] sm:$0xff]  ;;  %3478 = vmatpush.msra.mxu1 %v3184_v5  ;;  %3279 = vmatpush.msra.mxu3 %v3023_v52  ;;  %v3076_v55 = vld [vmem:[%s7277_s12 + $0x278] sm:$0xff]  ;;  %v3021_v13 = vld [vmem:[%s7277_s12 + $0xc0] sm:$0xff] }
 0x66c   : > { %v2681_v42 = vsel %vm2680_vm1, %v2678_v9, %v2675_v24  ;;  %3826 = vrot.lane.b32.xlu2 %v3825_v32, %s7287_s19  ;;  %v3815_v6 = vpack.i.bf16 %v2841_v38, %v2827_v33  ;;  %3334 = vmatpush.msra.mxu0 %v3076_v55  ;;  %v3075_v21 = vld [vmem:[%s7277_s12 + $0x270] sm:$0xff]  ;;  %v2707_v32 = vmax.f32 %v6251_v15, 0.0  ;;  %v3004_v33 = vld [vmem:[%s7277_s12 + $0x38] sm:$0xff]  ;;  %v3014_v52 = vld [vmem:[%s7277_s12 + $0x88] sm:$0xff]  ;;  %s4002_s19 = sshra.s32 %s3590_s21, 4  ;;  %s4003_s19 = int_to_ptr.hbm [resolvable:$true] %s4002_s19 }
 0x66d   : > { %v3973_v61 = vpop.eup %3972  ;;  %v2713_v60 = vadd.f32 %v2705_v36, %v2681_v42  ;;  %3821 = vrot.lane.b32.xlu1 %v3820_v41, %s7291_s27  ;;  %v2687_v46 = vmul.f32 %v6269_v56, %v2686_v25  ;;  %vm2689_vm2 = vcmp.lt.f32.partialorder %v2688_v50, 0.0004427343  ;;  %3280 = vmatpush.msra.mxu3 %v3022_v0  ;;  %v3074_v36 = vld [vmem:[%s7277_s12 + $0x268] sm:$0xff]  ;;  %v3020_v42 = vld [vmem:[%s7277_s12 + $0xb8] sm:$0xff]  ;;  %s4004_s26 = scalar_lea.hbm %s4003_s19, 1  ;;  %p4009_p0 = scmp.lt.s32.totalorder %s4003_s19, %s7279_s14 }
 0x66e   : > { %v6295_v43 = vmul.f32 %v3973_v61, %v6209_v37  ;;  %v3010_v37 = vld [vmem:[%s7277_s12 + $0x68] sm:$0xff]  ;;  %3335 = vmatpush.msra.mxu0 %v3075_v21  ;;  %v3003_v61 = vld [vmem:[%s7277_s12 + $0x30] sm:$0xff]  ;;  %3479 = vmatpush.msra.mxu1 %v3183_v18  ;;  %v3044_v5 = vld [vmem:[%s7277_s12 + $0x178] sm:$0xff]  ;;  %p4005_p11 = scmp.ne.s32.totalorder %s4003_s19, %s4004_s26 }
 0x66f   : > { %3978 = vtanh.f32 %v2713_v60  ;;  %3256 = vmatpush.msrb.mxu2 %v3010_v37  ;;  %3281 = vmatpush.msra.mxu3 %v3021_v13  ;;  %v3073_v60 = vld [vmem:[%s7277_s12 + $0x260] sm:$0xff]  ;;  %v3060_v0 = vld [vmem:[%s7277_s12 + $0x1f8] sm:$0xff]  ;;  %v3043_v21 = vld [vmem:[%s7277_s12 + $0x170] sm:$0xff] }
 0x670   : > { %v3975_v14 = vpop.eup %3974  ;;  %v2874_v30 = vrot.slane %v6295_v43, 3  ;;  %v2888_v58 = vrot.slane %v6295_v43, 7  ;;  %v2870_v47 = vrot.slane %v6295_v43, 2  ;;  %v2884_v26 = vrot.slane %v6295_v43, 6  ;;  %3816 = vrot.lane.b32.xlu0 %v3815_v6, %s7289_s28  ;;  %s7309_s28 = smov 32   ;;  %3336 = vmatpush.msra.mxu0 %v3074_v36  ;;  %v3042_v36 = vld [vmem:[%s7277_s12 + $0x168] sm:$0xff]  ;;  %p4006_p12 = pnand %p4005_p11, %p4169_p5 }
 0x671   : > { %v3977_v34 = vpop.eup %3976  ;;  %v2691_v29 = vadd.f32 1.0, %v3975_v14  ;;  %v2866_v35 = vrot.slane %v6295_v43, 1  ;;  %v2694_v7 = vmul.f32 -0.5, %v3975_v14  ;;  %v2880_v63 = vrot.slane %v6295_v43, 5  ;;  %3257 = vmatpush.msrb.mxu2 %v3009_v23  ;;  %3282 = vmatpush.msra.mxu3 %v3020_v42  ;;  %v3070_v23 = vld [vmem:[%s7277_s12 + $0x248] sm:$0xff]  ;;  %v3065_v18 = vld [vmem:[%s7277_s12 + $0x220] sm:$0xff] }
 0x672   : > { %v2684_v16 = vmul.f32 0.6931472, %v3977_v34  ;;  %v3840_v39 = vpack.i.bf16 %v2888_v58, %v2874_v30  ;;  %v3835_v44 = vpack.i.bf16 %v2884_v26, %v2870_v47  ;;  %v2697_v56 = vand.u32 2147483647, %v3975_v14  ;;  %3337 = vmatpush.msra.mxu0 %v3073_v60  ;;  %v3001_v26 = vld [vmem:[%s7277_s12 + $0x20] sm:$0xff]  ;;  %p4007_p13 = pneg %p4006_p12 }
 0x673   : > { %3980 = vlog2.f32 %v2691_v29  ;;  %v3830_v27 = vpack.i.bf16 %v2880_v63, %v2866_v35  ;;  %v2695_v49 = vadd.f32 1.0, %v2694_v7  ;;  %3258 = vmatpush.msrb.mxu2 %v3008_v31  ;;  %3283 = vmatpush.msra.mxu3 %v3019_v40  ;;  %v3017_v34 = vld [vmem:[%s7277_s12 + $0xa0] sm:$0xff]  ;;  %v3000_v29 = vld [vmem:[%s7277_s12 + $0x18] sm:$0xff] }
 0x674   : > { %v2690_v22 = vsel %vm2689_vm2, %v2687_v46, %v2684_v16  ;;  %3841 = vrot.lane.b32.xlu2 %v3840_v39, %s7308_s20  ;;  %vm2698_vm3 = vcmp.lt.f32.partialorder %v2697_v56, 0.0004427343  ;;  %v3071_v46 = vld [vmem:[%s7277_s12 + $0x250] sm:$0xff]  ;;  %v3016_v35 = vld [vmem:[%s7277_s12 + $0x98] sm:$0xff]  ;;  %v2997_v56 = vld [vmem:[%s7277_s12] sm:$0xff] }
 0x675   : > { %v2714_v28 = vadd.f32 %v2706_v10, %v2690_v22  ;;  %v3979_v53 = vpop.eup %3978  ;;  %3836 = vrot.lane.b32.xlu1 %v3835_v44, %s7291_s27  ;;  %3259 = vmatpush.msrb.mxu2 %v3007_v48  ;;  %v2696_v12 = vmul.f32 %v3975_v14, %v2695_v49  ;;  %v3072_v14 = vld [vmem:[%s7277_s12 + $0x258] sm:$0xff]  ;;  %v2999_v39 = vld [vmem:[%s7277_s12 + $0x10] sm:$0xff]  ;;  %v3069_v44 = vld [vmem:[%s7277_s12 + $0x240] sm:$0xff] }
 0x676   : > { %v6363_v24 = vmul.f32 %v3979_v53, %v6219_v3  ;;  %3284 = vmatpush.msra.mxu3 %v3018_v11  ;;  %3338 = vmatpush.msra.mxu0 %v3072_v14  ;;  %v3015_v10 = vld [vmem:[%s7277_s12 + $0x90] sm:$0xff]  ;;  %v3041_v40 = vld [vmem:[%s7277_s12 + $0x160] sm:$0xff]  ;;  %v3038_v11 = vld [vmem:[%s7277_s12 + $0x148] sm:$0xff] }
 0x677   : > { %3982 = vtanh.f32 %v2714_v28  ;;  %3260 = vmatpush.msrb.mxu2 %v3006_v57  ;;  %v3068_v57 = vld [vmem:[%s7277_s12 + $0x238] sm:$0xff]  ;;  %v3062_v14 = vld [vmem:[%s7277_s12 + $0x208] sm:$0xff] }
 0x678   : > { %3831 = vrot.lane.b32.xlu0 %v3830_v27, %s7309_s28  ;;  %v2901_v54 = vrot.slane %v6363_v24, 3  ;;  %v2897_v6 = vrot.slane %v6363_v24, 2  ;;  %v2893_v50 = vrot.slane %v6363_v24, 1  ;;  %3285 = vmatpush.msra.mxu3 %v3017_v34  ;;  %v2915_v22 = vrot.slane %v6363_v24, 7  ;;  %v2998_v27 = vld [vmem:[%s7277_s12 + $0x8] sm:$0xff]  ;;  %v3124_v34 = vld [vmem:[%s7277_s12 + $0x3f8] sm:$0xff] }
 0x679   : > { %v3981_v4 = vpop.eup %3980  ;;  %3261 = vmatpush.msrb.mxu2 %v3005_v8  ;;  %3339 = vmatpush.msra.mxu0 %v3071_v46  ;;  %v2911_v28 = vrot.slane %v6363_v24, 6  ;;  %v2907_v31 = vrot.slane %v6363_v24, 5  ;;  %v3036_v46 = vld [vmem:[%s7277_s12 + $0x138] sm:$0xff] }
 0x67a   : > { %v2693_v9 = vmul.f32 0.6931472, %v3981_v4  ;;  %3286 = vmatpush.msra.mxu3 %v3016_v35  ;;  %v3035_v35 = vld [vmem:[%s7277_s12 + $0x130] sm:$0xff] }
 0x67b   : > { %3262 = vmatpush.msrb.mxu2 %v3004_v33  ;;  %3340 = vmatpush.msra.mxu0 %v3070_v23  ;;  %v3067_v33 = vld [vmem:[%s7277_s12 + $0x230] sm:$0xff] }
 0x67c   : > { %v2699_v41 = vsel %vm2698_vm3, %v2696_v12, %v2693_v9  ;;  %3287 = vmatpush.msra.mxu3 %v3015_v10  ;;  %v3123_v23 = vld [vmem:[%s7277_s12 + $0x3f0] sm:$0xff]  ;;  %v3121_v10 = vld [vmem:[%s7277_s12 + $0x3e0] sm:$0xff] }
 0x67d   : > { %v3983_v3 = vpop.eup %3982  ;;  %v2715_v38 = vadd.f32 %v2707_v32, %v2699_v41  ;;  %3263 = vmatpush.msrb.mxu2 %v3003_v61  ;;  %3341 = vmatpush.msra.mxu0 %v3069_v44  ;;  %v3059_v32 = vld [vmem:[%s7277_s12 + $0x1f0] sm:$0xff]  ;;  %v3066_v41 = vld [vmem:[%s7277_s12 + $0x228] sm:$0xff]  ;;  %v3033_v44 = vld [vmem:[%s7277_s12 + $0x120] sm:$0xff] }
 0x67e   : > { %v6382_v25 = vmul.f32 %v3983_v3, %v6235_v20  ;;  %v3002_v20 = vld [vmem:[%s7277_s12 + $0x28] sm:$0xff]  ;;  %3288 = vmatpush.msra.mxu3 %v3014_v52  ;;  %v3119_v52 = vld [vmem:[%s7277_s12 + $0x3d0] sm:$0xff] }
 0x67f   : > { %3984 = vtanh.f32 %v2715_v38  ;;  %3264 = vmatpush.msrb.mxu2 %v3002_v20  ;;  %3342 = vmatpush.msra.mxu0 %v3068_v57  ;;  %v3058_v38 = vld [vmem:[%s7277_s12 + $0x1e8] sm:$0xff]  ;;  %v3064_v20 = vld [vmem:[%s7277_s12 + $0x218] sm:$0xff] }
 0x680   : > { %v2940_v17 = vrot.slane %v6382_v25, 3  ;;  %v2936_v19 = vrot.slane %v6382_v25, 2  ;;  %v2932_v37 = vrot.slane %v6382_v25, 1  ;;  %v2954_v16 = vrot.slane %v6382_v25, 7  ;;  %v3182_v61 = vld [vmem:[%s7277_s12 + $0x5c8] sm:$0xff] }
 0x681   : > { %3265 = vmatpush.msrb.mxu2 %v3001_v26  ;;  %v2950_v7 = vrot.slane %v6382_v25, 6  ;;  %v2946_v51 = vrot.slane %v6382_v25, 5  ;;  %3343 = vmatpush.msra.mxu0 %v3067_v33  ;;  %v3053_v26 = vld [vmem:[%s7277_s12 + $0x1c0] sm:$0xff]  ;;  %v3118_v57 = vld [vmem:[%s7277_s12 + $0x3c8] sm:$0xff]  ;;  %v3179_v33 = vld [vmem:[%s7277_s12 + $0x5b0] sm:$0xff] }
 0x682   : > { %v3855_v30 = vpack.i.bf16 %v2901_v54, %v2940_v17  ;;  %v3850_v58 = vpack.i.bf16 %v2897_v6, %v2936_v19  ;;  %v3845_v47 = vpack.i.bf16 %v2893_v50, %v2932_v37  ;;  %v3870_v48 = vpack.i.bf16 %v2915_v22, %v2954_v16  ;;  %3480 = vmatpush.msra.mxu1 %v3182_v61  ;;  %v3057_v54 = vld [vmem:[%s7277_s12 + $0x1e0] sm:$0xff]  ;;  %v3040_v6 = vld [vmem:[%s7277_s12 + $0x158] sm:$0xff]  ;;  %v3039_v19 = vld [vmem:[%s7277_s12 + $0x150] sm:$0xff] }
 0x683   : > { %3266 = vmatpush.msrb.mxu2 %v3000_v29  ;;  %v3865_v49 = vpack.i.bf16 %v2911_v28, %v2950_v7  ;;  %v3860_v53 = vpack.i.bf16 %v2907_v31, %v2946_v51  ;;  %3344 = vmatpush.msra.mxu0 %v3066_v41  ;;  %v3056_v17 = vld [vmem:[%s7277_s12 + $0x1d8] sm:$0xff]  ;;  %v3063_v50 = vld [vmem:[%s7277_s12 + $0x210] sm:$0xff]  ;;  %v3122_v7 = vld [vmem:[%s7277_s12 + $0x3e8] sm:$0xff] }
 0x684   : > { %3856 = vrot.lane.b32.xlu2 %v3855_v30, %s7308_s20  ;;  %3851 = vrot.lane.b32.xlu1 %v3850_v58, %s7310_s22  ;;  %v3055_v37 = vld [vmem:[%s7277_s12 + $0x1d0] sm:$0xff]  ;;  %v3054_v30 = vld [vmem:[%s7277_s12 + $0x1c8] sm:$0xff] }
 0x685   : > { %3846 = vrot.lane.b32.xlu0 %v3845_v47, %s7309_s28  ;;  %v3985_v63 = vpop.eup %3984  ;;  %3267 = vmatpush.msrb.mxu2 %v2999_v39  ;;  %v3037_v58 = vld [vmem:[%s7277_s12 + $0x140] sm:$0xff]  ;;  %v3052_v29 = vld [vmem:[%s7277_s12 + $0x1b8] sm:$0xff]  ;;  %v3051_v16 = vld [vmem:[%s7277_s12 + $0x1b0] sm:$0xff] }
 0x686   : > { %v6445_v59 = vmul.f32 %v3985_v63, %v6251_v15  ;;  %v3013_v15 = vld [vmem:[%s7277_s12 + $0x80] sm:$0xff]  ;;  %3345 = vmatpush.msra.mxu0 %v3065_v18  ;;  %v3034_v39 = vld [vmem:[%s7277_s12 + $0x128] sm:$0xff]  ;;  %v3120_v28 = vld [vmem:[%s7277_s12 + $0x3d8] sm:$0xff]  ;;  %v2745_v18 = vrot.slane %v6214_v2, 4 }
 0x687   : > { %3268 = vmatpush.msrb.mxu2 %v2998_v27  ;;  %3289 = vmatpush.msra.mxu3 %v3013_v15  ;;  %v3061_v47 = vld [vmem:[%s7277_s12 + $0x200] sm:$0xff]  ;;  %v3050_v51 = vld [vmem:[%s7277_s12 + $0x1a8] sm:$0xff]  ;;  %v3032_v27 = vld [vmem:[%s7277_s12 + $0x118] sm:$0xff] }
 0x688   : > { %v2967_v4 = vrot.slane %v6445_v59, 3  ;;  %v2981_v8 = vrot.slane %v6445_v59, 7  ;;  %v2963_v55 = vrot.slane %v6445_v59, 2  ;;  %v2977_v9 = vrot.slane %v6445_v59, 6  ;;  %3346 = vmatpush.msra.mxu0 %v3064_v20  ;;  %v3181_v63 = vld [vmem:[%s7277_s12 + $0x5c0] sm:$0xff]  ;;  %v3048_v31 = vld [vmem:[%s7277_s12 + $0x198] sm:$0xff] }
 0x689   : > { %3269 = vmatpush.msrb.mxu2 %v2997_v56  ;;  %v2959_v12 = vrot.slane %v6445_v59, 1  ;;  %v2973_v13 = vrot.slane %v6445_v59, 5  ;;  %3314 = vmatpush.msrb.mxu3 %v3060_v0  ;;  %v3049_v22 = vld [vmem:[%s7277_s12 + $0x1a0] sm:$0xff]  ;;  %v3046_v56 = vld [vmem:[%s7277_s12 + $0x188] sm:$0xff] }
 0x68a   : > { %v3885_v42 = vpack.i.bf16 %v2981_v8, %v2967_v4  ;;  %v3880_v3 = vpack.i.bf16 %v2977_v9, %v2963_v55  ;;  %3347 = vmatpush.msra.mxu0 %v3063_v50  ;;  %3481 = vmatpush.msra.mxu1 %v3181_v63  ;;  %v3029_v15 = vld [vmem:[%s7277_s12 + $0x100] sm:$0xff]  ;;  %v3116_v4 = vld [vmem:[%s7277_s12 + $0x3b8] sm:$0xff]  ;;  %v3115_v55 = vld [vmem:[%s7277_s12 + $0x3b0] sm:$0xff] }
 0x68b   : > { %3294 = vmatpush.msra.mxu2 %v3044_v5  ;;  %3315 = vmatpush.msrb.mxu3 %v3059_v32  ;;  %v3875_v60 = vpack.i.bf16 %v2973_v13, %v2959_v12  ;;  %v3045_v5 = vld [vmem:[%s7277_s12 + $0x180] sm:$0xff]  ;;  %v3180_v8 = vld [vmem:[%s7277_s12 + $0x5b8] sm:$0xff]  ;;  %v3114_v9 = vld [vmem:[%s7277_s12 + $0x3a8] sm:$0xff] }
 0x68c   : > { %3871 = vrot.lane.b32.xlu2 %v3870_v48, %s7308_s20  ;;  %3866 = vrot.lane.b32.xlu1 %v3865_v49, %s7310_s22  ;;  %v3031_v48 = vld [vmem:[%s7277_s12 + $0x110] sm:$0xff]  ;;  %v3117_v0 = vld [vmem:[%s7277_s12 + $0x3c0] sm:$0xff] }
 0x68d   : > { %3861 = vrot.lane.b32.xlu0 %v3860_v53, %s7309_s28  ;;  %3295 = vmatpush.msra.mxu2 %v3043_v21  ;;  %v3047_v49 = vld [vmem:[%s7277_s12 + $0x190] sm:$0xff]  ;;  %v3030_v53 = vld [vmem:[%s7277_s12 + $0x108] sm:$0xff]  ;;  %v3113_v12 = vld [vmem:[%s7277_s12 + $0x3a0] sm:$0xff] }
 0x68e   : > { %3316 = vmatpush.msrb.mxu3 %v3058_v38  ;;  %3348 = vmatpush.msra.mxu0 %v3062_v14  ;;  %v3112_v13 = vld [vmem:[%s7277_s12 + $0x398] sm:$0xff]  ;;  %v3111_v21 = vld [vmem:[%s7277_s12 + $0x390] sm:$0xff]  ;;  %v3110_v32 = vld [vmem:[%s7277_s12 + $0x388] sm:$0xff] }
 0x68f   : > { %3296 = vmatpush.msra.mxu2 %v3042_v36  ;;  %3482 = vmatpush.msra.mxu1 %v3180_v8  ;;  %v3109_v36 = vld [vmem:[%s7277_s12 + $0x380] sm:$0xff]  ;;  %v3090_v63 = vld [vmem:[%s7277_s12 + $0x2e8] sm:$0xff] }
 0x690   : > { %3317 = vmatpush.msrb.mxu3 %v3057_v54  ;;  %3349 = vmatpush.msra.mxu0 %v3061_v47  ;;  %v3108_v47 = vld [vmem:[%s7277_s12 + $0x378] sm:$0xff] }
 0x691   : > { %3297 = vmatpush.msra.mxu2 %v3041_v40  ;;  %3483 = vmatpush.msra.mxu1 %v3179_v33  ;;  %v3177_v40 = vld [vmem:[%s7277_s12 + $0x5a0] sm:$0xff] }
 0x692   : > { %3318 = vmatpush.msrb.mxu3 %v3056_v17  ;;  %3394 = vmatpush.msrb.mxu0 %v3124_v34  ;;  %v3176_v17 = vld [vmem:[%s7277_s12 + $0x598] sm:$0xff] }
 0x693   : > { %3298 = vmatpush.msra.mxu2 %v3040_v6 }
 0x694   : > { %3886 = vrot.lane.b32.xlu2 %v3885_v42, %s7308_s20  ;;  %3881 = vrot.lane.b32.xlu1 %v3880_v3, %s7310_s22  ;;  %v3178_v42 = vld [vmem:[%s7277_s12 + $0x5a8] sm:$0xff]  ;;  %s456_s22 = sand.u32 1, %s4042_s30   ;;  %s4008_s20 = scalar_lea.hbm %s7279_s14, 2 }
 0x695   : > { %3876 = vrot.lane.b32.xlu0 %v3875_v60, %s7309_s28  ;;  %3299 = vmatpush.msra.mxu2 %v3039_v19  ;;  %s457_s2 = scalar_lea.vmem [#allocation2], %s456_s22  ;;  %s3577_s25 = scalar_lea.sflag [#allocation3], %s456_s22 }
 0x696   : > { %3319 = vmatpush.msrb.mxu3 %v3055_v37  ;;  %3395 = vmatpush.msrb.mxu0 %v3123_v23  ;;  %v3174_v23 = vld [vmem:[%s7277_s12 + $0x588] sm:$0xff]  ;;  %s3587_s0 = sshll.u32 %s457_s2, 4  ;;  %p4010_p1 = scmp.lt.s32.totalorder %s4008_s20, %s4004_s26  ;;  %s3588_s0 = int_to_ptr.vmem [resolvable:$true] %s3587_s0 }
 0x697   : > { %3300 = vmatpush.msra.mxu2 %v3038_v11  ;;  %3484 = vmatpush.msra.mxu1 %v3178_v42 }
 0x698   : > { %3320 = vmatpush.msrb.mxu3 %v3054_v30  ;;  %3396 = vmatpush.msrb.mxu0 %v3122_v7  ;;  %p4011_p2 = por %p4010_p1, %p4009_p0 }
 0x699   : > { %3301 = vmatpush.msra.mxu2 %v3037_v58  ;;  %3485 = vmatpush.msra.mxu1 %v3177_v40  ;;  %v3092_v58 = vld [vmem:[%s7277_s12 + $0x2f8] sm:$0xff] }
 0x69a   : > { %3321 = vmatpush.msrb.mxu3 %v3053_v26  ;;  %3397 = vmatpush.msrb.mxu0 %v3121_v10  ;;  %v3175_v26 = vld [vmem:[%s7277_s12 + $0x590] sm:$0xff]  ;;  %v3173_v10 = vld [vmem:[%s7277_s12 + $0x580] sm:$0xff]  ;;  %p4012_p3 = pnand %p4011_p2, %p4007_p13 }
 0x69b   : > { %3302 = vmatpush.msra.mxu2 %v3036_v46  ;;  %3486 = vmatpush.msra.mxu1 %v3176_v17  ;;  %v3091_v46 = vld [vmem:[%s7277_s12 + $0x2f0] sm:$0xff] }
 0x69c   : > { %3322 = vmatpush.msrb.mxu3 %v3052_v29  ;;  %3398 = vmatpush.msrb.mxu0 %v3120_v28  ;;  %v3107_v29 = vld [vmem:[%s7277_s12 + $0x370] sm:$0xff] }
 0x69d   : > { %3303 = vmatpush.msra.mxu2 %v3035_v35  ;;  %3487 = vmatpush.msra.mxu1 %v3175_v26 }
 0x69e   : > { %3323 = vmatpush.msrb.mxu3 %v3051_v16  ;;  %3399 = vmatpush.msrb.mxu0 %v3119_v52 }
 0x69f   : > { %3304 = vmatpush.msra.mxu2 %v3034_v39  ;;  %3488 = vmatpush.msra.mxu1 %v3174_v23  ;;  %v3170_v23 = vld [vmem:[%s7277_s12 + $0x568] sm:$0xff] }
 0x6a0   : > { %3324 = vmatpush.msrb.mxu3 %v3050_v51  ;;  %3400 = vmatpush.msrb.mxu0 %v3118_v57  ;;  %v3106_v51 = vld [vmem:[%s7277_s12 + $0x368] sm:$0xff] }
 0x6a1   : > { %3305 = vmatpush.msra.mxu2 %v3033_v44  ;;  %v2772_v44 = vrot.slane %v6228_v1, 4  ;;  %3489 = vmatpush.msra.mxu1 %v3173_v10 }
 0x6a2   : > { %3325 = vmatpush.msrb.mxu3 %v3049_v22  ;;  %3401 = vmatpush.msrb.mxu0 %v3117_v0  ;;  %v3088_v0 = vld [vmem:[%s7277_s12 + $0x2d8] sm:$0xff] }
 0x6a3   : > { %3306 = vmatpush.msra.mxu2 %v3032_v27  ;;  %v3252_v27 = vld [vmem:[%s7277_s12 + $0x7f8] sm:$0xff] }
 0x6a4   : > { %3326 = vmatpush.msrb.mxu3 %v3048_v31  ;;  %3402 = vmatpush.msrb.mxu0 %v3116_v4  ;;  %v3089_v31 = vld [vmem:[%s7277_s12 + $0x2e0] sm:$0xff]  ;;  %v3104_v4 = vld [vmem:[%s7277_s12 + $0x358] sm:$0xff] }
 0x6a5   : > { %3307 = vmatpush.msra.mxu2 %v3031_v48  ;;  %v3105_v48 = vld [vmem:[%s7277_s12 + $0x360] sm:$0xff]  ;;  %3554 = vmatpush.msrb.mxu1 %v3252_v27  ;;  %v3080_v27 = vld [vmem:[%s7277_s12 + $0x298] sm:$0xff] }
 0x6a6   : > { %3327 = vmatpush.msrb.mxu3 %v3047_v49  ;;  %3403 = vmatpush.msrb.mxu0 %v3115_v55  ;;  %v3251_v55 = vld [vmem:[%s7277_s12 + $0x7f0] sm:$0xff] }
 0x6a7   : > { %3308 = vmatpush.msra.mxu2 %v3030_v53  ;;  %3555 = vmatpush.msrb.mxu1 %v3251_v55 }
 0x6a8   : > { %3328 = vmatpush.msrb.mxu3 %v3046_v56  ;;  %3404 = vmatpush.msrb.mxu0 %v3114_v9  ;;  %v3087_v9 = vld [vmem:[%s7277_s12 + $0x2d0] sm:$0xff] }
 0x6a9   : > { %3309 = vmatpush.msra.mxu2 %v3029_v15 }
 0x6aa   : > { %3329 = vmatpush.msrb.mxu3 %v3045_v5  ;;  %3405 = vmatpush.msrb.mxu0 %v3113_v12  ;;  %v3103_v12 = vld [vmem:[%s7277_s12 + $0x350] sm:$0xff] }
 0x6ac   : > { %3406 = vmatpush.msrb.mxu0 %v3112_v13 }
 0x6ae   : > { %3407 = vmatpush.msrb.mxu0 %v3111_v21  ;;  %v3782_v41 = vpop.permute.xlu2 %3781  ;;  %v3250_v21 = vld [vmem:[%s7277_s12 + $0x7e8] sm:$0xff] }
 0x6af   : > { %v3784_v19 = vunpack.i.h.bf16 %v3782_v41  ;;  %v3783_v50 = vunpack.i.l.bf16 %v3782_v41  ;;  %v3102_v41 = vld [vmem:[%s7277_s12 + $0x348] sm:$0xff]  ;;  %3556 = vmatpush.msrb.mxu1 %v3250_v21 }
 0x6b0   : > { %3408 = vmatpush.msrb.mxu0 %v3110_v32  ;;  %v3166_v21 = vld [vmem:[%s7277_s12 + $0x548] sm:$0xff] }
 0x6b2   : > { %3409 = vmatpush.msrb.mxu0 %v3109_v36  ;;  %v3086_v36 = vld [vmem:[%s7277_s12 + $0x2c8] sm:$0xff] }
 0x6b6   : > { %v3797_v20 = vpop.permute.xlu2 %3796 }
 0x6b7   : > { %v3799_v49 = vunpack.i.h.bf16 %v3797_v20  ;;  %v3798_v52 = vunpack.i.l.bf16 %v3797_v20  ;;  %v3100_v20 = vld [vmem:[%s7277_s12 + $0x338] sm:$0xff] }
 0x6be   : > { %v6705_v57 = vpop.permute.xlu2 %3811 }
 0x6c7   : > { %v3777_v3 = vpop.permute.xlu1 %3776 }
 0x6c8   : > { %v3779_v38 = vunpack.i.h.bf16 %v3777_v3  ;;  %v3778_v61 = vunpack.i.l.bf16 %v3777_v3  ;;  %v3249_v3 = vld [vmem:[%s7277_s12 + $0x7e0] sm:$0xff] }
 0x6c9   : > { %3557 = vmatpush.msrb.mxu1 %v3249_v3 }
 0x6ca   : > { %v3772_v60 = vpop.permute.xlu0 %3771 }
 0x6cb   : > { %v3774_v54 = vunpack.i.h.bf16 %v3772_v60  ;;  %v3773_v6 = vunpack.i.l.bf16 %v3772_v60  ;;  %v3814_v60 = vunpack.i.h.bf16 %v6705_v57 }
 0x6cd   : > { %v2790_v37 = vsel %vm2150_vm10, %v2745_v18, %v3774_v54  ;;  %v2786_v11 = vsel %vm2150_vm10, %v6214_v2, %v3773_v6  ;;  %v3248_v18 = vld [vmem:[%s7277_s12 + $0x7d8] sm:$0xff] }
 0x6ce   : > { %v2787_v14 = vsel %vm2328_vm11, %v2786_v11, %v3778_v61  ;;  %v2791_v30 = vsel %vm2328_vm11, %v2790_v37, %v3779_v38  ;;  %v3085_v38 = vld [vmem:[%s7277_s12 + $0x2c0] sm:$0xff]  ;;  %v3084_v6 = vld [vmem:[%s7277_s12 + $0x2b8] sm:$0xff]  ;;  %v6770_v37 = vpop.permute.xlu2 %3826  ;;  %v3083_v11 = vld [vmem:[%s7277_s12 + $0x2b0] sm:$0xff]  ;;  %3558 = vmatpush.msrb.mxu1 %v3248_v18 }
 0x6cf   : > { %v2789_v34 = vsel %vm2788_vm4, %v2787_v14, %v3783_v50  ;;  %v2792_v2 = vsel %vm2788_vm4, %v2791_v30, %v3784_v19  ;;  %v3792_v35 = vpop.permute.xlu1 %3791  ;;  %v3101_v61 = vld [vmem:[%s7277_s12 + $0x340] sm:$0xff]  ;;  %v3172_v19 = vld [vmem:[%s7277_s12 + $0x578] sm:$0xff]  ;;  %v3247_v50 = vld [vmem:[%s7277_s12 + $0x7d0] sm:$0xff] }
 0x6d0   : > { %3270 = vmatmul.f32.vlgmr.msrb.gmra.mxu2 %v2789_v34  ;;  %3290 = vmatmul.f32.vlgmr.msra.gmra.mxu3 %v2792_v2  ;;  %v3794_v16 = vunpack.i.h.bf16 %v3792_v35  ;;  %v3793_v7 = vunpack.i.l.bf16 %v3792_v35  ;;  %v3099_v14 = vld [vmem:[%s7277_s12 + $0x330] sm:$0xff]  ;;  %v3082_v2 = vld [vmem:[%s7277_s12 + $0x2a8] sm:$0xff]  ;;  %v3156_v18 = vld [vmem:[%s7277_s12 + $0x4f8] sm:$0xff] }
 0x6d1   : > { %3354 = vmatpush.msrb.mxu2 %v3092_v58  ;;  %3374 = vmatpush.msra.mxu3 %v3108_v47  ;;  %v3171_v58 = vld [vmem:[%s7277_s12 + $0x570] sm:$0xff]  ;;  %v3246_v47 = vld [vmem:[%s7277_s12 + $0x7c8] sm:$0xff] }
 0x6d2   : > { %v3787_v39 = vpop.permute.xlu0 %3786  ;;  %3559 = vmatpush.msrb.mxu1 %v3247_v50 }
 0x6d3   : > { %3355 = vmatpush.msrb.mxu2 %v3091_v46  ;;  %3375 = vmatpush.msra.mxu3 %v3107_v29  ;;  %v3789_v22 = vunpack.i.h.bf16 %v3787_v39  ;;  %v3788_v28 = vunpack.i.l.bf16 %v3787_v39  ;;  %v3098_v46 = vld [vmem:[%s7277_s12 + $0x328] sm:$0xff]  ;;  %v2839_v29 = vrot.slane %v6260_v45, 4  ;;  %v3097_v39 = vld [vmem:[%s7277_s12 + $0x320] sm:$0xff] }
 0x6d4   : > { %3560 = vmatpush.msrb.mxu1 %v3246_v47  ;;  %v3238_v47 = vld [vmem:[%s7277_s12 + $0x788] sm:$0xff] }
 0x6d5   : > { %v2796_v53 = vsel %vm2150_vm10, %v2772_v44, %v3789_v22  ;;  %v2793_v56 = vsel %vm2150_vm10, %v6228_v1, %v3788_v28  ;;  %3356 = vmatpush.msrb.mxu2 %v3090_v63  ;;  %3376 = vmatpush.msra.mxu3 %v3106_v51  ;;  %v3829_v63 = vunpack.i.h.bf16 %v6770_v37  ;;  %v3169_v44 = vld [vmem:[%s7277_s12 + $0x560] sm:$0xff]  ;;  %v3244_v22 = vld [vmem:[%s7277_s12 + $0x7b8] sm:$0xff] }
 0x6d6   : > { %v2794_v15 = vsel %vm2328_vm11, %v2793_v56, %v3793_v7  ;;  %v2797_v5 = vsel %vm2328_vm11, %v2796_v53, %v3794_v16  ;;  %v3245_v16 = vld [vmem:[%s7277_s12 + $0x7c0] sm:$0xff]  ;;  %v3243_v53 = vld [vmem:[%s7277_s12 + $0x7b0] sm:$0xff] }
 0x6d7   : > { %3357 = vmatpush.msrb.mxu2 %v3089_v31  ;;  %3377 = vmatpush.msra.mxu3 %v3105_v48  ;;  %v2795_v1 = vsel %vm2788_vm4, %v2794_v15, %v3798_v52  ;;  %v2798_v8 = vsel %vm2788_vm4, %v2797_v5, %v3799_v49  ;;  %v6726_v13 = vpop.permute.xlu1 %3806  ;;  %v3081_v7 = vld [vmem:[%s7277_s12 + $0x2a0] sm:$0xff]  ;;  %v3096_v31 = vld [vmem:[%s7277_s12 + $0x318] sm:$0xff]  ;;  %v2812_v49 = vrot.slane %v6244_v62, 4  ;;  %v3079_v5 = vld [vmem:[%s7277_s12 + $0x290] sm:$0xff] }
 0x6d8   : > { %3310 = vmatmul.f32.vlgmr.msra.gmra.mxu2 %v2795_v1  ;;  %3330 = vmatmul.f32.vlgmr.msrb.gmra.mxu3 %v2798_v8  ;;  %v3809_v32 = vunpack.i.h.bf16 %v6726_v13  ;;  %v3808_v56 = vunpack.i.l.bf16 %v6726_v13  ;;  %v3168_v15 = vld [vmem:[%s7277_s12 + $0x558] sm:$0xff]  ;;  %v3242_v1 = vld [vmem:[%s7277_s12 + $0x7a8] sm:$0xff]  ;;  %v6842_v8 = vpop.permute.xlu2 %3841 }
 0x6d9   : > { %3358 = vmatpush.msrb.mxu2 %v3088_v0  ;;  %3378 = vmatpush.msra.mxu3 %v3104_v4  ;;  %v3095_v4 = vld [vmem:[%s7277_s12 + $0x310] sm:$0xff]  ;;  %v3094_v13 = vld [vmem:[%s7277_s12 + $0x308] sm:$0xff] }
 0x6da   : > { %v6732_v33 = vpop.permute.xlu0 %3801  ;;  %3561 = vmatpush.msrb.mxu1 %v3245_v16  ;;  %v3152_v16 = vld [vmem:[%s7277_s12 + $0x4d8] sm:$0xff] }
 0x6db   : > { %3359 = vmatpush.msrb.mxu2 %v3087_v9  ;;  %3379 = vmatpush.msra.mxu3 %v3103_v12  ;;  %v3804_v42 = vunpack.i.h.bf16 %v6732_v33  ;;  %v3803_v51 = vunpack.i.l.bf16 %v6732_v33  ;;  %v3167_v9 = vld [vmem:[%s7277_s12 + $0x550] sm:$0xff]  ;;  %v3078_v12 = vld [vmem:[%s7277_s12 + $0x288] sm:$0xff] }
 0x6dc   : > { %3562 = vmatpush.msrb.mxu1 %v3244_v22 }
 0x6dd   : > { %v2853_v40 = vsel %vm2150_vm10, %v6244_v62, %v3804_v42  ;;  %3360 = vmatpush.msrb.mxu2 %v3086_v36  ;;  %3380 = vmatpush.msra.mxu3 %v3102_v41  ;;  %v2856_v62 = vsel %vm2150_vm10, %v2812_v49, %v3803_v51  ;;  %v3813_v36 = vunpack.i.l.bf16 %v6705_v57  ;;  %v3093_v42 = vld [vmem:[%s7277_s12 + $0x300] sm:$0xff]  ;;  %v3151_v51 = vld [vmem:[%s7277_s12 + $0x4d0] sm:$0xff] }
 0x6de   : > { %v2854_v54 = vsel %vm2328_vm11, %v2853_v40, %v3809_v32  ;;  %3563 = vmatpush.msrb.mxu1 %v3243_v53  ;;  %v3077_v32 = vld [vmem:[%s7277_s12 + $0x280] sm:$0xff]  ;;  %v2857_v33 = vsel %vm2328_vm11, %v2856_v62, %v3808_v56  ;;  %v3140_v40 = vld [vmem:[%s7277_s12 + $0x478] sm:$0xff] }
 0x6df   : > { %3361 = vmatpush.msrb.mxu2 %v3085_v38  ;;  %3381 = vmatpush.msra.mxu3 %v3101_v61  ;;  %v2855_v17 = vsel %vm2788_vm4, %v2854_v54, %v3814_v60  ;;  %v6778_v30 = vpop.permute.xlu1 %3821  ;;  %v3828_v38 = vunpack.i.l.bf16 %v6770_v37  ;;  %v3165_v60 = vld [vmem:[%s7277_s12 + $0x540] sm:$0xff]  ;;  %v2858_v57 = vsel %vm2788_vm4, %v2857_v33, %v3813_v36  ;;  %v3163_v37 = vld [vmem:[%s7277_s12 + $0x530] sm:$0xff] }
 0x6e0   : > { %3350 = vmatmul.f32.vlgmr.msra.gmra.mxu0 %v2855_v17  ;;  %v3824_v26 = vunpack.i.h.bf16 %v6778_v30  ;;  %v3823_v0 = vunpack.i.l.bf16 %v6778_v30  ;;  %3564 = vmatpush.msrb.mxu1 %v3242_v1  ;;  %v3139_v17 = vld [vmem:[%s7277_s12 + $0x470] sm:$0xff]  ;;  %v6898_v50 = vpop.permute.xlu2 %3856  ;;  %v3154_v30 = vld [vmem:[%s7277_s12 + $0x4e8] sm:$0xff]  ;;  %v3133_v49 = vld [vmem:[%s7277_s12 + $0x440] sm:$0xff] }
 0x6e1   : > { %3362 = vmatpush.msrb.mxu2 %v3084_v6  ;;  %3382 = vmatpush.msra.mxu3 %v3100_v20  ;;  %v3164_v6 = vld [vmem:[%s7277_s12 + $0x538] sm:$0xff]  ;;  %v3157_v56 = vld [vmem:[%s7277_s12 + $0x500] sm:$0xff]  ;;  %v3235_v33 = vld [vmem:[%s7277_s12 + $0x770] sm:$0xff] }
 0x6e2   : > { %3454 = vmatpush.msra.mxu0 %v3172_v19  ;;  %v3817_v34 = vpop.permute.xlu0 %3816  ;;  %v3240_v20 = vld [vmem:[%s7277_s12 + $0x798] sm:$0xff]  ;;  %v3155_v19 = vld [vmem:[%s7277_s12 + $0x4f0] sm:$0xff] }
 0x6e3   : > { %3363 = vmatpush.msrb.mxu2 %v3083_v11  ;;  %3383 = vmatpush.msra.mxu3 %v3099_v14  ;;  %v3819_v35 = vunpack.i.h.bf16 %v3817_v34  ;;  %v3818_v28 = vunpack.i.l.bf16 %v3817_v34  ;;  %v3239_v11 = vld [vmem:[%s7277_s12 + $0x790] sm:$0xff]  ;;  %v3138_v14 = vld [vmem:[%s7277_s12 + $0x468] sm:$0xff]  ;;  %v3153_v34 = vld [vmem:[%s7277_s12 + $0x4e0] sm:$0xff] }
 0x6e4   : > { %3455 = vmatpush.msra.mxu0 %v3171_v58  ;;  %v3162_v58 = vld [vmem:[%s7277_s12 + $0x528] sm:$0xff]  ;;  %v3148_v1 = vld [vmem:[%s7277_s12 + $0x4b8] sm:$0xff] }
 0x6e5   : > { %v2862_v10 = vsel %vm2150_vm10, %v2839_v29, %v3819_v35  ;;  %3364 = vmatpush.msrb.mxu2 %v3082_v2  ;;  %3384 = vmatpush.msra.mxu3 %v3098_v46  ;;  %v2859_v55 = vsel %vm2150_vm10, %v6260_v45, %v3818_v28  ;;  %v3241_v45 = vld [vmem:[%s7277_s12 + $0x7a0] sm:$0xff]  ;;  %v3134_v28 = vld [vmem:[%s7277_s12 + $0x448] sm:$0xff] }
 0x6e6   : > { %3456 = vmatpush.msra.mxu0 %v3170_v23  ;;  %v2863_v48 = vsel %vm2328_vm11, %v2862_v10, %v3824_v26  ;;  %v2860_v3 = vsel %vm2328_vm11, %v2859_v55, %v3823_v0  ;;  %3565 = vmatpush.msrb.mxu1 %v3241_v45  ;;  %v3137_v26 = vld [vmem:[%s7277_s12 + $0x460] sm:$0xff]  ;;  %v3136_v23 = vld [vmem:[%s7277_s12 + $0x458] sm:$0xff]  ;;  %v3859_v0 = vunpack.i.h.bf16 %v6898_v50  ;;  %v2905_v55 = vrot.slane %v6363_v24, 4 }
 0x6e7   : > { %3365 = vmatpush.msrb.mxu2 %v3081_v7  ;;  %3385 = vmatpush.msra.mxu3 %v3097_v39  ;;  %v2864_v52 = vsel %vm2788_vm4, %v2863_v48, %v3829_v63  ;;  %v6866_v41 = vpop.permute.xlu1 %3836  ;;  %v2861_v54 = vsel %vm2788_vm4, %v2860_v3, %v3828_v38  ;;  %v3161_v46 = vld [vmem:[%s7277_s12 + $0x520] sm:$0xff]  ;;  %v3160_v39 = vld [vmem:[%s7277_s12 + $0x518] sm:$0xff]  ;;  %v3135_v63 = vld [vmem:[%s7277_s12 + $0x450] sm:$0xff] }
 0x6e8   : > { %3457 = vmatpush.msra.mxu0 %v3169_v44  ;;  %3566 = vmatpush.msrb.mxu1 %v3240_v20  ;;  %v3237_v35 = vld [vmem:[%s7277_s12 + $0x780] sm:$0xff]  ;;  %v3159_v44 = vld [vmem:[%s7277_s12 + $0x510] sm:$0xff]  ;;  %v3158_v48 = vld [vmem:[%s7277_s12 + $0x508] sm:$0xff] }
 0x6e9   : > { %3366 = vmatpush.msrb.mxu2 %v3080_v27  ;;  %3386 = vmatpush.msra.mxu3 %v3096_v31  ;;  %v3150_v27 = vld [vmem:[%s7277_s12 + $0x4c8] sm:$0xff]  ;;  %v6962_v31 = vpop.permute.xlu2 %3871 }
 0x6ea   : > { %3410 = vmatmul.f32.vlgmr.msrb.gmra.mxu0 %v2864_v52  ;;  %v6873_v61 = vpop.permute.xlu0 %3831  ;;  %3567 = vmatpush.msrb.mxu1 %v3239_v11  ;;  %v3149_v52 = vld [vmem:[%s7277_s12 + $0x4c0] sm:$0xff]  ;;  %v3146_v38 = vld [vmem:[%s7277_s12 + $0x4a8] sm:$0xff]  ;;  %v3128_v11 = vld [vmem:[%s7277_s12 + $0x418] sm:$0xff] }
 0x6eb   : > { %3458 = vmatpush.msra.mxu0 %v3168_v15  ;;  %3367 = vmatpush.msrb.mxu2 %v3079_v5 }
 0x6ec   : > { %3387 = vmatpush.msra.mxu3 %v3095_v4  ;;  %3568 = vmatpush.msrb.mxu1 %v3238_v47  ;;  %v3132_v4 = vld [vmem:[%s7277_s12 + $0x438] sm:$0xff] }
 0x6ed   : > { %3459 = vmatpush.msra.mxu0 %v3167_v9  ;;  %3368 = vmatpush.msrb.mxu2 %v3078_v12  ;;  %v3236_v12 = vld [vmem:[%s7277_s12 + $0x778] sm:$0xff] }
 0x6ee   : > { %3388 = vmatpush.msra.mxu3 %v3094_v13  ;;  %3569 = vmatpush.msrb.mxu1 %v3237_v35  ;;  %v3874_v13 = vunpack.i.h.bf16 %v6962_v31  ;;  %v3232_v47 = vld [vmem:[%s7277_s12 + $0x758] sm:$0xff]  ;;  %v3839_v35 = vunpack.i.h.bf16 %v6866_v41 }
 0x6ef   : > { %3460 = vmatpush.msra.mxu0 %v3166_v21  ;;  %3369 = vmatpush.msrb.mxu2 %v3077_v32  ;;  %v3131_v21 = vld [vmem:[%s7277_s12 + $0x430] sm:$0xff] }
 0x6f0   : > { %3389 = vmatpush.msra.mxu3 %v3093_v42  ;;  %3370 = vmatmul.f32.vlgmr.msrb.gmra.mxu2 %v2858_v57  ;;  %v3130_v42 = vld [vmem:[%s7277_s12 + $0x428] sm:$0xff]  ;;  %v3129_v57 = vld [vmem:[%s7277_s12 + $0x420] sm:$0xff] }
 0x6f1   : > { %3461 = vmatpush.msra.mxu0 %v3165_v60  ;;  %3390 = vmatmul.f32.vlgmr.msra.gmra.mxu3 %v2861_v54  ;;  %v3234_v60 = vld [vmem:[%s7277_s12 + $0x768] sm:$0xff]  ;;  %v3145_v54 = vld [vmem:[%s7277_s12 + $0x4a0] sm:$0xff] }
 0x6f2   : > { %3414 = vmatpush.msra.mxu2 %v3140_v40  ;;  %3434 = vmatpush.msrb.mxu3 %v3156_v18  ;;  %v7022_v18 = vpop.permute.xlu2 %3886 }
 0x6f3   : > { %3462 = vmatpush.msra.mxu0 %v3164_v6  ;;  %v3233_v6 = vld [vmem:[%s7277_s12 + $0x760] sm:$0xff] }
 0x6f4   : > { %3415 = vmatpush.msra.mxu2 %v3139_v17  ;;  %3435 = vmatpush.msrb.mxu3 %v3155_v19  ;;  %v3834_v19 = vunpack.i.h.bf16 %v6873_v61 }
 0x6f5   : > { %3463 = vmatpush.msra.mxu0 %v3163_v37  ;;  %v3833_v37 = vunpack.i.l.bf16 %v6873_v61  ;;  %v2878_v61 = vrot.slane %v6295_v43, 4 }
 0x6f6   : > { %v6924_v2 = vpop.permute.xlu1 %3851  ;;  %3416 = vmatpush.msra.mxu2 %v3138_v14  ;;  %3436 = vmatpush.msrb.mxu3 %v3154_v30  ;;  %v2971_v14 = vrot.slane %v6445_v59, 4 }
 0x6f7   : > { %v6929_v29 = vpop.permute.xlu0 %3846  ;;  %3464 = vmatpush.msra.mxu0 %v3162_v58  ;;  %v3854_v10 = vunpack.i.h.bf16 %v6924_v2  ;;  %v3144_v58 = vld [vmem:[%s7277_s12 + $0x498] sm:$0xff] }
 0x6f8   : > { %v3849_v7 = vunpack.i.h.bf16 %v6929_v29  ;;  %3417 = vmatpush.msra.mxu2 %v3137_v26  ;;  %3437 = vmatpush.msrb.mxu3 %v3153_v34  ;;  %v3889_v26 = vunpack.i.h.bf16 %v7022_v18  ;;  %v3127_v34 = vld [vmem:[%s7277_s12 + $0x410] sm:$0xff] }
 0x6f9   : > { %3465 = vmatpush.msra.mxu0 %v3161_v46 }
 0x6fa   : > { %3418 = vmatpush.msra.mxu2 %v3136_v23  ;;  %3438 = vmatpush.msrb.mxu3 %v3152_v16  ;;  %v2925_v22 = vsel %vm2150_vm10, %v6363_v24, %v3849_v7  ;;  %v3147_v24 = vld [vmem:[%s7277_s12 + $0x4b0] sm:$0xff]  ;;  %v3838_v23 = vunpack.i.l.bf16 %v6866_v41  ;;  %v3126_v41 = vld [vmem:[%s7277_s12 + $0x408] sm:$0xff] }
 0x6fb   : > { %3466 = vmatpush.msra.mxu0 %v3160_v39  ;;  %v2926_v15 = vsel %vm2328_vm11, %v2925_v22, %v3854_v10  ;;  %v3143_v16 = vld [vmem:[%s7277_s12 + $0x490] sm:$0xff]  ;;  %v3230_v22 = vld [vmem:[%s7277_s12 + $0x748] sm:$0xff] }
 0x6fc   : > { %3419 = vmatpush.msra.mxu2 %v3135_v63  ;;  %3439 = vmatpush.msrb.mxu3 %v3151_v51  ;;  %v2927_v45 = vsel %vm2788_vm4, %v2926_v15, %v3859_v0  ;;  %v3231_v7 = vld [vmem:[%s7277_s12 + $0x750] sm:$0xff]  ;;  %v2922_v63 = vsel %vm2150_vm10, %v2878_v61, %v3834_v19  ;;  %v2919_v51 = vsel %vm2150_vm10, %v6295_v43, %v3833_v37  ;;  %v3125_v43 = vld [vmem:[%s7277_s12 + $0x400] sm:$0xff]  ;;  %v3204_v15 = vld [vmem:[%s7277_s12 + $0x678] sm:$0xff] }
 0x6fd   : > { %3467 = vmatpush.msra.mxu0 %v3159_v44  ;;  %v3142_v44 = vld [vmem:[%s7277_s12 + $0x488] sm:$0xff]  ;;  %v3213_v37 = vld [vmem:[%s7277_s12 + $0x6c0] sm:$0xff]  ;;  %v3211_v61 = vld [vmem:[%s7277_s12 + $0x6b0] sm:$0xff] }
 0x6fe   : > { %v6973_v53 = vpop.permute.xlu1 %3866  ;;  %3420 = vmatpush.msra.mxu2 %v3134_v28  ;;  %3440 = vmatpush.msrb.mxu3 %v3150_v27  ;;  %v3141_v28 = vld [vmem:[%s7277_s12 + $0x480] sm:$0xff]  ;;  %v3222_v19 = vld [vmem:[%s7277_s12 + $0x708] sm:$0xff] }
 0x6ff   : > { %v3869_v5 = vunpack.i.h.bf16 %v6973_v53  ;;  %v6980_v62 = vpop.permute.xlu0 %3861  ;;  %3468 = vmatpush.msra.mxu0 %v3158_v48  ;;  %v3229_v27 = vld [vmem:[%s7277_s12 + $0x740] sm:$0xff]  ;;  %v2920_v48 = vsel %vm2328_vm11, %v2919_v51, %v3838_v23  ;;  %v3848_v23 = vunpack.i.l.bf16 %v6929_v29  ;;  %v3853_v51 = vunpack.i.l.bf16 %v6924_v2  ;;  %v3190_v2 = vld [vmem:[%s7277_s12 + $0x608] sm:$0xff] }
 0x700   : > { %v3864_v9 = vunpack.i.h.bf16 %v6980_v62  ;;  %3421 = vmatpush.msra.mxu2 %v3133_v49  ;;  %3441 = vmatpush.msrb.mxu3 %v3149_v52  ;;  %v2923_v49 = vsel %vm2328_vm11, %v2922_v63, %v3839_v35  ;;  %v3844_v52 = vunpack.i.h.bf16 %v6842_v8  ;;  %v3209_v35 = vld [vmem:[%s7277_s12 + $0x6a0] sm:$0xff]  ;;  %v2944_v63 = vrot.slane %v6382_v25, 4 }
 0x701   : > { %3469 = vmatpush.msra.mxu0 %v3157_v56  ;;  %v3843_v56 = vunpack.i.l.bf16 %v6842_v8  ;;  %v3228_v8 = vld [vmem:[%s7277_s12 + $0x738] sm:$0xff]  ;;  %v3868_v29 = vunpack.i.l.bf16 %v6973_v53  ;;  %v3206_v53 = vld [vmem:[%s7277_s12 + $0x688] sm:$0xff] }
 0x702   : > { %v2928_v32 = vsel %vm2150_vm10, %v2905_v55, %v3864_v9  ;;  %3422 = vmatpush.msra.mxu2 %v3132_v4  ;;  %3442 = vmatpush.msrb.mxu3 %v3148_v1  ;;  %v2924_v4 = vsel %vm2788_vm4, %v2923_v49, %v3844_v52  ;;  %v3203_v1 = vld [vmem:[%s7277_s12 + $0x670] sm:$0xff] }
 0x703   : > { %v2929_v36 = vsel %vm2328_vm11, %v2928_v32, %v3869_v5  ;;  %3534 = vmatpush.msrb.mxu0 %v3236_v12  ;;  %v3220_v5 = vld [vmem:[%s7277_s12 + $0x6f8] sm:$0xff]  ;;  %v2921_v0 = vsel %vm2788_vm4, %v2920_v48, %v3843_v56  ;;  %v3219_v55 = vld [vmem:[%s7277_s12 + $0x6f0] sm:$0xff]  ;;  %v3202_v12 = vld [vmem:[%s7277_s12 + $0x668] sm:$0xff]  ;;  %v3873_v48 = vunpack.i.l.bf16 %v6962_v31 }
 0x704   : > { %v2930_v3 = vsel %vm2788_vm4, %v2929_v36, %v3874_v13  ;;  %3470 = vmatmul.f32.vlgmr.msra.gmra.mxu0 %v2927_v45  ;;  %3423 = vmatpush.msra.mxu2 %v3131_v21  ;;  %v3227_v9 = vld [vmem:[%s7277_s12 + $0x730] sm:$0xff]  ;;  %v3218_v13 = vld [vmem:[%s7277_s12 + $0x6e8] sm:$0xff]  ;;  %v3201_v21 = vld [vmem:[%s7277_s12 + $0x660] sm:$0xff] }
 0x705   : > { %3443 = vmatpush.msrb.mxu3 %v3147_v24  ;;  %3535 = vmatpush.msrb.mxu0 %v3235_v33  ;;  %v3226_v45 = vld [vmem:[%s7277_s12 + $0x728] sm:$0xff]  ;;  %v3217_v32 = vld [vmem:[%s7277_s12 + $0x6e0] sm:$0xff]  ;;  %v3200_v33 = vld [vmem:[%s7277_s12 + $0x658] sm:$0xff] }
 0x706   : > { %v7020_v40 = vpop.permute.xlu1 %3881  ;;  %3424 = vmatpush.msra.mxu2 %v3130_v42  ;;  %3490 = vmatmul.f32.vlgmr.msra.gmra.mxu1 %v2930_v3  ;;  %v3225_v24 = vld [vmem:[%s7277_s12 + $0x720] sm:$0xff]  ;;  %v3216_v36 = vld [vmem:[%s7277_s12 + $0x6d8] sm:$0xff] }
 0x707   : > { %v3884_v20 = vunpack.i.h.bf16 %v7020_v40  ;;  %v7031_v17 = vpop.permute.xlu0 %3876  ;;  %3444 = vmatpush.msrb.mxu3 %v3146_v38  ;;  %3536 = vmatpush.msrb.mxu0 %v3234_v60  ;;  %v3224_v3 = vld [vmem:[%s7277_s12 + $0x718] sm:$0xff]  ;;  %v3199_v38 = vld [vmem:[%s7277_s12 + $0x650] sm:$0xff] }
 0x708   : > { %v3879_v30 = vunpack.i.h.bf16 %v7031_v17  ;;  %3425 = vmatpush.msra.mxu2 %v3129_v57  ;;  %v3878_v42 = vunpack.i.l.bf16 %v7031_v17  ;;  %v3215_v60 = vld [vmem:[%s7277_s12 + $0x6d0] sm:$0xff] }
 0x709   : > { %3445 = vmatpush.msrb.mxu3 %v3145_v54  ;;  %3537 = vmatpush.msrb.mxu0 %v3233_v6  ;;  %v3223_v57 = vld [vmem:[%s7277_s12 + $0x710] sm:$0xff]  ;;  %v3883_v54 = vunpack.i.l.bf16 %v7020_v40  ;;  %v3198_v6 = vld [vmem:[%s7277_s12 + $0x648] sm:$0xff]  ;;  %v3197_v40 = vld [vmem:[%s7277_s12 + $0x640] sm:$0xff] }
 0x70a   : > { %v2994_v46 = vsel %vm2150_vm10, %v2971_v14, %v3879_v30  ;;  %3426 = vmatpush.msra.mxu2 %v3128_v11  ;;  %v2991_v17 = vsel %vm2150_vm10, %v6445_v59, %v3878_v42  ;;  %v3221_v59 = vld [vmem:[%s7277_s12 + $0x700] sm:$0xff]  ;;  %v3196_v14 = vld [vmem:[%s7277_s12 + $0x638] sm:$0xff] }
 0x70b   : > { %v2995_v39 = vsel %vm2328_vm11, %v2994_v46, %v3884_v20  ;;  %3446 = vmatpush.msrb.mxu3 %v3144_v58  ;;  %3538 = vmatpush.msrb.mxu0 %v3232_v47  ;;  %v3214_v20 = vld [vmem:[%s7277_s12 + $0x6c8] sm:$0xff]  ;;  %v2992_v11 = vsel %vm2328_vm11, %v2991_v17, %v3883_v54  ;;  %v3212_v30 = vld [vmem:[%s7277_s12 + $0x6b8] sm:$0xff]  ;;  %v3888_v58 = vunpack.i.l.bf16 %v7022_v18  ;;  %v3195_v47 = vld [vmem:[%s7277_s12 + $0x630] sm:$0xff] }
 0x70c   : > { %v2996_v10 = vsel %vm2788_vm4, %v2995_v39, %v3889_v26  ;;  %3427 = vmatpush.msra.mxu2 %v3127_v34  ;;  %v3194_v18 = vld [vmem:[%s7277_s12 + $0x628] sm:$0xff]  ;;  %v3193_v46 = vld [vmem:[%s7277_s12 + $0x620] sm:$0xff]  ;;  %v3208_v39 = vld [vmem:[%s7277_s12 + $0x698] sm:$0xff] }
 0x70d   : > { %3447 = vmatpush.msrb.mxu3 %v3143_v16  ;;  %3539 = vmatpush.msrb.mxu0 %v3231_v7  ;;  %v2993_v26 = vsel %vm2788_vm4, %v2992_v11, %v3888_v58  ;;  %v3210_v34 = vld [vmem:[%s7277_s12 + $0x6a8] sm:$0xff]  ;;  %v3863_v16 = vunpack.i.l.bf16 %v6980_v62  ;;  %v3192_v7 = vld [vmem:[%s7277_s12 + $0x618] sm:$0xff]  ;;  %v3191_v62 = vld [vmem:[%s7277_s12 + $0x610] sm:$0xff] }
 0x70e   : > { %3428 = vmatpush.msra.mxu2 %v3126_v41  ;;  %3570 = vmatmul.f32.vlgmr.msrb.gmra.mxu1 %v2996_v10  ;;  %v3207_v41 = vld [vmem:[%s7277_s12 + $0x690] sm:$0xff]  ;;  %v2985_v10 = vsel %vm2150_vm10, %v6382_v25, %v3848_v23  ;;  %v3205_v25 = vld [vmem:[%s7277_s12 + $0x680] sm:$0xff] }
 0x70f   : > { %3448 = vmatpush.msrb.mxu3 %v3142_v44  ;;  %3540 = vmatpush.msrb.mxu0 %v3230_v22  ;;  %v2988_v44 = vsel %vm2150_vm10, %v2944_v63, %v3863_v16  ;;  %v3189_v22 = vld [vmem:[%s7277_s12 + $0x600] sm:$0xff] }
 0x710   : > { %3429 = vmatpush.msra.mxu2 %v3125_v43  ;;  %v2986_v43 = vsel %vm2328_vm11, %v2985_v10, %v3853_v51 }
 0x711   : > { %3449 = vmatpush.msrb.mxu3 %v3141_v28  ;;  %3541 = vmatpush.msrb.mxu0 %v3229_v27  ;;  %v2989_v28 = vsel %vm2328_vm11, %v2988_v44, %v3868_v29  ;;  %v3858_v27 = vunpack.i.l.bf16 %v6898_v50 }
 0x712   : > { %3430 = vmatmul.f32.vlgmr.msra.gmra.mxu2 %v2921_v0  ;;  %3450 = vmatmul.f32.vlgmr.msrb.gmra.mxu3 %v2924_v4  ;;  %v2990_v52 = vsel %vm2788_vm4, %v2989_v28, %v3873_v48 }
 0x713   : > { %3494 = vmatpush.msrb.mxu2 %v3204_v15  ;;  %3514 = vmatpush.msra.mxu3 %v3220_v5  ;;  %v2987_v49 = vsel %vm2788_vm4, %v2986_v43, %v3858_v27  ;;  %v3253_v15 = vld [vmem:[%s7278_s13] sm:$0x1] }
 0x714   : > { %3542 = vmatpush.msrb.mxu0 %v3228_v8 }
 0x715   : > { %3495 = vmatpush.msrb.mxu2 %v3203_v1  ;;  %3515 = vmatpush.msra.mxu3 %v3219_v55 }
 0x716   : > { %3543 = vmatpush.msrb.mxu0 %v3227_v9 }
 0x717   : > { %3496 = vmatpush.msrb.mxu2 %v3202_v12  ;;  %3516 = vmatpush.msra.mxu3 %v3218_v13 }
 0x718   : > { %3544 = vmatpush.msrb.mxu0 %v3226_v45 }
 0x719   : > { %3497 = vmatpush.msrb.mxu2 %v3201_v21  ;;  %3517 = vmatpush.msra.mxu3 %v3217_v32 }
 0x71a   : > { %3545 = vmatpush.msrb.mxu0 %v3225_v24 }
 0x71b   : > { %3498 = vmatpush.msrb.mxu2 %v3200_v33  ;;  %3518 = vmatpush.msra.mxu3 %v3216_v36 }
 0x71c   : > { %3546 = vmatpush.msrb.mxu0 %v3224_v3 }
 0x71d   : > { %3499 = vmatpush.msrb.mxu2 %v3199_v38  ;;  %3519 = vmatpush.msra.mxu3 %v3215_v60 }
 0x71e   : > { %3547 = vmatpush.msrb.mxu0 %v3223_v57 }
 0x71f   : > { %3500 = vmatpush.msrb.mxu2 %v3198_v6  ;;  %3520 = vmatpush.msra.mxu3 %v3214_v20 }
 0x720   : > { %3548 = vmatpush.msrb.mxu0 %v3222_v19 }
 0x721   : > { %3501 = vmatpush.msrb.mxu2 %v3197_v40  ;;  %3521 = vmatpush.msra.mxu3 %v3213_v37 }
 0x722   : > { %3549 = vmatpush.msrb.mxu0 %v3221_v59 }
 0x723   : > { %3502 = vmatpush.msrb.mxu2 %v3196_v14  ;;  %3522 = vmatpush.msra.mxu3 %v3212_v30 }
 0x724   : > { %3550 = vmatmul.f32.vlgmr.msrb.gmra.mxu0 %v2993_v26 }
 0x725   : > { %3503 = vmatpush.msrb.mxu2 %v3195_v47  ;;  %3523 = vmatpush.msra.mxu3 %v3211_v61 }
 0x727   : > { %3504 = vmatpush.msrb.mxu2 %v3194_v18  ;;  %3524 = vmatpush.msra.mxu3 %v3210_v34 }
 0x729   : > { %3505 = vmatpush.msrb.mxu2 %v3193_v46  ;;  %3525 = vmatpush.msra.mxu3 %v3209_v35 }
 0x72b   : > { %3506 = vmatpush.msrb.mxu2 %v3192_v7  ;;  %3526 = vmatpush.msra.mxu3 %v3208_v39 }
 0x72d   : > { %3507 = vmatpush.msrb.mxu2 %v3191_v62  ;;  %3527 = vmatpush.msra.mxu3 %v3207_v41 }
 0x72f   : > { %3508 = vmatpush.msrb.mxu2 %v3190_v2  ;;  %3528 = vmatpush.msra.mxu3 %v3206_v53 }
 0x731   : > { %3509 = vmatpush.msrb.mxu2 %v3189_v22  ;;  %3529 = vmatpush.msra.mxu3 %v3205_v25 }
 0x732   : > { %3510 = vmatmul.f32.vlgmr.msrb.gmra.mxu2 %v2987_v49  ;;  %3530 = vmatmul.f32.vlgmr.msra.gmra.mxu3 %v2990_v52 }
 0x753   : > { %v3271_v56 = vpop.f32.mrf.mxu2  ;;  %v3291_v5 = vpop.f32.mrf.mxu3 }
 0x754   : > { %v3272_v0 = vadd.f32 %v3271_v56, %v3253_v15 }
 0x756   : > { %v3292_v4 = vadd.f32 %v3291_v5, %v3272_v0 }
 0x75b   : > { %v3311_v50 = vpop.f32.mrf.mxu2  ;;  %v3331_v8 = vpop.f32.mrf.mxu3 }
 0x75c   : > { %v3312_v31 = vadd.f32 %v3311_v50, %v3292_v4 }
 0x75d   : > { %v3351_v55 = vpop.f32.mrf.mxu0 }
 0x75e   : > { %v3332_v1 = vadd.f32 %v3331_v8, %v3312_v31 }
 0x760   : > { %v3352_v12 = vadd.f32 %v3351_v55, %v3332_v1 }
 0x767   : > { %v3411_v32 = vpop.f32.mrf.mxu0 }
 0x773   : > { %v3371_v9 = vpop.f32.mrf.mxu2 }
 0x774   : > { %v3372_v13 = vadd.f32 %v3371_v9, %v3352_v12  ;;  %v3391_v45 = vpop.f32.mrf.mxu3 }
 0x776   : > { %v3392_v21 = vadd.f32 %v3391_v45, %v3372_v13 }
 0x778   : > { %v3412_v33 = vadd.f32 %v3411_v32, %v3392_v21 }
 0x781   : > { %v3471_v38 = vpop.f32.mrf.mxu0 }
 0x783   : > { %v3491_v57 = vpop.f32.mrf.mxu1 }
 0x78b   : > { %v3571_v59 = vpop.f32.mrf.mxu1 }
 0x795   : > { %v3431_v24 = vpop.f32.mrf.mxu2  ;;  %v3451_v42 = vpop.f32.mrf.mxu3 }
 0x796   : > { %v3432_v36 = vadd.f32 %v3431_v24, %v3412_v33 }
 0x798   : > { %v3452_v3 = vadd.f32 %v3451_v42, %v3432_v36 }
 0x79a   : > { %v3472_v60 = vadd.f32 %v3471_v38, %v3452_v3 }
 0x79c   : > { %v3492_v54 = vadd.f32 %v3491_v57, %v3472_v60 }
 0x7a1   : > { %v3551_v40 = vpop.f32.mrf.mxu0 }
 0x7b5   : > { %v3511_v6 = vpop.f32.mrf.mxu2  ;;  %v3531_v17 = vpop.f32.mrf.mxu3 }
 0x7b6   : > { %v3512_v20 = vadd.f32 %v3511_v6, %v3492_v54 }
 0x7b8   : > { %v3532_v19 = vadd.f32 %v3531_v17, %v3512_v20 }
 0x7ba   : > { %v3552_v37 = vadd.f32 %v3551_v40, %v3532_v19 }
 0x7bc   : > { %v3572_v11 = vadd.f32 %v3571_v59, %v3552_v37 }
 0x7be   : > { %3575 = vst.msk [vmem:[%s457_s2] sm:$0x1] %vm3574_vm5, %v3572_v11 }
 0x7bf   : > { %4015 = shalt.err (!%p4012_p3)
}
 0x7c0   : > { %3724 = dma.vmem_to_hbm [thread:$0]  (%p4169_p5), %s3588_s0, 16, %s3590_s21, %s3577_s25  }
 0x7c1 PF: > { %p3730_p4 = scmp.ge.s32.totalorder %s4050_s16, 2  ;;  %s3601_s22 = sand.u32 1, %s4038_s29  }
 0x7c2   : > { %s3602_s28 = scalar_lea.sflag [#allocation3], %s3601_s22 }
 0x7c3   : > { %p3727_p7 = pnand %p3730_p4, %p4173_p6 }
 0x7c5   : > { %p3728_p8 = pneg %p3727_p7 }
 0x7c7   : > { %4033 = dma.done.wait (%p3728_p8), %s3602_s28, 16  }
 0x7c8   : > { %4035 = vsyncadd (%p3728_p8), %s3602_s28, 4294967280  ;;  %s7311_s16 = sld [smem:[#allocation6_spill]]  ;;  %s7314_s29 = smov %s4042_s30 }
 0x7c9   : > { %s7312_s1 = sld [smem:[#allocation5_spill]] }
 0x7ca   : > { %s7313_s15 = sld [smem:[#allocation7_spill]] }
 0x7ce   : > { %p24_p9 = scmp.ge.s32.totalorder %s7311_s16, 4  }
 0x7cf   : > { %s7315_s30 = smov %s7312_s1 }
 0x7d0   :  { %26 = sbr.rel (!%p24_p9) target bundleno = 7 (0x7), region = 111 }
 0x7d5   :  { %3607 = vsyncpa [#allocation3], 1 }
 0x7d6   :  { %3609 = vsyncpa [#allocation3 + $0x1], 1 }

</bundles_post_ra>
